<compile_context>
chip_gen: v7x
topology: tpu7x:2x2x1
jax: 0.10.0
libtpu: 0.0.40
codegen_flags: <defaults>
</compile_context>

<pallas_src>
import jax
import jax.numpy as jnp
from jax.experimental import pallas as pl
from jax.experimental.pallas import tpu as pltpu


_INV_SQRT2 = 0.7071067811865476


def _gelu_exact(x):
    # nn.GELU() default = exact (erf-based) GELU
    return 0.5 * x * (1.0 + jax.lax.erf(x * _INV_SQRT2))


def _layernorm(x, gamma, beta, eps=1e-5):
    # Fused single-pass statistics: var = E[x^2] - mean^2 (one traversal of x).
    mean = jnp.mean(x, axis=-1, keepdims=True)
    mean_sq = jnp.mean(x * x, axis=-1, keepdims=True)
    var = jnp.maximum(mean_sq - mean * mean, 0.0)
    return (x - mean) * jax.lax.rsqrt(var + eps) * gamma + beta


def mixer_block_kernel(
    x_ref,                     # (Bt, Pp, C)
    g1_ref, b1_ref,            # LayerNorm1: (1, C) f32
    w1d_ref, tb1_ref,          # block-diag token Linear1: (Bt*token_dim, Bt*Pp), (Bt*token_dim, 1)
    w2d_ref, tb2_ref,          # block-diag token Linear2: (Bt*Pp, Bt*token_dim), (Bt*Pp, 1)
    g2_ref, b2_ref,            # LayerNorm2: (1, C) f32
    cw1t_ref, cb1_ref,         # channel Linear1 (pre-transposed): (C, channel_dim), (1, channel_dim)
    cw2t_ref, cb2_ref,         # channel Linear2 (pre-transposed): (channel_dim, C), (1, C)
    out_ref,                   # (Bt, Pp, C)
):
    bt, pp, c = x_ref.shape

    # Small parameter loads hoisted once per grid step.
    g1 = g1_ref[...]
    b1 = b1_ref[...]
    g2 = g2_ref[...]
    b2 = b2_ref[...]
    w1d = w1d_ref[...]          # (Bt*token_dim, Bt*Pp)  mm dtype
    tb1 = tb1_ref[...]          # (Bt*token_dim, 1)      f32
    w2d = w2d_ref[...]          # (Bt*Pp, Bt*token_dim)  mm dtype
    tb2 = tb2_ref[...]          # (Bt*Pp, 1)             f32
    cw1t = cw1t_ref[...]        # (C, channel_dim)
    cb1 = cb1_ref[...]          # (1, channel_dim)
    cw2t = cw2t_ref[...]        # (channel_dim, C)
    cb2 = cb2_ref[...]          # (1, C)

    mm_dtype = w1d.dtype        # bf16 matmul operands, f32 accumulation

    # Layout-preserving flatten (Pp % 8 == 0 guaranteed by the wrapper).
    x2 = x_ref[...].reshape(bt * pp, c).astype(jnp.float32)

    # ---- token mixing: ONE matmul pair for the whole batch block ------------
    # Row ordering of x2 is (b, p); the block-diagonal weights keep that row
    # ordering through the token FF, so no transposes / relayouts are needed.
    y = _layernorm(x2, g1, b1)                                            # (Bt*Pp, C)
    h = jnp.dot(w1d, y.astype(mm_dtype),
                preferred_element_type=jnp.float32)                       # (Bt*token_dim, C)
    h = _gelu_exact(h + tb1)                                              # bias + exact GELU
    tok = jnp.dot(w2d, h.astype(mm_dtype),
                  preferred_element_type=jnp.float32)                     # (Bt*Pp, C)
    px = x2 + tok + tb2

    # ---- channel mixing: all Bt*Pp rows in one matmul pair ------------------
    z = _layernorm(px, g2, b2)                                            # (Bt*Pp, C)
    h2 = jnp.dot(z.astype(mm_dtype), cw1t,
                 preferred_element_type=jnp.float32)                      # (Bt*Pp, channel_dim)
    h2 = _gelu_exact(h2 + cb1)
    ch = jnp.dot(h2.astype(mm_dtype), cw2t,
                 preferred_element_type=jnp.float32)                      # (Bt*Pp, C)
    cx = px + ch + cb2

    out_ref[...] = cx.reshape(bt, pp, c).astype(out_ref.dtype)


def _tpu_hw():
    """Return (generation, per-core VMEM bytes); conservative defaults if unknown."""
    vmem_cap = 64 * 1024 * 1024            # v7x per-TensorCore value = safe floor
    gen = 6
    try:
        info = pltpu.get_tpu_info()
        cap = getattr(info, "vmem_capacity_bytes", None)
        if cap:
            vmem_cap = int(cap)
    except Exception:
        pass
    try:
        kind = jax.devices()[0].device_kind.lower()
        for g in (7, 6, 5, 4):
            if ("v%d" % g) in kind:
                gen = g
                break
    except Exception:
        pass
    return gen, vmem_cap


def _est_vmem_bytes(bb, pp, c, token_dim, channel_dim, x_itemsize, mm_bytes):
    """Conservative per-step VMEM estimate (weights assumed double-buffered)."""
    rows = bb * pp
    f32 = 4
    io = 2 * 2 * rows * c * x_itemsize                          # x + out blocks, 2 bufs
    w_tok = 2 * mm_bytes * 2 * (bb * token_dim) * (bb * pp)     # block-diag W1 + W2
    w_ch = 2 * mm_bytes * 2 * c * channel_dim                   # cw1t + cw2t
    small = 2 * f32 * (6 * c + channel_dim + bb * token_dim + bb * pp)
    interm = f32 * (5 * rows * c + 2 * bb * token_dim * c + 2 * rows * channel_dim)
    return io + w_tok + w_ch + small + interm


def _choose_block_b(B, est_fn, budget, min_grid):
    divisors = [d for d in range(B, 0, -1) if B % d == 0]
    for want_grid in (min_grid, 2, 1):
        for d in divisors:
            if B // d >= want_grid and est_fn(d) <= budget:
                return d
    return 1


def mixer_block(x, params, *, block_b=None, use_bf16=True):
    B, P, C = x.shape
    (g1, b1, tw1, tb1, tw2, tb2, g2, b2, cw1, cb1, cw2, cb2) = params
    token_dim = tw1.shape[0]
    channel_dim = cw1.shape[0]

    gen, vmem_cap = _tpu_hw()
    # 75% of per-core VMEM => ~48 MiB on v7x (64 MiB/TC), ~96 MiB on v5e/v6e.
    budget = min(int(0.75 * vmem_cap), 100 * 1024 * 1024)
    min_grid = 4 if gen >= 7 else 2        # >=2 steps per TensorCore on v7x megacore

    # ---- pad num_patch up to a multiple of 8 (sublane alignment) ------------
    Pp = ((P + 7) // 8) * 8
    if Pp != P:
        x_p = jnp.pad(x, ((0, 0), (0, Pp - P), (0, 0)))
        tw1_p = jnp.pad(tw1, ((0, 0), (0, Pp - P)))      # zero cols -> padded rows inert
        tw2_p = jnp.pad(tw2, ((0, Pp - P), (0, 0)))      # zero rows -> padded out rows = 0
        tb2_p = jnp.pad(tb2.reshape(-1), (0, Pp - P))
    else:
        x_p, tw1_p, tw2_p, tb2_p = x, tw1, tw2, tb2.reshape(-1)

    mm_dtype = jnp.bfloat16 if use_bf16 else jnp.float32
    mm_bytes = jnp.dtype(mm_dtype).itemsize

    def est(bb):
        return _est_vmem_bytes(bb, Pp, C, token_dim, channel_dim,
                               x.dtype.itemsize, mm_bytes)

    if block_b is None:
        block_b = _choose_block_b(B, est, budget, min_grid)
    assert B % block_b == 0, "batch must be divisible by block_b"
    bb = block_b
    grid_b = B // bb

    # ---- one-time weight prep OUTSIDE the kernel -----------------------------
    eye = jnp.eye(bb, dtype=jnp.float32)
    w1d = jnp.kron(eye, tw1_p).astype(mm_dtype)          # (bb*token_dim, bb*Pp)
    w2d = jnp.kron(eye, tw2_p).astype(mm_dtype)          # (bb*Pp, bb*token_dim)
    tb1_k = jnp.tile(tb1.reshape(-1), bb).reshape(bb * token_dim, 1).astype(jnp.float32)
    tb2_k = jnp.tile(tb2_p, bb).reshape(bb * Pp, 1).astype(jnp.float32)
    cw1t_k = cw1.T.astype(mm_dtype)                      # (C, channel_dim)
    cw2t_k = cw2.T.astype(mm_dtype)                      # (channel_dim, C)
    g1_k = g1.reshape(1, C).astype(jnp.float32)
    b1_k = b1.reshape(1, C).astype(jnp.float32)
    g2_k = g2.reshape(1, C).astype(jnp.float32)
    b2_k = b2.reshape(1, C).astype(jnp.float32)
    cb1_k = cb1.reshape(1, channel_dim).astype(jnp.float32)
    cb2_k = cb2.reshape(1, C).astype(jnp.float32)

    est_b = est(bb)
    vmem_limit = int(min(budget, max(2 * est_b, 16 * 1024 * 1024)))

    def _call(single_buffer_weights):
        def const_spec(arr):
            nd = arr.ndim
            imap = lambda b: (0,) * nd
            if single_buffer_weights:
                try:
                    # Constant index_map across the grid -> no need to double-buffer.
                    return pl.BlockSpec(arr.shape, imap, pipeline_mode=pl.Buffered(1))
                except Exception:
                    pass
            return pl.BlockSpec(arr.shape, imap)

        return pl.pallas_call(
            mixer_block_kernel,
            out_shape=jax.ShapeDtypeStruct((B, Pp, C), x.dtype),
            grid_spec=pltpu.PrefetchScalarGridSpec(
                num_scalar_prefetch=0,
                grid=(grid_b,),
                in_specs=[
                    pl.BlockSpec((bb, Pp, C), lambda b: (b, 0, 0)),
                    const_spec(g1_k), const_spec(b1_k),
                    const_spec(w1d), const_spec(tb1_k),
                    const_spec(w2d), const_spec(tb2_k),
                    const_spec(g2_k), const_spec(b2_k),
                    const_spec(cw1t_k), const_spec(cb1_k),
                    const_spec(cw2t_k), const_spec(cb2_k),
                ],
                out_specs=pl.BlockSpec((bb, Pp, C), lambda b: (b, 0, 0)),
            ),
            compiler_params=pltpu.CompilerParams(
                dimension_semantics=("parallel",),      # shard batch blocks across TCs
                vmem_limit_bytes=vmem_limit,
            ),
        )(x_p, g1_k, b1_k, w1d, tb1_k, w2d, tb2_k, g2_k, b2_k,
          cw1t_k, cb1_k, cw2t_k, cb2_k)

    try:
        out = _call(True)
    except Exception:
        # Single-buffered weights (pl.Buffered(1)) unsupported in this JAX /
        # Mosaic build -> fall back to default double-buffered resident weights.
        out = _call(False)

    if Pp != P:
        out = out[:, :P, :]
    return out


def mixer_block_ref(x, params):
    """Pure-JAX f32 reference (mirrors PyTorch semantics exactly)."""
    (g1, b1, tw1, tb1, tw2, tb2, g2, b2, cw1, cb1, cw2, cb2) = params

    def ln(v, g, bta):
        m = jnp.mean(v, axis=-1, keepdims=True)
        va = jnp.mean((v - m) ** 2, axis=-1, keepdims=True)
        return (v - m) / jnp.sqrt(va + 1e-5) * g + bta

    y = ln(x, g1[0], b1[0])
    yt = jnp.transpose(y, (0, 2, 1))                      # b p c -> b c p
    h = _gelu_exact(yt @ tw1.T + tb1[0])
    t = h @ tw2.T + tb2[0]
    px = x + jnp.transpose(t, (0, 2, 1))                  # b c p -> b p c

    z = ln(px, g2[0], b2[0])
    h2 = _gelu_exact(z @ cw1.T + cb1[0])
    c = h2 @ cw2.T + cb2[0]
    return px + c


def init_params(key, dim, num_patch, token_dim, channel_dim):
    ks = jax.random.split(key, 8)
    scale = 0.02
    g1 = jnp.ones((1, dim), jnp.float32)
    b1 = jnp.zeros((1, dim), jnp.float32)
    tw1 = scale * jax.random.normal(ks[0], (token_dim, num_patch), jnp.float32)
    tb1 = scale * jax.random.normal(ks[1], (1, token_dim), jnp.float32)
    tw2 = scale * jax.random.normal(ks[2], (num_patch, token_dim), jnp.float32)
    tb2 = scale * jax.random.normal(ks[3], (1, num_patch), jnp.float32)
    g2 = jnp.ones((1, dim), jnp.float32)
    b2 = jnp.zeros((1, dim), jnp.float32)
    cw1 = scale * jax.random.normal(ks[4], (channel_dim, dim), jnp.float32)
    cb1 = scale * jax.random.normal(ks[5], (1, channel_dim), jnp.float32)
    cw2 = scale * jax.random.normal(ks[6], (dim, channel_dim), jnp.float32)
    cb2 = scale * jax.random.normal(ks[7], (1, dim), jnp.float32)
    return (g1, b1, tw1, tb1, tw2, tb2, g2, b2, cw1, cb1, cw2, cb2)


if __name__ == "__main__":
    key = jax.random.PRNGKey(0)
    kx, kp, kx2, kp2 = jax.random.split(key, 4)

    # Case 1: lane/sublane-aligned shapes (C, token_dim, channel_dim multiples
    # of 128; P a multiple of 8).
    B, P, C = 8, 16, 128               # batch, num_patch, dim
    token_dim, channel_dim = 128, 256
    x = jax.random.normal(kx, (B, P, C), jnp.float32)
    params = init_params(kp, C, P, token_dim, channel_dim)
    ref = mixer_block_ref(x, params)

    out = jax.block_until_ready(mixer_block(x, params))            # bf16 matmuls
    assert out.shape == (B, P, C)
    assert jnp.allclose(out, ref, atol=2e-2, rtol=2e-2), "bf16 path mismatch vs reference"

    out_f32 = jax.block_until_ready(mixer_block(x, params, use_bf16=False))
    assert jnp.allclose(out_f32, ref, atol=3e-4, rtol=3e-4), "f32 path mismatch vs reference"

    # Case 2: non-multiple-of-8 num_patch (exercises the P-padding path).
    B2, P2, C2 = 4, 12, 128
    td2, cd2 = 64, 128
    x2 = jax.random.normal(kx2, (B2, P2, C2), jnp.float32)
    params2 = init_params(kp2, C2, P2, td2, cd2)
    ref2 = mixer_block_ref(x2, params2)
    out2 = jax.block_until_ready(mixer_block(x2, params2))
    assert out2.shape == (B2, P2, C2)
    assert jnp.allclose(out2, ref2, atol=2e-2, rtol=2e-2), "padded-P path mismatch vs reference"

    print("KERNEL_OK")
</pallas_src>

<mosaic_0001>
module attributes {stable_mosaic.version = 11 : i64} {
  func.func @mixer_block_kernel(%arg0: i32, %arg1: memref<4x16x128xf32, #tpu.memory_space<vmem>>, %arg2: memref<1x128xf32, #tpu.memory_space<vmem>>, %arg3: memref<1x128xf32, #tpu.memory_space<vmem>>, %arg4: memref<512x64xbf16, #tpu.memory_space<vmem>>, %arg5: memref<512x1xf32, #tpu.memory_space<vmem>>, %arg6: memref<64x512xbf16, #tpu.memory_space<vmem>>, %arg7: memref<64x1xf32, #tpu.memory_space<vmem>>, %arg8: memref<1x128xf32, #tpu.memory_space<vmem>>, %arg9: memref<1x128xf32, #tpu.memory_space<vmem>>, %arg10: memref<128x256xbf16, #tpu.memory_space<vmem>>, %arg11: memref<1x256xf32, #tpu.memory_space<vmem>>, %arg12: memref<256x128xbf16, #tpu.memory_space<vmem>>, %arg13: memref<1x128xf32, #tpu.memory_space<vmem>>, %arg14: memref<4x16x128xf32, #tpu.memory_space<vmem>>) attributes {dimension_semantics = [#tpu.dimension_semantics<parallel>], iteration_bounds = array<i64: 2>, scalar_prefetch = 0 : i64, scratch_operands = 0 : i64, tpu.core_type = #tpu.core_type<tc>, window_params = [{transform_indices = @transform_0, window_bounds = array<i64: 4, 16, 128>}, {pipeline_mode = #tpu.pipeline_mode<synchronous>, transform_indices = @transform_1, window_bounds = array<i64: 1, 128>}, {pipeline_mode = #tpu.pipeline_mode<synchronous>, transform_indices = @transform_2, window_bounds = array<i64: 1, 128>}, {pipeline_mode = #tpu.pipeline_mode<synchronous>, transform_indices = @transform_3, window_bounds = array<i64: 512, 64>}, {pipeline_mode = #tpu.pipeline_mode<synchronous>, transform_indices = @transform_4, window_bounds = array<i64: 512, 1>}, {pipeline_mode = #tpu.pipeline_mode<synchronous>, transform_indices = @transform_5, window_bounds = array<i64: 64, 512>}, {pipeline_mode = #tpu.pipeline_mode<synchronous>, transform_indices = @transform_6, window_bounds = array<i64: 64, 1>}, {pipeline_mode = #tpu.pipeline_mode<synchronous>, transform_indices = @transform_7, window_bounds = array<i64: 1, 128>}, {pipeline_mode = #tpu.pipeline_mode<synchronous>, transform_indices = @transform_8, window_bounds = array<i64: 1, 128>}, {pipeline_mode = #tpu.pipeline_mode<synchronous>, transform_indices = @transform_9, window_bounds = array<i64: 128, 256>}, {pipeline_mode = #tpu.pipeline_mode<synchronous>, transform_indices = @transform_10, window_bounds = array<i64: 1, 256>}, {pipeline_mode = #tpu.pipeline_mode<synchronous>, transform_indices = @transform_11, window_bounds = array<i64: 256, 128>}, {pipeline_mode = #tpu.pipeline_mode<synchronous>, transform_indices = @transform_12, window_bounds = array<i64: 1, 128>}, {transform_indices = @transform_13, window_bounds = array<i64: 4, 16, 128>}]} {
    %c0 = arith.constant 0 : index
    %c0_0 = arith.constant 0 : index
    %0 = vector.load %arg2[%c0, %c0_0] : memref<1x128xf32, #tpu.memory_space<vmem>>, vector<1x128xf32>
    %c0_1 = arith.constant 0 : index
    %c0_2 = arith.constant 0 : index
    %1 = vector.load %arg3[%c0_1, %c0_2] : memref<1x128xf32, #tpu.memory_space<vmem>>, vector<1x128xf32>
    %c0_3 = arith.constant 0 : index
    %c0_4 = arith.constant 0 : index
    %2 = vector.load %arg8[%c0_3, %c0_4] : memref<1x128xf32, #tpu.memory_space<vmem>>, vector<1x128xf32>
    %c0_5 = arith.constant 0 : index
    %c0_6 = arith.constant 0 : index
    %3 = vector.load %arg9[%c0_5, %c0_6] : memref<1x128xf32, #tpu.memory_space<vmem>>, vector<1x128xf32>
    %c0_7 = arith.constant 0 : index
    %c0_8 = arith.constant 0 : index
    %4 = vector.load %arg4[%c0_7, %c0_8] : memref<512x64xbf16, #tpu.memory_space<vmem>>, vector<512x64xbf16>
    %c0_9 = arith.constant 0 : index
    %c0_10 = arith.constant 0 : index
    %5 = vector.load %arg5[%c0_9, %c0_10] : memref<512x1xf32, #tpu.memory_space<vmem>>, vector<512x1xf32>
    %c0_11 = arith.constant 0 : index
    %c0_12 = arith.constant 0 : index
    %6 = vector.load %arg6[%c0_11, %c0_12] : memref<64x512xbf16, #tpu.memory_space<vmem>>, vector<64x512xbf16>
    %c0_13 = arith.constant 0 : index
    %c0_14 = arith.constant 0 : index
    %7 = vector.load %arg7[%c0_13, %c0_14] : memref<64x1xf32, #tpu.memory_space<vmem>>, vector<64x1xf32>
    %c0_15 = arith.constant 0 : index
    %c0_16 = arith.constant 0 : index
    %8 = vector.load %arg10[%c0_15, %c0_16] : memref<128x256xbf16, #tpu.memory_space<vmem>>, vector<128x256xbf16>
    %c0_17 = arith.constant 0 : index
    %c0_18 = arith.constant 0 : index
    %9 = vector.load %arg11[%c0_17, %c0_18] : memref<1x256xf32, #tpu.memory_space<vmem>>, vector<1x256xf32>
    %c0_19 = arith.constant 0 : index
    %c0_20 = arith.constant 0 : index
    %10 = vector.load %arg12[%c0_19, %c0_20] : memref<256x128xbf16, #tpu.memory_space<vmem>>, vector<256x128xbf16>
    %c0_21 = arith.constant 0 : index
    %c0_22 = arith.constant 0 : index
    %11 = vector.load %arg13[%c0_21, %c0_22] : memref<1x128xf32, #tpu.memory_space<vmem>>, vector<1x128xf32>
    %c0_23 = arith.constant 0 : index
    %c0_24 = arith.constant 0 : index
    %c0_25 = arith.constant 0 : index
    %12 = vector.load %arg1[%c0_23, %c0_24, %c0_25] : memref<4x16x128xf32, #tpu.memory_space<vmem>>, vector<4x16x128xf32>
    %13 = vector.shape_cast %12 : vector<4x16x128xf32> to vector<64x128xf32>
    %cst = arith.constant dense<0.000000e+00> : vector<64xf32>
    %14 = vector.multi_reduction <add>, %13, %cst [1] : vector<64x128xf32> to vector<64xf32>
    %15 = vector.shape_cast %14 : vector<64xf32> to vector<64x1xf32>
    %cst_26 = arith.constant 1.280000e+02 : f32
    %16 = vector.broadcast %cst_26 : f32 to vector<64x1xf32>
    %17 = arith.divf %15, %16 : vector<64x1xf32>
    %18 = arith.mulf %13, %13 : vector<64x128xf32>
    %cst_27 = arith.constant dense<0.000000e+00> : vector<64xf32>
    %19 = vector.multi_reduction <add>, %18, %cst_27 [1] : vector<64x128xf32> to vector<64xf32>
    %20 = vector.shape_cast %19 : vector<64xf32> to vector<64x1xf32>
    %cst_28 = arith.constant 1.280000e+02 : f32
    %21 = vector.broadcast %cst_28 : f32 to vector<64x1xf32>
    %22 = arith.divf %20, %21 : vector<64x1xf32>
    %23 = arith.mulf %17, %17 : vector<64x1xf32>
    %24 = arith.subf %22, %23 : vector<64x1xf32>
    %cst_29 = arith.constant 0.000000e+00 : f32
    %25 = vector.broadcast %cst_29 : f32 to vector<64x1xf32>
    %26 = arith.maximumf %24, %25 : vector<64x1xf32>
    %27 = vector.broadcast %17 : vector<64x1xf32> to vector<64x128xf32>
    %28 = arith.subf %13, %27 : vector<64x128xf32>
    %cst_30 = arith.constant 9.99999974E-6 : f32
    %29 = vector.broadcast %cst_30 : f32 to vector<64x1xf32>
    %30 = arith.addf %26, %29 : vector<64x1xf32>
    %31 = math.rsqrt %30 : vector<64x1xf32>
    %32 = vector.broadcast %31 : vector<64x1xf32> to vector<64x128xf32>
    %33 = arith.mulf %28, %32 : vector<64x128xf32>
    %34 = vector.broadcast %0 : vector<1x128xf32> to vector<64x128xf32>
    %35 = arith.mulf %33, %34 : vector<64x128xf32>
    %36 = vector.broadcast %1 : vector<1x128xf32> to vector<64x128xf32>
    %37 = arith.addf %35, %36 : vector<64x128xf32>
    %38 = arith.truncf %37 : vector<64x128xf32> to vector<64x128xbf16>
    %cst_31 = arith.constant dense<0.000000e+00> : vector<512x128xf32>
    %39 = tpu.matmul %4, %38, %cst_31 {dimension_numbers = #tpu.dot_dimension_numbers<[1], [0], [0], [1], [0, 0, 1, 1], [], []>} : vector<512x64xbf16>, vector<64x128xbf16>, vector<512x128xf32> -> vector<512x128xf32>
    %40 = vector.broadcast %5 : vector<512x1xf32> to vector<512x128xf32>
    %41 = arith.addf %39, %40 : vector<512x128xf32>
    %cst_32 = arith.constant 5.000000e-01 : f32
    %42 = vector.broadcast %cst_32 : f32 to vector<512x128xf32>
    %43 = arith.mulf %42, %41 : vector<512x128xf32>
    %cst_33 = arith.constant 0.707106769 : f32
    %44 = vector.broadcast %cst_33 : f32 to vector<512x128xf32>
    %45 = arith.mulf %41, %44 : vector<512x128xf32>
    %46 = math.erf %45 : vector<512x128xf32>
    %cst_34 = arith.constant 1.000000e+00 : f32
    %47 = vector.broadcast %cst_34 : f32 to vector<512x128xf32>
    %48 = arith.addf %47, %46 : vector<512x128xf32>
    %49 = arith.mulf %43, %48 : vector<512x128xf32>
    %50 = arith.truncf %49 : vector<512x128xf32> to vector<512x128xbf16>
    %cst_35 = arith.constant dense<0.000000e+00> : vector<64x128xf32>
    %51 = tpu.matmul %6, %50, %cst_35 {dimension_numbers = #tpu.dot_dimension_numbers<[1], [0], [0], [1], [0, 0, 1, 1], [], []>} : vector<64x512xbf16>, vector<512x128xbf16>, vector<64x128xf32> -> vector<64x128xf32>
    %52 = arith.addf %13, %51 : vector<64x128xf32>
    %53 = vector.broadcast %7 : vector<64x1xf32> to vector<64x128xf32>
    %54 = arith.addf %52, %53 : vector<64x128xf32>
    %cst_36 = arith.constant dense<0.000000e+00> : vector<64xf32>
    %55 = vector.multi_reduction <add>, %54, %cst_36 [1] : vector<64x128xf32> to vector<64xf32>
    %56 = vector.shape_cast %55 : vector<64xf32> to vector<64x1xf32>
    %cst_37 = arith.constant 1.280000e+02 : f32
    %57 = vector.broadcast %cst_37 : f32 to vector<64x1xf32>
    %58 = arith.divf %56, %57 : vector<64x1xf32>
    %59 = arith.mulf %54, %54 : vector<64x128xf32>
    %cst_38 = arith.constant dense<0.000000e+00> : vector<64xf32>
    %60 = vector.multi_reduction <add>, %59, %cst_38 [1] : vector<64x128xf32> to vector<64xf32>
    %61 = vector.shape_cast %60 : vector<64xf32> to vector<64x1xf32>
    %cst_39 = arith.constant 1.280000e+02 : f32
    %62 = vector.broadcast %cst_39 : f32 to vector<64x1xf32>
    %63 = arith.divf %61, %62 : vector<64x1xf32>
    %64 = arith.mulf %58, %58 : vector<64x1xf32>
    %65 = arith.subf %63, %64 : vector<64x1xf32>
    %cst_40 = arith.constant 0.000000e+00 : f32
    %66 = vector.broadcast %cst_40 : f32 to vector<64x1xf32>
    %67 = arith.maximumf %65, %66 : vector<64x1xf32>
    %68 = vector.broadcast %58 : vector<64x1xf32> to vector<64x128xf32>
    %69 = arith.subf %54, %68 : vector<64x128xf32>
    %cst_41 = arith.constant 9.99999974E-6 : f32
    %70 = vector.broadcast %cst_41 : f32 to vector<64x1xf32>
    %71 = arith.addf %67, %70 : vector<64x1xf32>
    %72 = math.rsqrt %71 : vector<64x1xf32>
    %73 = vector.broadcast %72 : vector<64x1xf32> to vector<64x128xf32>
    %74 = arith.mulf %69, %73 : vector<64x128xf32>
    %75 = vector.broadcast %2 : vector<1x128xf32> to vector<64x128xf32>
    %76 = arith.mulf %74, %75 : vector<64x128xf32>
    %77 = vector.broadcast %3 : vector<1x128xf32> to vector<64x128xf32>
    %78 = arith.addf %76, %77 : vector<64x128xf32>
    %79 = arith.truncf %78 : vector<64x128xf32> to vector<64x128xbf16>
    %cst_42 = arith.constant dense<0.000000e+00> : vector<64x256xf32>
    %80 = tpu.matmul %79, %8, %cst_42 {dimension_numbers = #tpu.dot_dimension_numbers<[1], [0], [0], [1], [0, 0, 1, 1], [], []>} : vector<64x128xbf16>, vector<128x256xbf16>, vector<64x256xf32> -> vector<64x256xf32>
    %81 = vector.broadcast %9 : vector<1x256xf32> to vector<64x256xf32>
    %82 = arith.addf %80, %81 : vector<64x256xf32>
    %cst_43 = arith.constant 5.000000e-01 : f32
    %83 = vector.broadcast %cst_43 : f32 to vector<64x256xf32>
    %84 = arith.mulf %83, %82 : vector<64x256xf32>
    %cst_44 = arith.constant 0.707106769 : f32
    %85 = vector.broadcast %cst_44 : f32 to vector<64x256xf32>
    %86 = arith.mulf %82, %85 : vector<64x256xf32>
    %87 = math.erf %86 : vector<64x256xf32>
    %cst_45 = arith.constant 1.000000e+00 : f32
    %88 = vector.broadcast %cst_45 : f32 to vector<64x256xf32>
    %89 = arith.addf %88, %87 : vector<64x256xf32>
    %90 = arith.mulf %84, %89 : vector<64x256xf32>
    %91 = arith.truncf %90 : vector<64x256xf32> to vector<64x256xbf16>
    %cst_46 = arith.constant dense<0.000000e+00> : vector<64x128xf32>
    %92 = tpu.matmul %91, %10, %cst_46 {dimension_numbers = #tpu.dot_dimension_numbers<[1], [0], [0], [1], [0, 0, 1, 1], [], []>} : vector<64x256xbf16>, vector<256x128xbf16>, vector<64x128xf32> -> vector<64x128xf32>
    %93 = arith.addf %54, %92 : vector<64x128xf32>
    %94 = vector.broadcast %11 : vector<1x128xf32> to vector<64x128xf32>
    %95 = arith.addf %93, %94 : vector<64x128xf32>
    %96 = vector.shape_cast %95 : vector<64x128xf32> to vector<4x16x128xf32>
    %c0_47 = arith.constant 0 : index
    %c0_48 = arith.constant 0 : index
    %c0_49 = arith.constant 0 : index
    %97 = vector.load %arg14[%c0_47, %c0_48, %c0_49] : memref<4x16x128xf32, #tpu.memory_space<vmem>>, vector<4x16x128xf32>
    tpu.vector_store %arg14[%c0_47, %c0_48, %c0_49], %96 {strides = array<i32>} : memref<4x16x128xf32, #tpu.memory_space<vmem>>, vector<4x16x128xf32>,
    return
  }
  func.func @transform_0(%arg0: i32) -> (i32, i32, i32) {
    %c0_i32 = arith.constant 0 : i32
    %c0_i32_0 = arith.constant 0 : i32
    %c0_i32_1 = arith.constant 0 : i32
    return %arg0, %c0_i32, %c0_i32_0 : i32, i32, i32
  }
  func.func @transform_1(%arg0: i32) -> (i32, i32) {
    %c0_i32 = arith.constant 0 : i32
    %c0_i32_0 = arith.constant 0 : i32
    %c0_i32_1 = arith.constant 0 : i32
    return %c0_i32, %c0_i32_0 : i32, i32
  }
  func.func @transform_2(%arg0: i32) -> (i32, i32) {
    %c0_i32 = arith.constant 0 : i32
    %c0_i32_0 = arith.constant 0 : i32
    %c0_i32_1 = arith.constant 0 : i32
    return %c0_i32, %c0_i32_0 : i32, i32
  }
  func.func @transform_3(%arg0: i32) -> (i32, i32) {
    %c0_i32 = arith.constant 0 : i32
    %c0_i32_0 = arith.constant 0 : i32
    %c0_i32_1 = arith.constant 0 : i32
    return %c0_i32, %c0_i32_0 : i32, i32
  }
  func.func @transform_4(%arg0: i32) -> (i32, i32) {
    %c0_i32 = arith.constant 0 : i32
    %c0_i32_0 = arith.constant 0 : i32
    %c0_i32_1 = arith.constant 0 : i32
    return %c0_i32, %c0_i32_0 : i32, i32
  }
  func.func @transform_5(%arg0: i32) -> (i32, i32) {
    %c0_i32 = arith.constant 0 : i32
    %c0_i32_0 = arith.constant 0 : i32
    %c0_i32_1 = arith.constant 0 : i32
    return %c0_i32, %c0_i32_0 : i32, i32
  }
  func.func @transform_6(%arg0: i32) -> (i32, i32) {
    %c0_i32 = arith.constant 0 : i32
    %c0_i32_0 = arith.constant 0 : i32
    %c0_i32_1 = arith.constant 0 : i32
    return %c0_i32, %c0_i32_0 : i32, i32
  }
  func.func @transform_7(%arg0: i32) -> (i32, i32) {
    %c0_i32 = arith.constant 0 : i32
    %c0_i32_0 = arith.constant 0 : i32
    %c0_i32_1 = arith.constant 0 : i32
    return %c0_i32, %c0_i32_0 : i32, i32
  }
  func.func @transform_8(%arg0: i32) -> (i32, i32) {
    %c0_i32 = arith.constant 0 : i32
    %c0_i32_0 = arith.constant 0 : i32
    %c0_i32_1 = arith.constant 0 : i32
    return %c0_i32, %c0_i32_0 : i32, i32
  }
  func.func @transform_9(%arg0: i32) -> (i32, i32) {
    %c0_i32 = arith.constant 0 : i32
    %c0_i32_0 = arith.constant 0 : i32
    %c0_i32_1 = arith.constant 0 : i32
    return %c0_i32, %c0_i32_0 : i32, i32
  }
  func.func @transform_10(%arg0: i32) -> (i32, i32) {
    %c0_i32 = arith.constant 0 : i32
    %c0_i32_0 = arith.constant 0 : i32
    %c0_i32_1 = arith.constant 0 : i32
    return %c0_i32, %c0_i32_0 : i32, i32
  }
  func.func @transform_11(%arg0: i32) -> (i32, i32) {
    %c0_i32 = arith.constant 0 : i32
    %c0_i32_0 = arith.constant 0 : i32
    %c0_i32_1 = arith.constant 0 : i32
    return %c0_i32, %c0_i32_0 : i32, i32
  }
  func.func @transform_12(%arg0: i32) -> (i32, i32) {
    %c0_i32 = arith.constant 0 : i32
    %c0_i32_0 = arith.constant 0 : i32
    %c0_i32_1 = arith.constant 0 : i32
    return %c0_i32, %c0_i32_0 : i32, i32
  }
  func.func @transform_13(%arg0: i32) -> (i32, i32, i32) {
    %c0_i32 = arith.constant 0 : i32
    %c0_i32_0 = arith.constant 0 : i32
    %c0_i32_1 = arith.constant 0 : i32
    return %arg0, %c0_i32, %c0_i32_0 : i32, i32, i32
  }
}

module attributes {stable_mosaic.version = 11 : i64} {
  func.func @mixer_block_kernel(%arg0: i32, %arg1: memref<4x16x128xf32, #tpu.memory_space<vmem>>, %arg2: memref<1x128xf32, #tpu.memory_space<vmem>>, %arg3: memref<1x128xf32, #tpu.memory_space<vmem>>, %arg4: memref<512x64xbf16, #tpu.memory_space<vmem>>, %arg5: memref<512x1xf32, #tpu.memory_space<vmem>>, %arg6: memref<64x512xbf16, #tpu.memory_space<vmem>>, %arg7: memref<64x1xf32, #tpu.memory_space<vmem>>, %arg8: memref<1x128xf32, #tpu.memory_space<vmem>>, %arg9: memref<1x128xf32, #tpu.memory_space<vmem>>, %arg10: memref<128x256xbf16, #tpu.memory_space<vmem>>, %arg11: memref<1x256xf32, #tpu.memory_space<vmem>>, %arg12: memref<256x128xbf16, #tpu.memory_space<vmem>>, %arg13: memref<1x128xf32, #tpu.memory_space<vmem>>, %arg14: memref<4x16x128xf32, #tpu.memory_space<vmem>>) attributes {dimension_semantics = [#tpu.dimension_semantics<parallel>], iteration_bounds = array<i64: 2>, scalar_prefetch = 0 : i64, scratch_operands = 0 : i64, tpu.core_type = #tpu.core_type<tc>, window_params = [{transform_indices = @transform_0, window_bounds = array<i64: 4, 16, 128>}, {pipeline_mode = #tpu.pipeline_mode<synchronous>, transform_indices = @transform_1, window_bounds = array<i64: 1, 128>}, {pipeline_mode = #tpu.pipeline_mode<synchronous>, transform_indices = @transform_2, window_bounds = array<i64: 1, 128>}, {pipeline_mode = #tpu.pipeline_mode<synchronous>, transform_indices = @transform_3, window_bounds = array<i64: 512, 64>}, {pipeline_mode = #tpu.pipeline_mode<synchronous>, transform_indices = @transform_4, window_bounds = array<i64: 512, 1>}, {pipeline_mode = #tpu.pipeline_mode<synchronous>, transform_indices = @transform_5, window_bounds = array<i64: 64, 512>}, {pipeline_mode = #tpu.pipeline_mode<synchronous>, transform_indices = @transform_6, window_bounds = array<i64: 64, 1>}, {pipeline_mode = #tpu.pipeline_mode<synchronous>, transform_indices = @transform_7, window_bounds = array<i64: 1, 128>}, {pipeline_mode = #tpu.pipeline_mode<synchronous>, transform_indices = @transform_8, window_bounds = array<i64: 1, 128>}, {pipeline_mode = #tpu.pipeline_mode<synchronous>, transform_indices = @transform_9, window_bounds = array<i64: 128, 256>}, {pipeline_mode = #tpu.pipeline_mode<synchronous>, transform_indices = @transform_10, window_bounds = array<i64: 1, 256>}, {pipeline_mode = #tpu.pipeline_mode<synchronous>, transform_indices = @transform_11, window_bounds = array<i64: 256, 128>}, {pipeline_mode = #tpu.pipeline_mode<synchronous>, transform_indices = @transform_12, window_bounds = array<i64: 1, 128>}, {transform_indices = @transform_13, window_bounds = array<i64: 4, 16, 128>}]} {
    %c0 = arith.constant 0 : index
    %c0_0 = arith.constant 0 : index
    %0 = vector.load %arg2[%c0, %c0_0] : memref<1x128xf32, #tpu.memory_space<vmem>>, vector<1x128xf32>
    %c0_1 = arith.constant 0 : index
    %c0_2 = arith.constant 0 : index
    %1 = vector.load %arg3[%c0_1, %c0_2] : memref<1x128xf32, #tpu.memory_space<vmem>>, vector<1x128xf32>
    %c0_3 = arith.constant 0 : index
    %c0_4 = arith.constant 0 : index
    %2 = vector.load %arg8[%c0_3, %c0_4] : memref<1x128xf32, #tpu.memory_space<vmem>>, vector<1x128xf32>
    %c0_5 = arith.constant 0 : index
    %c0_6 = arith.constant 0 : index
    %3 = vector.load %arg9[%c0_5, %c0_6] : memref<1x128xf32, #tpu.memory_space<vmem>>, vector<1x128xf32>
    %c0_7 = arith.constant 0 : index
    %c0_8 = arith.constant 0 : index
    %4 = vector.load %arg4[%c0_7, %c0_8] : memref<512x64xbf16, #tpu.memory_space<vmem>>, vector<512x64xbf16>
    %c0_9 = arith.constant 0 : index
    %c0_10 = arith.constant 0 : index
    %5 = vector.load %arg5[%c0_9, %c0_10] : memref<512x1xf32, #tpu.memory_space<vmem>>, vector<512x1xf32>
    %c0_11 = arith.constant 0 : index
    %c0_12 = arith.constant 0 : index
    %6 = vector.load %arg6[%c0_11, %c0_12] : memref<64x512xbf16, #tpu.memory_space<vmem>>, vector<64x512xbf16>
    %c0_13 = arith.constant 0 : index
    %c0_14 = arith.constant 0 : index
    %7 = vector.load %arg7[%c0_13, %c0_14] : memref<64x1xf32, #tpu.memory_space<vmem>>, vector<64x1xf32>
    %c0_15 = arith.constant 0 : index
    %c0_16 = arith.constant 0 : index
    %8 = vector.load %arg10[%c0_15, %c0_16] : memref<128x256xbf16, #tpu.memory_space<vmem>>, vector<128x256xbf16>
    %c0_17 = arith.constant 0 : index
    %c0_18 = arith.constant 0 : index
    %9 = vector.load %arg11[%c0_17, %c0_18] : memref<1x256xf32, #tpu.memory_space<vmem>>, vector<1x256xf32>
    %c0_19 = arith.constant 0 : index
    %c0_20 = arith.constant 0 : index
    %10 = vector.load %arg12[%c0_19, %c0_20] : memref<256x128xbf16, #tpu.memory_space<vmem>>, vector<256x128xbf16>
    %c0_21 = arith.constant 0 : index
    %c0_22 = arith.constant 0 : index
    %11 = vector.load %arg13[%c0_21, %c0_22] : memref<1x128xf32, #tpu.memory_space<vmem>>, vector<1x128xf32>
    %c0_23 = arith.constant 0 : index
    %c0_24 = arith.constant 0 : index
    %c0_25 = arith.constant 0 : index
    %12 = vector.load %arg1[%c0_23, %c0_24, %c0_25] : memref<4x16x128xf32, #tpu.memory_space<vmem>>, vector<4x16x128xf32>
    %13 = vector.shape_cast %12 : vector<4x16x128xf32> to vector<64x128xf32>
    %cst = arith.constant dense<0.000000e+00> : vector<64xf32>
    %14 = vector.multi_reduction <add>, %13, %cst [1] : vector<64x128xf32> to vector<64xf32>
    %15 = vector.shape_cast %14 : vector<64xf32> to vector<64x1xf32>
    %cst_26 = arith.constant 1.280000e+02 : f32
    %16 = vector.broadcast %cst_26 : f32 to vector<64x1xf32>
    %17 = arith.divf %15, %16 : vector<64x1xf32>
    %18 = arith.mulf %13, %13 : vector<64x128xf32>
    %cst_27 = arith.constant dense<0.000000e+00> : vector<64xf32>
    %19 = vector.multi_reduction <add>, %18, %cst_27 [1] : vector<64x128xf32> to vector<64xf32>
    %20 = vector.shape_cast %19 : vector<64xf32> to vector<64x1xf32>
    %cst_28 = arith.constant 1.280000e+02 : f32
    %21 = vector.broadcast %cst_28 : f32 to vector<64x1xf32>
    %22 = arith.divf %20, %21 : vector<64x1xf32>
    %23 = arith.mulf %17, %17 : vector<64x1xf32>
    %24 = arith.subf %22, %23 : vector<64x1xf32>
    %cst_29 = arith.constant 0.000000e+00 : f32
    %25 = vector.broadcast %cst_29 : f32 to vector<64x1xf32>
    %26 = arith.maximumf %24, %25 : vector<64x1xf32>
    %27 = vector.broadcast %17 : vector<64x1xf32> to vector<64x128xf32>
    %28 = arith.subf %13, %27 : vector<64x128xf32>
    %cst_30 = arith.constant 9.99999974E-6 : f32
    %29 = vector.broadcast %cst_30 : f32 to vector<64x1xf32>
    %30 = arith.addf %26, %29 : vector<64x1xf32>
    %31 = math.rsqrt %30 : vector<64x1xf32>
    %32 = vector.broadcast %31 : vector<64x1xf32> to vector<64x128xf32>
    %33 = arith.mulf %28, %32 : vector<64x128xf32>
    %34 = vector.broadcast %0 : vector<1x128xf32> to vector<64x128xf32>
    %35 = arith.mulf %33, %34 : vector<64x128xf32>
    %36 = vector.broadcast %1 : vector<1x128xf32> to vector<64x128xf32>
    %37 = arith.addf %35, %36 : vector<64x128xf32>
    %38 = arith.truncf %37 : vector<64x128xf32> to vector<64x128xbf16>
    %cst_31 = arith.constant dense<0.000000e+00> : vector<512x128xf32>
    %39 = tpu.matmul %4, %38, %cst_31 {dimension_numbers = #tpu.dot_dimension_numbers<[1], [0], [0], [1], [0, 0, 1, 1], [], []>} : vector<512x64xbf16>, vector<64x128xbf16>, vector<512x128xf32> -> vector<512x128xf32>
    %40 = vector.broadcast %5 : vector<512x1xf32> to vector<512x128xf32>
    %41 = arith.addf %39, %40 : vector<512x128xf32>
    %cst_32 = arith.constant 5.000000e-01 : f32
    %42 = vector.broadcast %cst_32 : f32 to vector<512x128xf32>
    %43 = arith.mulf %42, %41 : vector<512x128xf32>
    %cst_33 = arith.constant 0.707106769 : f32
    %44 = vector.broadcast %cst_33 : f32 to vector<512x128xf32>
    %45 = arith.mulf %41, %44 : vector<512x128xf32>
    %46 = math.erf %45 : vector<512x128xf32>
    %cst_34 = arith.constant 1.000000e+00 : f32
    %47 = vector.broadcast %cst_34 : f32 to vector<512x128xf32>
    %48 = arith.addf %47, %46 : vector<512x128xf32>
    %49 = arith.mulf %43, %48 : vector<512x128xf32>
    %50 = arith.truncf %49 : vector<512x128xf32> to vector<512x128xbf16>
    %cst_35 = arith.constant dense<0.000000e+00> : vector<64x128xf32>
    %51 = tpu.matmul %6, %50, %cst_35 {dimension_numbers = #tpu.dot_dimension_numbers<[1], [0], [0], [1], [0, 0, 1, 1], [], []>} : vector<64x512xbf16>, vector<512x128xbf16>, vector<64x128xf32> -> vector<64x128xf32>
    %52 = arith.addf %13, %51 : vector<64x128xf32>
    %53 = vector.broadcast %7 : vector<64x1xf32> to vector<64x128xf32>
    %54 = arith.addf %52, %53 : vector<64x128xf32>
    %cst_36 = arith.constant dense<0.000000e+00> : vector<64xf32>
    %55 = vector.multi_reduction <add>, %54, %cst_36 [1] : vector<64x128xf32> to vector<64xf32>
    %56 = vector.shape_cast %55 : vector<64xf32> to vector<64x1xf32>
    %cst_37 = arith.constant 1.280000e+02 : f32
    %57 = vector.broadcast %cst_37 : f32 to vector<64x1xf32>
    %58 = arith.divf %56, %57 : vector<64x1xf32>
    %59 = arith.mulf %54, %54 : vector<64x128xf32>
    %cst_38 = arith.constant dense<0.000000e+00> : vector<64xf32>
    %60 = vector.multi_reduction <add>, %59, %cst_38 [1] : vector<64x128xf32> to vector<64xf32>
    %61 = vector.shape_cast %60 : vector<64xf32> to vector<64x1xf32>
    %cst_39 = arith.constant 1.280000e+02 : f32
    %62 = vector.broadcast %cst_39 : f32 to vector<64x1xf32>
    %63 = arith.divf %61, %62 : vector<64x1xf32>
    %64 = arith.mulf %58, %58 : vector<64x1xf32>
    %65 = arith.subf %63, %64 : vector<64x1xf32>
    %cst_40 = arith.constant 0.000000e+00 : f32
    %66 = vector.broadcast %cst_40 : f32 to vector<64x1xf32>
    %67 = arith.maximumf %65, %66 : vector<64x1xf32>
    %68 = vector.broadcast %58 : vector<64x1xf32> to vector<64x128xf32>
    %69 = arith.subf %54, %68 : vector<64x128xf32>
    %cst_41 = arith.constant 9.99999974E-6 : f32
    %70 = vector.broadcast %cst_41 : f32 to vector<64x1xf32>
    %71 = arith.addf %67, %70 : vector<64x1xf32>
    %72 = math.rsqrt %71 : vector<64x1xf32>
    %73 = vector.broadcast %72 : vector<64x1xf32> to vector<64x128xf32>
    %74 = arith.mulf %69, %73 : vector<64x128xf32>
    %75 = vector.broadcast %2 : vector<1x128xf32> to vector<64x128xf32>
    %76 = arith.mulf %74, %75 : vector<64x128xf32>
    %77 = vector.broadcast %3 : vector<1x128xf32> to vector<64x128xf32>
    %78 = arith.addf %76, %77 : vector<64x128xf32>
    %79 = arith.truncf %78 : vector<64x128xf32> to vector<64x128xbf16>
    %cst_42 = arith.constant dense<0.000000e+00> : vector<64x256xf32>
    %80 = tpu.matmul %79, %8, %cst_42 {dimension_numbers = #tpu.dot_dimension_numbers<[1], [0], [0], [1], [0, 0, 1, 1], [], []>} : vector<64x128xbf16>, vector<128x256xbf16>, vector<64x256xf32> -> vector<64x256xf32>
    %81 = vector.broadcast %9 : vector<1x256xf32> to vector<64x256xf32>
    %82 = arith.addf %80, %81 : vector<64x256xf32>
    %cst_43 = arith.constant 5.000000e-01 : f32
    %83 = vector.broadcast %cst_43 : f32 to vector<64x256xf32>
    %84 = arith.mulf %83, %82 : vector<64x256xf32>
    %cst_44 = arith.constant 0.707106769 : f32
    %85 = vector.broadcast %cst_44 : f32 to vector<64x256xf32>
    %86 = arith.mulf %82, %85 : vector<64x256xf32>
    %87 = math.erf %86 : vector<64x256xf32>
    %cst_45 = arith.constant 1.000000e+00 : f32
    %88 = vector.broadcast %cst_45 : f32 to vector<64x256xf32>
    %89 = arith.addf %88, %87 : vector<64x256xf32>
    %90 = arith.mulf %84, %89 : vector<64x256xf32>
    %91 = arith.truncf %90 : vector<64x256xf32> to vector<64x256xbf16>
    %cst_46 = arith.constant dense<0.000000e+00> : vector<64x128xf32>
    %92 = tpu.matmul %91, %10, %cst_46 {dimension_numbers = #tpu.dot_dimension_numbers<[1], [0], [0], [1], [0, 0, 1, 1], [], []>} : vector<64x256xbf16>, vector<256x128xbf16>, vector<64x128xf32> -> vector<64x128xf32>
    %93 = arith.addf %54, %92 : vector<64x128xf32>
    %94 = vector.broadcast %11 : vector<1x128xf32> to vector<64x128xf32>
    %95 = arith.addf %93, %94 : vector<64x128xf32>
    %96 = vector.shape_cast %95 : vector<64x128xf32> to vector<4x16x128xf32>
    %c0_47 = arith.constant 0 : index
    %c0_48 = arith.constant 0 : index
    %c0_49 = arith.constant 0 : index
    %97 = vector.load %arg14[%c0_47, %c0_48, %c0_49] : memref<4x16x128xf32, #tpu.memory_space<vmem>>, vector<4x16x128xf32>
    tpu.vector_store %arg14[%c0_47, %c0_48, %c0_49], %96 {strides = array<i32>} : memref<4x16x128xf32, #tpu.memory_space<vmem>>, vector<4x16x128xf32>,
    return
  }
  func.func @transform_0(%arg0: i32) -> (i32, i32, i32) {
    %c0_i32 = arith.constant 0 : i32
    %c0_i32_0 = arith.constant 0 : i32
    %c0_i32_1 = arith.constant 0 : i32
    return %arg0, %c0_i32, %c0_i32_0 : i32, i32, i32
  }
  func.func @transform_1(%arg0: i32) -> (i32, i32) {
    %c0_i32 = arith.constant 0 : i32
    %c0_i32_0 = arith.constant 0 : i32
    %c0_i32_1 = arith.constant 0 : i32
    return %c0_i32, %c0_i32_0 : i32, i32
  }
  func.func @transform_2(%arg0: i32) -> (i32, i32) {
    %c0_i32 = arith.constant 0 : i32
    %c0_i32_0 = arith.constant 0 : i32
    %c0_i32_1 = arith.constant 0 : i32
    return %c0_i32, %c0_i32_0 : i32, i32
  }
  func.func @transform_3(%arg0: i32) -> (i32, i32) {
    %c0_i32 = arith.constant 0 : i32
    %c0_i32_0 = arith.constant 0 : i32
    %c0_i32_1 = arith.constant 0 : i32
    return %c0_i32, %c0_i32_0 : i32, i32
  }
  func.func @transform_4(%arg0: i32) -> (i32, i32) {
    %c0_i32 = arith.constant 0 : i32
    %c0_i32_0 = arith.constant 0 : i32
    %c0_i32_1 = arith.constant 0 : i32
    return %c0_i32, %c0_i32_0 : i32, i32
  }
  func.func @transform_5(%arg0: i32) -> (i32, i32) {
    %c0_i32 = arith.constant 0 : i32
    %c0_i32_0 = arith.constant 0 : i32
    %c0_i32_1 = arith.constant 0 : i32
    return %c0_i32, %c0_i32_0 : i32, i32
  }
  func.func @transform_6(%arg0: i32) -> (i32, i32) {
    %c0_i32 = arith.constant 0 : i32
    %c0_i32_0 = arith.constant 0 : i32
    %c0_i32_1 = arith.constant 0 : i32
    return %c0_i32, %c0_i32_0 : i32, i32
  }
  func.func @transform_7(%arg0: i32) -> (i32, i32) {
    %c0_i32 = arith.constant 0 : i32
    %c0_i32_0 = arith.constant 0 : i32
    %c0_i32_1 = arith.constant 0 : i32
    return %c0_i32, %c0_i32_0 : i32, i32
  }
  func.func @transform_8(%arg0: i32) -> (i32, i32) {
    %c0_i32 = arith.constant 0 : i32
    %c0_i32_0 = arith.constant 0 : i32
    %c0_i32_1 = arith.constant 0 : i32
    return %c0_i32, %c0_i32_0 : i32, i32
  }
  func.func @transform_9(%arg0: i32) -> (i32, i32) {
    %c0_i32 = arith.constant 0 : i32
    %c0_i32_0 = arith.constant 0 : i32
    %c0_i32_1 = arith.constant 0 : i32
    return %c0_i32, %c0_i32_0 : i32, i32
  }
  func.func @transform_10(%arg0: i32) -> (i32, i32) {
    %c0_i32 = arith.constant 0 : i32
    %c0_i32_0 = arith.constant 0 : i32
    %c0_i32_1 = arith.constant 0 : i32
    return %c0_i32, %c0_i32_0 : i32, i32
  }
  func.func @transform_11(%arg0: i32) -> (i32, i32) {
    %c0_i32 = arith.constant 0 : i32
    %c0_i32_0 = arith.constant 0 : i32
    %c0_i32_1 = arith.constant 0 : i32
    return %c0_i32, %c0_i32_0 : i32, i32
  }
  func.func @transform_12(%arg0: i32) -> (i32, i32) {
    %c0_i32 = arith.constant 0 : i32
    %c0_i32_0 = arith.constant 0 : i32
    %c0_i32_1 = arith.constant 0 : i32
    return %c0_i32, %c0_i32_0 : i32, i32
  }
  func.func @transform_13(%arg0: i32) -> (i32, i32, i32) {
    %c0_i32 = arith.constant 0 : i32
    %c0_i32_0 = arith.constant 0 : i32
    %c0_i32_1 = arith.constant 0 : i32
    return %arg0, %c0_i32, %c0_i32_0 : i32, i32, i32
  }
}

</mosaic_0001>

<bundles_post_ra>
// kernel: tpu_custom_call.1
= control target key start
LH: loop header
LB: loop body
LE: loop exit
PB: predicated region body
PF: predicated region fallthrough
CT: control target
= control target key end

     0   :  { %s5247_s0 = inlined_call_operand.vmem [shape: f32[8,16,128], index: 0, kind: input, shape index: {}]   ;;  %s5248_s1 = inlined_call_operand.vmem [shape: f32[1,128], index: 1, kind: input, shape index: {}]   ;;  %s5249_s2 = inlined_call_operand.vmem [shape: f32[1,128], index: 2, kind: input, shape index: {}]   ;;  %s5250_s3 = inlined_call_operand.vmem [shape: bf16[512,64], index: 3, kind: input, shape index: {}]   ;;  %s5251_s4 = inlined_call_operand.vmem [shape: f32[512,1], index: 4, kind: input, shape index: {}]   ;;  %s5252_s5 = inlined_call_operand.vmem [shape: bf16[64,512], index: 5, kind: input, shape index: {}]   ;;  %s5253_s6 = inlined_call_operand.vmem [shape: f32[64,1], index: 6, kind: input, shape index: {}]   ;;  %s5254_s7 = inlined_call_operand.vmem [shape: f32[1,128], index: 7, kind: input, shape index: {}]   ;;  %s5255_s8 = inlined_call_operand.vmem [shape: f32[1,128], index: 8, kind: input, shape index: {}]   ;;  %s5256_s9 = inlined_call_operand.vmem [shape: bf16[128,256], index: 9, kind: input, shape index: {}]   ;;  %s5257_s10 = inlined_call_operand.vmem [shape: f32[1,256], index: 10, kind: input, shape index: {}]   ;;  %s5258_s11 = inlined_call_operand.vmem [shape: bf16[256,128], index: 11, kind: input, shape index: {}]   ;;  %s5259_s12 = inlined_call_operand.vmem [shape: f32[1,128], index: 12, kind: input, shape index: {}]   ;;  %s5260_s13 = inlined_call_operand.hbm [shape: f32[8,16,128], index: 13, kind: output, shape index: {}]  }
   0x1   :  { %5264 = sst [smem:[#allocation13_spill]] %s5247_s0 }
   0x2   :  { %18 = vsyncpa [#allocation3], 0 }
   0x3   :  { %20 = vsyncpa [#allocation3 + $0x1], 0  ;;  %s3809_s25 = smov 0   ;;  %s3811_s26 = smov 0  }
   0x4   :  { %s3813_s27 = smov 0   ;;  %s3815_s28 = smov 0  }
   0x5 LB: > { %5265 = sst [smem:[#allocation5_spill]] %s3729_s27  ;;  %s3830_s29 = sadd.s32 4294967295, %s3733_s28   ;;  %s3733_s28 = sphi %s3815_s28, %s5295_s28   ;;  %s3729_s27 = sphi %s3813_s27, %s5292_s27   ;;  %s3725_s26 = sphi %s3811_s26, %s5294_s26   ;;  %s3721_s25 = sphi %s3809_s25, %s5293_s25  }
   0x6   : > { %s2953_s30 = sadd.s32 4294967294, %s3733_s28   ;;  %s3834_s14 = sadd.s32 1, %s3733_s28  }
   0x7   : > { %s311_s15 = sadd.s32 1, %s3729_s27  ;;  %s308_s16 = ssub.s32 %s3733_s28, %s3834_s14 }
   0x8   : > { %p321_p0 = scmp.ne.s32.totalorder %s3729_s27, %s3725_s26  ;;  %p309_p1 = scmp.eq.s32.totalorder %s308_s16, 0 }
   0x9   : > { %p322_p2 = scmp.eq.s32.totalorder %s3830_s29, 1  ;;  %p327_p3 = scmp.ne.s32.totalorder %s3725_s26, %s3721_s25 }
   0xa   : > { %p328_p4 = scmp.eq.s32.totalorder %s2953_s30, 1  ;;  %p2956_p7 = scmp.ge.s32.totalorder %s3733_s28, 1 }
   0xb   : > { %s3845_s17 = scalar_select %p309_p1, %s3729_s27, %s311_s15  }
   0xc   : > { %p3847_p5 = por %p322_p2, %p321_p0  ;;  %p3851_p6 = por %p328_p4, %p327_p3 }
   0xd   : > { %5266 = sst [smem:[#allocation6_spill]] %s3845_s17  ;;  %p392_p8 = scmp.lt.s32.totalorder %s3733_s28, 3 }
   0xf   : > { %p393_p9 = pnand %p2956_p7, %p392_p8 }
  0x11   : > { %396 = sbr.rel (%p393_p9) target bundleno = 1492 (0x5d4), region = 72 }
  0x18   : > { %s2958_s20 = sshll.u32 %s3830_s29, 2  ;;  %v5262_v0 = vmov 0   ;;  %s5269_s0 = sld [smem:[#allocation13_spill]]  ;;  %v531_v17 = vld [vmem:[%s5251_s4 + $0x88] sm:$0xff]  ;;  %v514_v18 = vld [vmem:[%s5251_s4] sm:$0xff]  ;;  %v532_v22 = vld [vmem:[%s5251_s4 + $0x90] sm:$0xff] }
  0x19   : > { %p438_p10 = scmp.lt.s32.totalorder %s2958_s20, 7  ;;  %3374 = vset.pattern.permute.xlu1 %v5262_v0  ;;  %3373 = vset.pattern.permute.xlu0 %v5262_v0  ;;  %v530_v19 = vld [vmem:[%s5251_s4 + $0x80] sm:$0xff]  ;;  %v515_v20 = vld [vmem:[%s5251_s4 + $0x8] sm:$0xff]  ;;  %v533_v24 = vld [vmem:[%s5251_s4 + $0x98] sm:$0xff]  ;;  %vm1285_vm0 = vcmask 523264   ;;  %s434_s27 = sand.u32 1, %s3725_s26  }
  0x1a   : > { %v535_v21 = vld [vmem:[%s5251_s4 + $0xa8] sm:$0xff]  ;;  %v537_v25 = vld [vmem:[%s5251_s4 + $0xb8] sm:$0xff]  ;;  %v516_v26 = vld [vmem:[%s5251_s4 + $0x10] sm:$0xff]  ;;  %s2957_s17 = sshll.u32 %s434_s27, 6  ;;  %s5206_s23 = scalar_lea.sflag [#allocation3], %s434_s27 }
  0x1b   : > { %s5297_s20 = smov (!%p438_p10, %s2958_s20), 7  ;;  %v519_v23 = vld [vmem:[%s5251_s4 + $0x28] sm:$0xff]  ;;  %v521_v27 = vld [vmem:[%s5251_s4 + $0x38] sm:$0xff]  ;;  %v534_v30 = vld [vmem:[%s5251_s4 + $0xa0] sm:$0xff]  ;;  %s5179_s16 = scalar_lea.vmem [#allocation2], %s2957_s17 }
  0x1c   : > { %s3084_s21 = sshll.u32 %s5297_s20, 4  ;;  %v517_v28 = vld [vmem:[%s5251_s4 + $0x18] sm:$0xff]  ;;  %v539_v29 = vld [vmem:[%s5251_s4 + $0xc8] sm:$0xff]  ;;  %v3375_v32 = vld [vmem:[%s5250_s3] sm:$0xff]   ;;  %s3086_s20 = sshll.u32 %s3830_s29, 10 }
  0x1d   : > { %v523_v31 = vld [vmem:[%s5251_s4 + $0x48] sm:$0xff]  ;;  %3251 = vmatprep.mubr.msk.bf16.mxu0 %vm1285_vm0, %v3375_v32  ;;  %v518_v33 = vld [vmem:[%s5251_s4 + $0x20] sm:$0xff]  ;;  %v541_v34 = vld [vmem:[%s5251_s4 + $0xd8] sm:$0xff]  ;;  %s3736_s17 = smov [#allocation2]  }
  0x1e   : > { %s3863_s24 = scalar_lea.vmem %s5269_s0, %s3084_s21  ;;  %v536_v35 = vld [vmem:[%s5251_s4 + $0xb0] sm:$0xff]  ;;  %v525_v36 = vld [vmem:[%s5251_s4 + $0x58] sm:$0xff]  ;;  %v543_v38 = vld [vmem:[%s5251_s4 + $0xe8] sm:$0xff]  ;;  %s2891_s21 = sshll.u32 %s5179_s16, 4  ;;  %s5200_s21 = int_to_ptr.vmem [resolvable:$true] %s2891_s21 }
  0x1f   : > { %v3866_v1 = vld [vmem:[%s3863_s24 + $0x18] sm:$0xff]  ;;  %v3869_v2 = vld [vmem:[%s3863_s24] sm:$0xff]  ;;  %v3876_v4 = vld [vmem:[%s3863_s24 + $0x8] sm:$0xff]  ;;  %s5198_s0 = scalar_lea.hbm %s5260_s13, %s3086_s20  ;;  %s3671_s29 = scalar_lea.vmem %s5200_s21, 1024 }
  0x20   : > { %666 = vadd.xlane.f32.xlu1 %v3866_v1  ;;  %660 = vadd.xlane.f32.xlu0 %v3869_v2  ;;  %v685_v3 = vmul.f32 %v3869_v2, %v3869_v2  ;;  %v3879_v5 = vld [vmem:[%s3863_s24 + $0x10] sm:$0xff]  ;;  %v686_v6 = vmul.f32 %v3876_v4, %v3876_v4  ;;  %v688_v8 = vmul.f32 %v3866_v1, %v3866_v1  ;;  %v3890_v9 = vld [vmem:[%s3863_s24 + $0x20] sm:$0xff]  ;;  %v3893_v10 = vld [vmem:[%s3863_s24 + $0x28] sm:$0xff]  ;;  %p3672_p11 = scmp.ne.s32.totalorder %s5200_s21, %s3671_s29  ;;  %s3675_s30 = sshll.u32 %s3736_s17, 4  ;;  %s3676_s30 = int_to_ptr.vmem [resolvable:$false] %s3675_s30 }
  0x21   : > { %v687_v7 = vmul.f32 %v3879_v5, %v3879_v5  ;;  %v689_v11 = vmul.f32 %v3890_v9, %v3890_v9  ;;  %v690_v12 = vmul.f32 %v3893_v10, %v3893_v10  ;;  %v3902_v13 = vld [vmem:[%s3863_s24 + $0x30] sm:$0xff]  ;;  %v3905_v14 = vld [vmem:[%s3863_s24 + $0x38] sm:$0xff]  ;;  %v538_v39 = vld [vmem:[%s5251_s4 + $0xc0] sm:$0xff]  ;;  %s3677_s15 = scalar_lea.vmem %s3676_s30, 2048  ;;  %p3678_p0 = scmp.lt.s32.totalorder %s5200_s21, %s3676_s30 }
  0x22   : > { %v691_v15 = vmul.f32 %v3902_v13, %v3902_v13  ;;  %v692_v16 = vmul.f32 %v3905_v14, %v3905_v14  ;;  %v520_v37 = vld [vmem:[%s5251_s4 + $0x30] sm:$0xff]  ;;  %v527_v40 = vld [vmem:[%s5251_s4 + $0x68] sm:$0xff]  ;;  %v522_v41 = vld [vmem:[%s5251_s4 + $0x40] sm:$0xff]  ;;  %p3673_p12 = pnand %p3672_p11, %p3847_p5  ;;  %p3679_p1 = scmp.lt.s32.totalorder %s3677_s15, %s3671_s29 }
  0x23   : > { %v545_v42 = vld [vmem:[%s5251_s4 + $0xf8] sm:$0xff]  ;;  %v540_v43 = vld [vmem:[%s5251_s4 + $0xd0] sm:$0xff]  ;;  %v563_v46 = vld [vmem:[%s5251_s4 + $0x188] sm:$0xff] }
  0x24   : > { %662 = vadd.xlane.f32.xlu0 %v3876_v4  ;;  %693 = vadd.xlane.f32.xlu1 %v685_v3  ;;  %v529_v44 = vld [vmem:[%s5251_s4 + $0x78] sm:$0xff]  ;;  %v524_v45 = vld [vmem:[%s5251_s4 + $0x50] sm:$0xff]  ;;  %v542_v47 = vld [vmem:[%s5251_s4 + $0xe0] sm:$0xff]  ;;  %p3674_p13 = pneg %p3673_p12  ;;  %p3680_p2 = por %p3679_p1, %p3678_p0 }
  0x25   : > { %v547_v48 = vld [vmem:[%s5251_s4 + $0x108] sm:$0xff]  ;;  %v526_v49 = vld [vmem:[%s5251_s4 + $0x60] sm:$0xff]  ;;  %v565_v50 = vld [vmem:[%s5251_s4 + $0x198] sm:$0xff] }
  0x26   : > { %v544_v51 = vld [vmem:[%s5251_s4 + $0xf0] sm:$0xff]  ;;  %v549_v52 = vld [vmem:[%s5251_s4 + $0x118] sm:$0xff]  ;;  %v567_v54 = vld [vmem:[%s5251_s4 + $0x1a8] sm:$0xff]  ;;  %p3681_p3 = pnand %p3680_p2, %p3674_p13 }
  0x27   : > { %v528_v53 = vld [vmem:[%s5251_s4 + $0x70] sm:$0xff]  ;;  %v562_v55 = vld [vmem:[%s5251_s4 + $0x180] sm:$0xff]  ;;  %v551_v56 = vld [vmem:[%s5251_s4 + $0x128] sm:$0xff] }
  0x28   : > { %664 = vadd.xlane.f32.xlu0 %v3879_v5  ;;  %695 = vadd.xlane.f32.xlu1 %v686_v6  ;;  %v546_v57 = vld [vmem:[%s5251_s4 + $0x100] sm:$0xff]  ;;  %v569_v58 = vld [vmem:[%s5251_s4 + $0x1b8] sm:$0xff]  ;;  %v564_v59 = vld [vmem:[%s5251_s4 + $0x190] sm:$0xff] }
  0x29   : > { %v553_v60 = vld [vmem:[%s5251_s4 + $0x138] sm:$0xff]  ;;  %v548_v61 = vld [vmem:[%s5251_s4 + $0x110] sm:$0xff]  ;;  %v571_v62 = vld [vmem:[%s5251_s4 + $0x1c8] sm:$0xff] }
  0x2a   : > { %v566_v63 = vld [vmem:[%s5251_s4 + $0x1a0] sm:$0xff]  ;;  %v555_v3 = vld [vmem:[%s5251_s4 + $0x148] sm:$0xff] }
  0x2b   : > { %v550_v6 = vld [vmem:[%s5251_s4 + $0x120] sm:$0xff] }
  0x2c   : > { %697 = vadd.xlane.f32.xlu0 %v687_v7  ;;  %699 = vadd.xlane.f32.xlu1 %v688_v8  ;;  %v573_v7 = vld [vmem:[%s5251_s4 + $0x1d8] sm:$0xff]  ;;  %v570_v32 = vld [vmem:[%s5251_s4 + $0x1c0] sm:$0xff] }
  0x30   : > { %668 = vadd.xlane.f32.xlu0 %v3890_v9  ;;  %670 = vadd.xlane.f32.xlu1 %v3893_v10 }
  0x34   : > { %701 = vadd.xlane.f32.xlu0 %v689_v11  ;;  %703 = vadd.xlane.f32.xlu1 %v690_v12 }
  0x38   : > { %672 = vadd.xlane.f32.xlu0 %v3902_v13  ;;  %674 = vadd.xlane.f32.xlu1 %v3905_v14 }
  0x3c   : > { %705 = vadd.xlane.f32.xlu0 %v691_v15  ;;  %707 = vadd.xlane.f32.xlu1 %v692_v16  ;;  %v568_v15 = vld [vmem:[%s5251_s4 + $0x1b0] sm:$0xff]  ;;  %v557_v16 = vld [vmem:[%s5251_s4 + $0x158] sm:$0xff] }
  0x4d   : > { %892 = vperm.xlu1 %3374, %v531_v17  }
  0x51   : > { %807 = vperm.xlu1 %3374, %v514_v18  }
  0x52   : > { %887 = vperm.xlu0 %3373, %v530_v19  }
  0x55   : > { %812 = vperm.xlu1 %3374, %v515_v20  }
  0x56   : > { %912 = vperm.xlu0 %3373, %v535_v21  }
  0x59   : > { %897 = vperm.xlu1 %3374, %v532_v22   ;;  %v552_v22 = vld [vmem:[%s5251_s4 + $0x130] sm:$0xff] }
  0x5a   : > { %832 = vperm.xlu0 %3373, %v519_v23   ;;  %v575_v23 = vld [vmem:[%s5251_s4 + $0x1e8] sm:$0xff] }
  0x5d   : > { %902 = vperm.xlu1 %3374, %v533_v24  }
  0x5e   : > { %922 = vperm.xlu0 %3373, %v537_v25  }
  0x61   : > { %817 = vperm.xlu1 %3374, %v516_v26  }
  0x62   : > { %842 = vperm.xlu0 %3373, %v521_v27  }
  0x65   : > { %822 = vperm.xlu1 %3374, %v517_v28  }
  0x66   : > { %932 = vperm.xlu0 %3373, %v539_v29  }
  0x69   : > { %907 = vperm.xlu1 %3374, %v534_v30  }
  0x6a   : > { %852 = vperm.xlu0 %3373, %v523_v31  }
  0x6d   : > { %827 = vperm.xlu1 %3374, %v518_v33   ;;  %v559_v33 = vld [vmem:[%s5251_s4 + $0x168] sm:$0xff] }
  0x6e   : > { %942 = vperm.xlu0 %3373, %v541_v34  }
  0x71   : > { %917 = vperm.xlu1 %3374, %v536_v35  }
  0x72   : > { %862 = vperm.xlu0 %3373, %v525_v36  }
  0x75   : > { %837 = vperm.xlu1 %3374, %v520_v37  }
  0x76   : > { %952 = vperm.xlu0 %3373, %v543_v38  }
  0x79   : > { %927 = vperm.xlu1 %3374, %v538_v39  }
  0x7a   : > { %872 = vperm.xlu0 %3373, %v527_v40  }
  0x7d   : > { %847 = vperm.xlu1 %3374, %v522_v41  }
  0x7e   : > { %962 = vperm.xlu0 %3373, %v545_v42  }
  0x81   : > { %937 = vperm.xlu1 %3374, %v540_v43   ;;  %v554_v43 = vld [vmem:[%s5251_s4 + $0x140] sm:$0xff] }
  0x82   : > { %882 = vperm.xlu0 %3373, %v529_v44   ;;  %v577_v44 = vld [vmem:[%s5251_s4 + $0x1f8] sm:$0xff] }
  0x85   : > { %857 = vperm.xlu1 %3374, %v524_v45  }
  0x86   : > { %1052 = vperm.xlu0 %3373, %v563_v46  }
  0x89   : > { %947 = vperm.xlu1 %3374, %v542_v47  }
  0x8a   : > { %972 = vperm.xlu0 %3373, %v547_v48  }
  0x8d   : > { %867 = vperm.xlu1 %3374, %v526_v49  }
  0x8e   : > { %1062 = vperm.xlu0 %3373, %v565_v50  }
  0x91   : > { %957 = vperm.xlu1 %3374, %v544_v51  }
  0x92   : > { %982 = vperm.xlu0 %3373, %v549_v52  }
  0x95   : > { %877 = vperm.xlu1 %3374, %v528_v53   ;;  %v572_v53 = vld [vmem:[%s5251_s4 + $0x1d0] sm:$0xff] }
  0x96   : > { %1072 = vperm.xlu0 %3373, %v567_v54  }
  0x99   : > { %1047 = vperm.xlu1 %3374, %v562_v55   ;;  %v561_v55 = vld [vmem:[%s5251_s4 + $0x178] sm:$0xff] }
  0x9a   : > { %992 = vperm.xlu0 %3373, %v551_v56  }
  0x9d   : > { %967 = vperm.xlu1 %3374, %v546_v57  }
  0x9e   : > { %1082 = vperm.xlu0 %3373, %v569_v58  }
  0xa1   : > { %1057 = vperm.xlu1 %3374, %v564_v59  }
  0xa2   : > { %1002 = vperm.xlu0 %3373, %v553_v60  }
  0xa5   : > { %977 = vperm.xlu1 %3374, %v548_v61  }
  0xa6   : > { %1092 = vperm.xlu0 %3373, %v571_v62  }
  0xa9   : > { %1067 = vperm.xlu1 %3374, %v566_v63  }
  0xaa   : > { %1012 = vperm.xlu0 %3373, %v555_v3   ;;  %v556_v3 = vld [vmem:[%s5251_s4 + $0x150] sm:$0xff] }
  0xad   : > { %v667_v8 = vpop.xlane.xlu1 %666  ;;  %v661_v11 = vpop.xlane.xlu0 %660  ;;  %987 = vperm.xlu1 %3374, %v550_v6  }
  0xae   : > { %v4064_v12 = vmul.f32 0.0078125, %v661_v11  ;;  %1102 = vperm.xlu0 %3373, %v573_v7   ;;  %v4082_v25 = vmul.f32 0.0078125, %v667_v8  ;;  %v595_v7 = vld [vmem:[%s5253_s6 + $0x8] sm:$0xff] }
  0xb0   : > { %v717_v19 = vmul.f32 %v4064_v12, %v4064_v12  ;;  %v720_v36 = vmul.f32 %v4082_v25, %v4082_v25  ;;  %v741_v6 = vsub.f32 %v3869_v2, %v4064_v12 }
  0xb1   : > { %v663_v17 = vpop.xlane.xlu0 %662  ;;  %v694_v18 = vpop.xlane.xlu1 %693  ;;  %1077 = vperm.xlu1 %3374, %v568_v15  }
  0xb2   : > { %v4074_v20 = vmul.f32 0.0078125, %v663_v17  ;;  %v709_v21 = vmul.f32 0.0078125, %v694_v18  ;;  %1022 = vperm.xlu0 %3373, %v557_v16   ;;  %v4129_v18 = vld [vmem:[%s5248_s1] ss:$0 sm:$0xff] }
  0xb4   : > { %v725_v24 = vsub.f32 %v709_v21, %v717_v19  ;;  %v718_v28 = vmul.f32 %v4074_v20, %v4074_v20 }
  0xb5   : > { %v665_v26 = vpop.xlane.xlu0 %664  ;;  %v696_v27 = vpop.xlane.xlu1 %695  ;;  %997 = vperm.xlu1 %3374, %v552_v22  }
  0xb6   : > { %v733_v29 = vmax.f32 %v725_v24, 0.0  ;;  %v4086_v30 = vmul.f32 0.0078125, %v665_v26  ;;  %v710_v31 = vmul.f32 0.0078125, %v696_v27  ;;  %1112 = vperm.xlu0 %3373, %v575_v23   ;;  %v574_v23 = vld [vmem:[%s5251_s4 + $0x1e0] sm:$0xff]  ;;  %v742_v24 = vsub.f32 %v3876_v4, %v4074_v20  ;;  %v597_v26 = vld [vmem:[%s5253_s6 + $0x18] sm:$0xff] }
  0xb8   : > { %v749_v34 = vadd.f32 1e-05, %v733_v29  ;;  %v726_v35 = vsub.f32 %v710_v31, %v718_v28  ;;  %v719_v37 = vmul.f32 %v4086_v30, %v4086_v30 }
  0xb9   : > { %v698_v38 = vpop.xlane.xlu0 %697  ;;  %v700_v39 = vpop.xlane.xlu1 %699  ;;  %1087 = vperm.xlu1 %3374, %v570_v32  }
  0xba   : > { %3471 = vrsqrt.f32 %v749_v34  ;;  %v734_v40 = vmax.f32 %v726_v35, 0.0  ;;  %v711_v41 = vmul.f32 0.0078125, %v698_v38  ;;  %v712_v42 = vmul.f32 0.0078125, %v700_v39  ;;  %1032 = vperm.xlu0 %3373, %v559_v33   ;;  %v558_v38 = vld [vmem:[%s5251_s4 + $0x160] sm:$0xff] }
  0xbb   : > { %v743_v39 = vsub.f32 %v3879_v5, %v4086_v30 }
  0xbc   : > { %v750_v45 = vadd.f32 1e-05, %v734_v40  ;;  %v727_v46 = vsub.f32 %v711_v41, %v719_v37  ;;  %v728_v47 = vsub.f32 %v712_v42, %v720_v36  ;;  %v4151_v37 = vld [vmem:[%s5249_s2] ss:$0 sm:$0xff]  ;;  %v599_v41 = vld [vmem:[%s5253_s6 + $0x28] sm:$0xff] }
  0xbd   : > { %v669_v48 = vpop.xlane.xlu0 %668  ;;  %v671_v49 = vpop.xlane.xlu1 %670  ;;  %1007 = vperm.xlu1 %3374, %v554_v43   ;;  %v744_v43 = vsub.f32 %v3866_v1, %v4082_v25  ;;  %v601_v25 = vld [vmem:[%s5253_s6 + $0x38] sm:$0xff] }
  0xbe   : > { %3473 = vrsqrt.f32 %v750_v45  ;;  %v735_v50 = vmax.f32 %v727_v46, 0.0  ;;  %v736_v51 = vmax.f32 %v728_v47, 0.0  ;;  %v4104_v52 = vmul.f32 0.0078125, %v669_v48  ;;  %1122 = vperm.xlu0 %3373, %v577_v44  }
  0xbf   : > { %v4109_v54 = vmul.f32 0.0078125, %v671_v49 }
  0xc0   : > { %v751_v56 = vadd.f32 1e-05, %v735_v50  ;;  %v752_v57 = vadd.f32 1e-05, %v736_v51  ;;  %v721_v58 = vmul.f32 %v4104_v52, %v4104_v52  ;;  %v576_v51 = vld [vmem:[%s5251_s4 + $0x1f0] sm:$0xff] }
  0xc1   : > { %v702_v59 = vpop.xlane.xlu0 %701  ;;  %v704_v60 = vpop.xlane.xlu1 %703  ;;  %1097 = vperm.xlu1 %3374, %v572_v53   ;;  %v722_v61 = vmul.f32 %v4109_v54, %v4109_v54 }
  0xc2   : > { %3475 = vrsqrt.f32 %v751_v56  ;;  %v713_v62 = vmul.f32 0.0078125, %v702_v59  ;;  %v714_v63 = vmul.f32 0.0078125, %v704_v60  ;;  %1042 = vperm.xlu0 %3373, %v561_v55   ;;  %v560_v60 = vld [vmem:[%s5251_s4 + $0x170] sm:$0xff] }
  0xc3   : > { %3477 = vrsqrt.f32 %v752_v57 }
  0xc4   : > { %v3472_v8 = vpop.eup %3471  ;;  %v729_v11 = vsub.f32 %v713_v62, %v721_v58  ;;  %v730_v15 = vsub.f32 %v714_v63, %v722_v61  ;;  %v745_v61 = vsub.f32 %v3890_v9, %v4104_v52  ;;  %v746_v63 = vsub.f32 %v3893_v10, %v4109_v54  ;;  %v596_v54 = vld [vmem:[%s5253_s6 + $0x10] sm:$0xff] }
  0xc5   : > { %v673_v16 = vpop.xlane.xlu0 %672  ;;  %v675_v17 = vpop.xlane.xlu1 %674  ;;  %v765_v19 = vmul.f32 %v3472_v8, %v741_v6  ;;  %1017 = vperm.xlu1 %3374, %v556_v3  }
  0xc6   : > { %v737_v21 = vmax.f32 %v729_v11, 0.0  ;;  %v738_v22 = vmax.f32 %v730_v15, 0.0  ;;  %v4131_v2 = vmul.f32 0.0078125, %v673_v16  ;;  %v4133_v12 = vmul.f32 0.0078125, %v675_v17  ;;  %2248 = vperm.xlu0 %3373, %v595_v7   ;;  %v594_v11 = vld [vmem:[%s5253_s6] sm:$0xff] }
  0xc7   : > { %v779_v35 = vmul.f32 %v4129_v18, %v765_v19 }
  0xc8   : > { %v3474_v27 = vpop.eup %3473  ;;  %v753_v28 = vadd.f32 1e-05, %v737_v21  ;;  %v754_v29 = vadd.f32 1e-05, %v738_v22  ;;  %v723_v31 = vmul.f32 %v4131_v2, %v4131_v2  ;;  %v724_v4 = vmul.f32 %v4133_v12, %v4133_v12 }
  0xc9   : > { %v706_v32 = vpop.xlane.xlu0 %705  ;;  %v708_v33 = vpop.xlane.xlu1 %707  ;;  %v766_v34 = vmul.f32 %v3474_v27, %v742_v24  ;;  %1107 = vperm.xlu1 %3374, %v574_v23   ;;  %v793_v47 = vadd.f32 %v4151_v37, %v779_v35  ;;  %v747_v16 = vsub.f32 %v3902_v13, %v4131_v2  ;;  %v748_v19 = vsub.f32 %v3905_v14, %v4133_v12  ;;  %v600_v2 = vld [vmem:[%s5253_s6 + $0x30] sm:$0xff]  ;;  %v3382_v35 = vld [vmem:[%s5250_s3 + $0x38] sm:$0xff]  }
  0xca   : > { %3479 = vrsqrt.f32 %v753_v28  ;;  %v715_v20 = vmul.f32 0.0078125, %v706_v32  ;;  %v716_v36 = vmul.f32 0.0078125, %v708_v33  ;;  %2258 = vperm.xlu0 %3373, %v597_v26   ;;  %v598_v26 = vld [vmem:[%s5253_s6 + $0x20] sm:$0xff]  ;;  %v3380_v33 = vld [vmem:[%s5250_s3 + $0x28] sm:$0xff]  }
  0xcb   : > { %3481 = vrsqrt.f32 %v754_v29  ;;  %v780_v40 = vmul.f32 %v4129_v18, %v766_v34  ;;  %v3376_v29 = vld [vmem:[%s5250_s3 + $0x8] sm:$0xff]   ;;  %v3379_v32 = vld [vmem:[%s5250_s3 + $0x20] sm:$0xff]   ;;  %v3381_v34 = vld [vmem:[%s5250_s3 + $0x30] sm:$0xff]  }
  0xcc   : > { %v3476_v42 = vpop.eup %3475  ;;  %v731_v44 = vsub.f32 %v715_v20, %v723_v31  ;;  %v732_v45 = vsub.f32 %v716_v36, %v724_v4  ;;  %v3378_v31 = vld [vmem:[%s5250_s3 + $0x18] sm:$0xff]   ;;  %v3383_v4 = vld [vmem:[%s5250_s3 + $0x40] sm:$0xff]   ;;  %v3384_v20 = vld [vmem:[%s5250_s3 + $0x48] sm:$0xff]  }
  0xcd   : > { %v3478_v46 = vpop.eup %3477  ;;  %v794_v48 = vadd.f32 %v4151_v37, %v780_v40  ;;  %v767_v49 = vmul.f32 %v3476_v42, %v743_v39  ;;  %1027 = vperm.xlu1 %3374, %v558_v38   ;;  %v3385_v36 = vld [vmem:[%s5250_s3 + $0x50] sm:$0xff]   ;;  %v3387_v38 = vld [vmem:[%s5250_s3 + $0x60] sm:$0xff]   ;;  %v3388_v39 = vld [vmem:[%s5250_s3 + $0x68] sm:$0xff]  }
  0xce   : > { %v739_v5 = vmax.f32 %v731_v44, 0.0  ;;  %v740_v30 = vmax.f32 %v732_v45, 0.0  ;;  %v768_v50 = vmul.f32 %v3478_v46, %v744_v43  ;;  %2268 = vperm.xlu0 %3373, %v599_v41   ;;  %v3389_v40 = vld [vmem:[%s5250_s3 + $0x70] sm:$0xff]   ;;  %v3390_v41 = vld [vmem:[%s5250_s3 + $0x78] sm:$0xff]   ;;  %v3391_v42 = vld [vmem:[%s5250_s3 + $0x80] sm:$0xff]  }
  0xcf   : > { %v801_v53 = vpack.c.bf16 %v794_v48, %v793_v47  ;;  %v781_v1 = vmul.f32 %v4129_v18, %v767_v49  ;;  %v3392_v43 = vld [vmem:[%s5250_s3 + $0x88] sm:$0xff]   ;;  %v3393_v44 = vld [vmem:[%s5250_s3 + $0x90] sm:$0xff]   ;;  %v3394_v45 = vld [vmem:[%s5250_s3 + $0x98] sm:$0xff]  }
  0xd0   : > { %v755_v55 = vadd.f32 1e-05, %v739_v5  ;;  %v756_v56 = vadd.f32 1e-05, %v740_v30  ;;  %v782_v57 = vmul.f32 %v4129_v18, %v768_v50  ;;  %v3395_v46 = vld [vmem:[%s5250_s3 + $0xa0] sm:$0xff]   ;;  %v3396_v47 = vld [vmem:[%s5250_s3 + $0xa8] sm:$0xff]  }
  0xd1   : > { %3243 = vmatprep.subr.bf16.mxu0 %v801_v53  ;;  %v795_v58 = vadd.f32 %v4151_v37, %v781_v1  ;;  %1117 = vperm.xlu1 %3374, %v576_v51   ;;  %v3397_v48 = vld [vmem:[%s5250_s3 + $0xb0] sm:$0xff]   ;;  %v3398_v49 = vld [vmem:[%s5250_s3 + $0xb8] sm:$0xff]   ;;  %v3399_v5 = vld [vmem:[%s5250_s3 + $0xc0] sm:$0xff]   ;;  %v4309_v51 = vpop.permute.xlu1 %892 }
  0xd2   : > { %3483 = vrsqrt.f32 %v755_v55  ;;  %3244 = vmatpush3.bf16.msra.mxu0 %v801_v53  ;;  %v796_v59 = vadd.f32 %v4151_v37, %v782_v57  ;;  %2278 = vperm.xlu0 %3373, %v601_v25   ;;  %v3400_v30 = vld [vmem:[%s5250_s3 + $0xc8] sm:$0xff]   ;;  %v3401_v50 = vld [vmem:[%s5250_s3 + $0xd0] sm:$0xff]   ;;  %v3402_v53 = vld [vmem:[%s5250_s3 + $0xd8] sm:$0xff]  }
  0xd3   : > { %3485 = vrsqrt.f32 %v756_v56  ;;  %v3403_v25 = vld [vmem:[%s5250_s3 + $0xe0] sm:$0xff]   ;;  %v3404_v56 = vld [vmem:[%s5250_s3 + $0xe8] sm:$0xff]   ;;  %v3405_v57 = vld [vmem:[%s5250_s3 + $0xf0] sm:$0xff]  }
  0xd4   : > { %v3480_v62 = vpop.eup %3479  ;;  %v802_v3 = vpack.c.bf16 %v796_v59, %v795_v58  ;;  %v3406_v59 = vld [vmem:[%s5250_s3 + $0xf8] sm:$0xff]  }
  0xd5   : > { %v3482_v6 = vpop.eup %3481  ;;  %v769_v7 = vmul.f32 %v3480_v62, %v745_v61  ;;  %1037 = vperm.xlu1 %3374, %v560_v60   ;;  %v808_v1 = vpop.permute.xlu1 %807 }
  0xd6   : > { %3245 = vmatprep.subr.bf16.mxu0 %v802_v3  ;;  %v770_v8 = vmul.f32 %v3482_v6, %v746_v63  ;;  %v4337_v63 = vpop.permute.xlu0 %887 }
  0xd7   : > { %3246 = vmatpush3.bf16.msra.mxu0 %v802_v3  ;;  %v783_v15 = vmul.f32 %v4129_v18, %v769_v7 }
  0xd8   : > { %v784_v9 = vmul.f32 %v4129_v18, %v770_v8 }
  0xd9   : > { %v797_v52 = vadd.f32 %v4151_v37, %v783_v15  ;;  %2243 = vperm.xlu1 %3374, %v594_v11   ;;  %v813_v55 = vpop.permute.xlu1 %812 }
  0xda   : > { %v798_v10 = vadd.f32 %v4151_v37, %v784_v9  ;;  %v4341_v6 = vpop.permute.xlu0 %912 }
  0xdc   : > { %v3484_v17 = vpop.eup %3483  ;;  %v803_v21 = vpack.c.bf16 %v798_v10, %v797_v52 }
  0xdd   : > { %v3486_v22 = vpop.eup %3485  ;;  %v771_v23 = vmul.f32 %v3484_v17, %v747_v16  ;;  %2253 = vperm.xlu1 %3374, %v596_v54   ;;  %v4328_v58 = vpop.permute.xlu1 %897 }
  0xde   : > { %3247 = vmatprep.subr.bf16.mxu0 %v803_v21  ;;  %v772_v24 = vmul.f32 %v3486_v22, %v748_v19  ;;  %v833_v8 = vpop.permute.xlu0 %832 }
  0xdf   : > { %3248 = vmatpush3.bf16.msra.mxu0 %v803_v21  ;;  %v785_v27 = vmul.f32 %v4129_v18, %v771_v23 }
  0xe0   : > { %v786_v28 = vmul.f32 %v4129_v18, %v772_v24  ;;  %v3377_v18 = vld [vmem:[%s5250_s3 + $0x10] sm:$0xff]  }
  0xe1   : > { %v799_v13 = vadd.f32 %v4151_v37, %v785_v27  ;;  %2263 = vperm.xlu1 %3374, %v598_v26   ;;  %v4334_v60 = vpop.permute.xlu1 %902 }
  0xe2   : > { %v800_v14 = vadd.f32 %v4151_v37, %v786_v28  ;;  %v3386_v37 = vld [vmem:[%s5250_s3 + $0x58] sm:$0xff]   ;;  %v4345_v15 = vpop.permute.xlu0 %922 }
  0xe4   : > { %v804_v12 = vpack.c.bf16 %v800_v14, %v799_v13 }
  0xe5   : > { %2273 = vperm.xlu1 %3374, %v600_v2   ;;  %v818_v61 = vpop.permute.xlu1 %817  ;;  %v3409_v2 = vld [vmem:[%s5252_s5 + $0x4] ss:$16 sps:$4 sm:$0xff]  }
  0xe6   : > { %3249 = vmatprep.subr.bf16.mxu0 %v804_v12  ;;  %v843_v52 = vpop.permute.xlu0 %842  ;;  %2135 = vmatprep.mubr.bf16.mxu1 %v3409_v2 }
  0xe7   : > { %3250 = vmatpush3.bf16.msra.mxu0 %v804_v12 }
  0xe9   : > { %v823_v62 = vpop.permute.xlu1 %822 }
  0xea   : > { %3252 = vmatmul.mubr.msk.bf16.vlgmr.msra.gmra.mrb[0].mxu0 %vm1285_vm0, %v3376_v29  ;;  %v4349_v54 = vpop.permute.xlu0 %932 }
  0xeb   : > { %3255 = vmatprep.mubr.msk.bf16.mxu0 %vm1285_vm0, %v3377_v18 }
  0xed   : > { %v4339_v3 = vpop.permute.xlu1 %907 }
  0xee   : > { %v4353_v17 = vpop.permute.xlu0 %852 }
  0xf1   : > { %v828_v7 = vpop.permute.xlu1 %827 }
  0xf2   : > { %3256 = vmatmul.mubr.msk.bf16.gmra.mrb[4].mxu0 %vm1285_vm0, %v3378_v31  ;;  %v4357_v21 = vpop.permute.xlu0 %942 }
  0xf3   : > { %3259 = vmatprep.mubr.msk.bf16.mxu0 %vm1285_vm0, %v3379_v32 }
  0xf5   : > { %v4343_v11 = vpop.permute.xlu1 %917 }
  0xf6   : > { %v4359_v23 = vpop.permute.xlu0 %862 }
  0xf9   : > { %v838_v9 = vpop.permute.xlu1 %837 }
  0xfa   : > { %3260 = vmatmul.mubr.msk.bf16.gmra.mrb[8].mxu0 %vm1285_vm0, %v3380_v33  ;;  %v4363_v26 = vpop.permute.xlu0 %952 }
  0xfb   : > { %3263 = vmatprep.mubr.msk.bf16.mxu0 %vm1285_vm0, %v3381_v34 }
  0xfd   : > { %v4347_v10 = vpop.permute.xlu1 %927 }
  0xfe   : > { %v4367_v28 = vpop.permute.xlu0 %872 }
 0x101   : > { %v4351_v16 = vpop.permute.xlu1 %847 }
 0x102   : > { %3264 = vmatmul.mubr.msk.bf16.gmra.mrb[12].mxu0 %vm1285_vm0, %v3382_v35  ;;  %v4371_v14 = vpop.permute.xlu0 %962 }
 0x103   : > { %3267 = vmatprep.mubr.msk.bf16.mxu0 %vm1285_vm0, %v3383_v4 }
 0x105   : > { %v4355_v19 = vpop.permute.xlu1 %937 }
 0x106   : > { %v4378_v29 = vpop.permute.xlu0 %882 }
 0x109   : > { %v858_v22 = vpop.permute.xlu1 %857 }
 0x10a   : > { %3268 = vmatmul.mubr.msk.bf16.gmra.mrb[16].mxu0 %vm1285_vm0, %v3384_v20  ;;  %v4382_v32 = vpop.permute.xlu0 %1052 }
 0x10b   : > { %3271 = vmatprep.mubr.msk.bf16.mxu0 %vm1285_vm0, %v3385_v36 }
 0x10d   : > { %v4361_v24 = vpop.permute.xlu1 %947 }
 0x111   : > { %v4365_v27 = vpop.permute.xlu1 %867 }
 0x112   : > { %3272 = vmatmul.mubr.msk.bf16.gmra.mrb[20].mxu0 %vm1285_vm0, %v3386_v37 }
 0x113   : > { %3275 = vmatprep.mubr.msk.bf16.mxu0 %vm1285_vm0, %v3387_v38 }
 0x115   : > { %v4369_v13 = vpop.permute.xlu1 %957 }
 0x119   : > { %v4376_v12 = vpop.permute.xlu1 %877 }
 0x11a   : > { %3276 = vmatmul.mubr.msk.bf16.gmra.mrb[24].mxu0 %vm1285_vm0, %v3388_v39 }
 0x11b   : > { %3279 = vmatprep.mubr.msk.bf16.mxu0 %vm1285_vm0, %v3389_v40 }
 0x11d   : > { %v4380_v18 = vpop.permute.xlu1 %1047 }
 0x121   : > { %v4384_v38 = vpop.permute.xlu1 %967 }
 0x122   : > { %3280 = vmatmul.mubr.msk.bf16.gmra.mrb[28].mxu0 %vm1285_vm0, %v3390_v41 }
 0x123   : > { %3283 = vmatprep.mubr.msk.bf16.mxu0 %vm1285_vm0, %v3391_v42 }
 0x12a   : > { %3284 = vmatmul.mubr.msk.bf16.gmra.mrb[32].mxu0 %vm1285_vm0, %v3392_v43  ;;  %v4386_v43 = vpop.permute.xlu0 %972 }
 0x12b   : > { %3287 = vmatprep.mubr.msk.bf16.mxu0 %vm1285_vm0, %v3393_v44 }
 0x132   : > { %3288 = vmatmul.mubr.msk.bf16.gmra.mrb[36].mxu0 %vm1285_vm0, %v3394_v45 }
 0x133   : > { %3291 = vmatprep.mubr.msk.bf16.mxu0 %vm1285_vm0, %v3395_v46 }
 0x13a   : > { %3292 = vmatmul.mubr.msk.bf16.gmra.mrb[40].mxu0 %vm1285_vm0, %v3396_v47  ;;  %v4390_v47 = vpop.permute.xlu1 %1057 }
 0x13b   : > { %3295 = vmatprep.mubr.msk.bf16.mxu0 %vm1285_vm0, %v3397_v48 }
 0x142   : > { %3296 = vmatmul.mubr.msk.bf16.gmra.mrb[44].mxu0 %vm1285_vm0, %v3398_v49 }
 0x143   : > { %3299 = vmatprep.mubr.msk.bf16.mxu0 %vm1285_vm0, %v3399_v5 }
 0x14a   : > { %3300 = vmatmul.mubr.msk.bf16.gmra.mrb[48].mxu0 %vm1285_vm0, %v3400_v30 }
 0x14b   : > { %3303 = vmatprep.mubr.msk.bf16.mxu0 %vm1285_vm0, %v3401_v50 }
 0x152   : > { %3304 = vmatmul.mubr.msk.bf16.gmra.mrb[52].mxu0 %vm1285_vm0, %v3402_v53 }
 0x153   : > { %3307 = vmatprep.mubr.msk.bf16.mxu0 %vm1285_vm0, %v3403_v25  ;;  %v4396_v25 = vpop.permute.xlu0 %1062 }
 0x15a   : > { %3308 = vmatmul.mubr.msk.bf16.gmra.mrb[56].mxu0 %vm1285_vm0, %v3404_v56 }
 0x15b   : > { %3311 = vmatprep.mubr.msk.bf16.mxu0 %vm1285_vm0, %v3405_v57 }
 0x162   : > { %3312 = vmatmul.mubr.msk.bf16.gmra.mrb[60].mxu0 %vm1285_vm0, %v3406_v59 }
 0x1bd   : > { %v3253_v31 = vpop.f32.mrb[0].mxu0 }
 0x1be   : > { %v1425_v33 = vadd.f32 %v3253_v31, %v818_v61  ;;  %v1416_v34 = vpop.f32.mrb[1].mxu0  ;;  %v4398_v61 = vpop.permute.xlu1 %977 }
 0x1bf   : > { %v1417_v35 = vadd.f32 %v1416_v34, %v808_v1  ;;  %v3254_v4 = vpop.f32.mrb[2].mxu0 }
 0x1c0   : > { %v1737_v20 = vmul.f32 0.70710677, %v1425_v33  ;;  %v1428_v36 = vadd.f32 %v3254_v4, %v823_v62  ;;  %v1419_v37 = vpop.f32.mrb[3].mxu0 }
 0x1c1   : > { %v1735_v39 = vmul.f32 0.70710677, %v1417_v35  ;;  %v1420_v40 = vadd.f32 %v1419_v37, %v813_v55 }
 0x1c2   : > { %3487 = verf.f32 %v1737_v20  ;;  %v1738_v41 = vmul.f32 0.70710677, %v1428_v36  ;;  %v1674_v34 = vmul.f32 0.5, %v1428_v36 }
 0x1c3   : > { %3489 = verf.f32 %v1735_v39  ;;  %v1736_v42 = vmul.f32 0.70710677, %v1420_v40 }
 0x1c4   : > { %3491 = verf.f32 %v1738_v41  ;;  %v4405_v41 = vpop.permute.xlu0 %982 }
 0x1c5   : > { %3493 = verf.f32 %v1736_v42  ;;  %v3257_v44 = vpop.f32.mrb[4].mxu0  ;;  %v1671_v42 = vmul.f32 0.5, %v1417_v35 }
 0x1c6   : > { %v4388_v45 = vadd.f32 %v3257_v44, %v838_v9  ;;  %v1432_v46 = vpop.f32.mrb[5].mxu0  ;;  %v1673_v9 = vmul.f32 0.5, %v1425_v33 }
 0x1c7   : > { %v4392_v48 = vadd.f32 %v1432_v46, %v828_v7  ;;  %v3258_v49 = vpop.f32.mrb[6].mxu0 }
 0x1c8   : > { %v1741_v5 = vmul.f32 0.70710677, %v4388_v45  ;;  %v1444_v30 = vadd.f32 %v3258_v49, %v843_v52  ;;  %v1435_v50 = vpop.f32.mrb[7].mxu0 }
 0x1c9   : > { %v1739_v53 = vmul.f32 0.70710677, %v4392_v48  ;;  %v1436_v1 = vadd.f32 %v1435_v50, %v833_v8 }
 0x1ca   : > { %3495 = verf.f32 %v1741_v5  ;;  %v1742_v55 = vmul.f32 0.70710677, %v1444_v30  ;;  %v1672_v5 = vmul.f32 0.5, %v1420_v40 }
 0x1cb   : > { %3497 = verf.f32 %v1739_v53  ;;  %v1740_v56 = vmul.f32 0.70710677, %v1436_v1  ;;  %v4420_v53 = vpop.permute.xlu1 %1067 }
 0x1cc   : > { %v3488_v57 = vpop.eup %3487  ;;  %3499 = verf.f32 %v1742_v55  ;;  %5270 = vst [vmem:[#allocation7_spill] sm:$0xff] %v4420_v53 }
 0x1cd   : > { %v3490_v59 = vpop.eup %3489  ;;  %3501 = verf.f32 %v1740_v56  ;;  %v3261_v62 = vpop.f32.mrb[8].mxu0  ;;  %v1865_v52 = vadd.f32 1.0, %v3488_v57 }
 0x1ce   : > { %v3492_v7 = vpop.eup %3491  ;;  %v4400_v2 = vadd.f32 %v3261_v62, %v858_v22  ;;  %v1448_v31 = vpop.f32.mrb[9].mxu0  ;;  %v1863_v39 = vadd.f32 1.0, %v3490_v59 }
 0x1cf   : > { %v3494_v8 = vpop.eup %3493  ;;  %v1866_v4 = vadd.f32 1.0, %v3492_v7  ;;  %v4403_v20 = vadd.f32 %v1448_v31, %v4351_v16  ;;  %v3262_v37 = vpop.f32.mrb[10].mxu0  ;;  %v4417_v50 = vmul.f32 %v1865_v52, %v1673_v9 }
 0x1d0   : > { %v1745_v44 = vmul.f32 0.70710677, %v4400_v2  ;;  %v4409_v46 = vadd.f32 %v3262_v37, %v4359_v23  ;;  %v1451_v33 = vpop.f32.mrb[11].mxu0  ;;  %v1864_v22 = vadd.f32 1.0, %v3494_v8  ;;  %v4423_v55 = vmul.f32 %v1863_v39, %v1671_v42  ;;  %v4431_v52 = vpop.permute.xlu0 %1072 }
 0x1d1   : > { %v4411_v49 = vmul.f32 %v1866_v4, %v1674_v34  ;;  %v1743_v36 = vmul.f32 0.70710677, %v4403_v20  ;;  %v4415_v16 = vadd.f32 %v1451_v33, %v4353_v17  ;;  %5271 = vst [vmem:[#allocation8_spill] sm:$0xff] %v4431_v52  ;;  %v1677_v37 = vmul.f32 0.5, %v4388_v45 }
 0x1d2   : > { %3503 = verf.f32 %v1745_v44  ;;  %v1746_v35 = vmul.f32 0.70710677, %v4409_v46  ;;  %v4425_v56 = vmul.f32 %v1864_v22, %v1672_v5  ;;  %v1678_v39 = vmul.f32 0.5, %v1444_v30 }
 0x1d3   : > { %3505 = verf.f32 %v1743_v36  ;;  %v1744_v23 = vmul.f32 0.70710677, %v4415_v16  ;;  %v1675_v22 = vmul.f32 0.5, %v4392_v48  ;;  %v1676_v5 = vmul.f32 0.5, %v1436_v1 }
 0x1d4   : > { %v3496_v40 = vpop.eup %3495  ;;  %3507 = verf.f32 %v1746_v35 }
 0x1d5   : > { %v3498_v57 = vpop.eup %3497  ;;  %v1869_v59 = vadd.f32 1.0, %v3496_v40  ;;  %3509 = verf.f32 %v1744_v23  ;;  %v3265_v62 = vpop.f32.mrb[12].mxu0 }
 0x1d6   : > { %v3500_v9 = vpop.eup %3499  ;;  %v1867_v31 = vadd.f32 1.0, %v3498_v57  ;;  %v4434_v8 = vadd.f32 %v3265_v62, %v4376_v12  ;;  %v1464_v34 = vpop.f32.mrb[13].mxu0 }
 0x1d7   : > { %v3502_v4 = vpop.eup %3501  ;;  %v1870_v42 = vadd.f32 1.0, %v3500_v9  ;;  %v4438_v44 = vadd.f32 %v1464_v34, %v4365_v27  ;;  %v3266_v33 = vpop.f32.mrb[14].mxu0  ;;  %v4444_v12 = vmul.f32 %v1869_v59, %v1677_v37 }
 0x1d8   : > { %v1868_v36 = vadd.f32 1.0, %v3502_v4  ;;  %v1749_v35 = vmul.f32 0.70710677, %v4434_v8  ;;  %v1467_v23 = vpop.f32.mrb[15].mxu0  ;;  %v4442_v40 = vpop.permute.xlu1 %987  ;;  %v4450_v30 = vadd.f32 %v3266_v33, %v4378_v29  ;;  %v4452_v27 = vmul.f32 %v1867_v31, %v1675_v22 }
 0x1d9   : > { %v4446_v57 = vmul.f32 %v1870_v42, %v1678_v39  ;;  %v1747_v45 = vmul.f32 0.70710677, %v4438_v44  ;;  %v4457_v48 = vadd.f32 %v1467_v23, %v4367_v28  ;;  %v4462_v34 = vpop.permute.xlu0 %992  ;;  %v1682_v23 = vmul.f32 0.5, %v4409_v46 }
 0x1da   : > { %v4454_v62 = vmul.f32 %v1868_v36, %v1676_v5  ;;  %3511 = verf.f32 %v1749_v35  ;;  %v1750_v1 = vmul.f32 0.70710677, %v4450_v30  ;;  %v1681_v35 = vmul.f32 0.5, %v4400_v2 }
 0x1db   : > { %3513 = verf.f32 %v1747_v45  ;;  %v1748_v29 = vmul.f32 0.70710677, %v4457_v48  ;;  %v1684_v17 = vmul.f32 0.5, %v4457_v48 }
 0x1dc   : > { %v3504_v9 = vpop.eup %3503  ;;  %3515 = verf.f32 %v1750_v1  ;;  %v4470_v36 = vpop.permute.xlu1 %1077 }
 0x1dd   : > { %v3506_v4 = vpop.eup %3505  ;;  %v1873_v37 = vadd.f32 1.0, %v3504_v9  ;;  %v3269_v39 = vpop.f32.mrb[16].mxu0  ;;  %3517 = verf.f32 %v1748_v29  ;;  %5272 = vst [vmem:[#allocation9_spill] sm:$0xff] %v4470_v36  ;;  %v1679_v9 = vmul.f32 0.5, %v4403_v20  ;;  %v1680_v29 = vmul.f32 0.5, %v4415_v16 }
 0x1de   : > { %v3508_v28 = vpop.eup %3507  ;;  %v1871_v42 = vadd.f32 1.0, %v3506_v4  ;;  %v4468_v33 = vadd.f32 %v3269_v39, %v4328_v58  ;;  %v1480_v22 = vpop.f32.mrb[17].mxu0 }
 0x1df   : > { %v3510_v5 = vpop.eup %3509  ;;  %v1874_v45 = vadd.f32 1.0, %v3508_v28  ;;  %v4475_v0 = vadd.f32 %v1480_v22, %v4337_v63  ;;  %v3270_v1 = vpop.f32.mrb[18].mxu0  ;;  %v4480_v59 = vmul.f32 %v1873_v37, %v1681_v35 }
 0x1e0   : > { %v1872_v4 = vadd.f32 1.0, %v3510_v5  ;;  %v1753_v58 = vmul.f32 0.70710677, %v4468_v33  ;;  %v1483_v39 = vpop.f32.mrb[19].mxu0  ;;  %v1492_v46 = vadd.f32 %v3270_v1, %v4334_v60  ;;  %v4486_v28 = vpop.permute.xlu0 %1082  ;;  %v4488_v63 = vmul.f32 %v1871_v42, %v1679_v9 }
 0x1e1   : > { %v4482_v31 = vmul.f32 %v1874_v45, %v1682_v23  ;;  %v1751_v2 = vmul.f32 0.70710677, %v4475_v0  ;;  %5273 = vst [vmem:[#allocation10_spill] sm:$0xff] %v4486_v28  ;;  %v4493_v20 = vadd.f32 %v1483_v39, %v4309_v51  ;;  %v4500_v42 = vpop.permute.xlu1 %997 }
 0x1e2   : > { %v4490_v22 = vmul.f32 %v1872_v4, %v1680_v29  ;;  %3519 = verf.f32 %v1753_v58  ;;  %v1754_v16 = vmul.f32 0.70710677, %v1492_v46  ;;  %v1685_v4 = vmul.f32 0.5, %v4434_v8 }
 0x1e3   : > { %3521 = verf.f32 %v1751_v2  ;;  %v1752_v35 = vmul.f32 0.70710677, %v4493_v20 }
 0x1e4   : > { %v3512_v5 = vpop.eup %3511  ;;  %3523 = verf.f32 %v1754_v16  ;;  %v4509_v60 = vpop.permute.xlu0 %1002  ;;  %v1683_v16 = vmul.f32 0.5, %v4438_v44 }
 0x1e5   : > { %v3514_v23 = vpop.eup %3513  ;;  %v3273_v45 = vpop.f32.mrb[20].mxu0  ;;  %v1877_v1 = vadd.f32 1.0, %v3512_v5  ;;  %3525 = verf.f32 %v1752_v35  ;;  %v1686_v5 = vmul.f32 0.5, %v4450_v30 }
 0x1e6   : > { %v4503_v51 = vadd.f32 %v3273_v45, %v4343_v11  ;;  %v1496_v9 = vpop.f32.mrb[21].mxu0  ;;  %v3516_v29 = vpop.eup %3515  ;;  %v1875_v58 = vadd.f32 1.0, %v3514_v23 }
 0x1e7   : > { %v4507_v39 = vadd.f32 %v1496_v9, %v4339_v3  ;;  %v3274_v2 = vpop.f32.mrb[22].mxu0  ;;  %v3518_v37 = vpop.eup %3517  ;;  %v1878_v35 = vadd.f32 1.0, %v3516_v29  ;;  %v4519_v23 = vmul.f32 %v1877_v1, %v1685_v4 }
 0x1e8   : > { %v1757_v11 = vmul.f32 0.70710677, %v4503_v51  ;;  %v1499_v45 = vpop.f32.mrb[23].mxu0  ;;  %v1876_v7 = vadd.f32 1.0, %v3518_v37  ;;  %v4517_v3 = vadd.f32 %v3274_v2, %v4345_v15  ;;  %v4526_v30 = vpop.permute.xlu1 %1087  ;;  %v4528_v29 = vmul.f32 %v1875_v58, %v1683_v16 }
 0x1e9   : > { %v1755_v8 = vmul.f32 0.70710677, %v4507_v39  ;;  %v4521_v9 = vmul.f32 %v1878_v35, %v1686_v5  ;;  %v4524_v44 = vadd.f32 %v1499_v45, %v4341_v6  ;;  %5274 = vst [vmem:[#allocation11_spill] sm:$0xff] %v4526_v30  ;;  %v4538_v5 = vpop.permute.xlu0 %1092  ;;  %v1689_v35 = vmul.f32 0.5, %v4468_v33 }
 0x1ea   : > { %3527 = verf.f32 %v1757_v11  ;;  %v4530_v52 = vmul.f32 %v1876_v7, %v1684_v17  ;;  %v1758_v48 = vmul.f32 0.70710677, %v4517_v3  ;;  %5275 = vst [vmem:[#allocation12_spill] sm:$0xff] %v4538_v5  ;;  %v1687_v11 = vmul.f32 0.5, %v4475_v0 }
 0x1eb   : > { %3529 = verf.f32 %v1755_v8  ;;  %v1756_v15 = vmul.f32 0.70710677, %v4524_v44  ;;  %v1690_v45 = vmul.f32 0.5, %v1492_v46  ;;  %v1688_v33 = vmul.f32 0.5, %v4493_v20 }
 0x1ec   : > { %v3520_v37 = vpop.eup %3519  ;;  %3531 = verf.f32 %v1758_v48 }
 0x1ed   : > { %v3522_v4 = vpop.eup %3521  ;;  %v3277_v2 = vpop.f32.mrb[24].mxu0  ;;  %v1881_v58 = vadd.f32 1.0, %v3520_v37  ;;  %3533 = verf.f32 %v1756_v15 }
 0x1ee   : > { %v4541_v17 = vadd.f32 %v3277_v2, %v4355_v19  ;;  %v1512_v7 = vpop.f32.mrb[25].mxu0  ;;  %v3524_v16 = vpop.eup %3523  ;;  %v1879_v15 = vadd.f32 1.0, %v3522_v4 }
 0x1ef   : > { %v4546_v8 = vadd.f32 %v1512_v7, %v4347_v10  ;;  %v3278_v48 = vpop.f32.mrb[26].mxu0  ;;  %v3526_v1 = vpop.eup %3525  ;;  %v1882_v6 = vadd.f32 1.0, %v3524_v16  ;;  %v1945_v7 = vmul.f32 %v1881_v58, %v1689_v35 }
 0x1f0   : > { %v1761_v5 = vmul.f32 0.70710677, %v4541_v17  ;;  %v4550_v37 = vadd.f32 %v3278_v48, %v4357_v21  ;;  %v1515_v19 = vpop.f32.mrb[27].mxu0  ;;  %v4552_v2 = vpop.permute.xlu1 %1007  ;;  %v1880_v10 = vadd.f32 1.0, %v3526_v1  ;;  %v1943_v28 = vmul.f32 %v1879_v15, %v1687_v11 }
 0x1f1   : > { %v1759_v0 = vmul.f32 0.70710677, %v4546_v8  ;;  %v4557_v46 = vadd.f32 %v1515_v19, %v4349_v54  ;;  %v1946_v30 = vmul.f32 %v1882_v6, %v1690_v45  ;;  %v4561_v4 = vpop.permute.xlu0 %1012  ;;  %v1693_v45 = vmul.f32 0.5, %v4503_v51 }
 0x1f2   : > { %3535 = verf.f32 %v1761_v5  ;;  %v1762_v16 = vmul.f32 0.70710677, %v4550_v37  ;;  %v1944_v20 = vmul.f32 %v1880_v10, %v1688_v33  ;;  %v1691_v15 = vmul.f32 0.5, %v4507_v39 }
 0x1f3   : > { %3537 = verf.f32 %v1759_v0  ;;  %v1760_v21 = vmul.f32 0.70710677, %v4557_v46  ;;  %v2000_v53 = vpack.c.bf16 %v1946_v30, %v1945_v7  ;;  %v1694_v33 = vmul.f32 0.5, %v4517_v3 }
 0x1f4   : > { %v3528_v48 = vpop.eup %3527  ;;  %3539 = verf.f32 %v1762_v16  ;;  %v1999_v5 = vpack.c.bf16 %v1944_v20, %v1943_v28  ;;  %v4566_v35 = vpop.permute.xlu1 %1097  ;;  %v1692_v7 = vmul.f32 0.5, %v4524_v44 }
 0x1f5   : > { %v3530_v36 = vpop.eup %3529  ;;  %3541 = verf.f32 %v1760_v21  ;;  %v3281_v54 = vpop.f32.mrb[28].mxu0  ;;  %v1885_v19 = vadd.f32 1.0, %v3528_v48 }
 0x1f6   : > { %v4564_v1 = vadd.f32 %v3281_v54, %v4369_v13  ;;  %v1528_v6 = vpop.f32.mrb[29].mxu0  ;;  %v3532_v58 = vpop.eup %3531  ;;  %v1883_v0 = vadd.f32 1.0, %v3530_v36  ;;  %3123 = vmatprep.subr.bf16.mxu1 %v1999_v5 }
 0x1f7   : > { %v4570_v16 = vadd.f32 %v1528_v6, %v4361_v24  ;;  %v3282_v11 = vpop.f32.mrb[30].mxu0  ;;  %v3534_v30 = vpop.eup %3533  ;;  %v1886_v10 = vadd.f32 1.0, %v3532_v58  ;;  %v5276_v24 = vpack.c.bf16 %v4425_v56, %v4423_v55  ;;  %v1949_v3 = vmul.f32 %v1885_v19, %v1693_v45 }
 0x1f8   : > { %v1765_v13 = vmul.f32 0.70710677, %v4564_v1  ;;  %v1531_v28 = vpop.f32.mrb[31].mxu0  ;;  %v1884_v21 = vadd.f32 1.0, %v3534_v30  ;;  %v4578_v36 = vadd.f32 %v3282_v11, %v4371_v14  ;;  %v4583_v39 = vpop.permute.xlu0 %1102  ;;  %v1947_v44 = vmul.f32 %v1883_v0, %v1691_v15 }
 0x1f9   : > { %v1763_v51 = vmul.f32 0.70710677, %v4570_v16  ;;  %3124 = vmatpush3.bf16.msra.mxu1 %v5276_v24  ;;  %v1950_v48 = vmul.f32 %v1886_v10, %v1694_v33  ;;  %v4586_v20 = vadd.f32 %v1531_v28, %v4363_v26  ;;  %v4590_v56 = vpop.permute.xlu1 %1017  ;;  %v5277_v19 = vpack.c.bf16 %v4411_v49, %v4417_v50 }
 0x1fa   : > { %3543 = verf.f32 %v1765_v13  ;;  %3125 = vmatprep.subr.bf16.mxu1 %v2000_v53  ;;  %v1948_v54 = vmul.f32 %v1884_v21, %v1692_v7  ;;  %v1766_v6 = vmul.f32 0.70710677, %v4578_v36  ;;  %v1697_v10 = vmul.f32 0.5, %v4541_v17 }
 0x1fb   : > { %3545 = verf.f32 %v1763_v51  ;;  %v1764_v5 = vmul.f32 0.70710677, %v4586_v20  ;;  %v2002_v58 = vpack.c.bf16 %v1950_v48, %v1949_v3  ;;  %v1698_v13 = vmul.f32 0.5, %v4550_v37 }
 0x1fc   : > { %v3536_v14 = vpop.eup %3535  ;;  %3547 = verf.f32 %v1766_v6  ;;  %v2001_v53 = vpack.c.bf16 %v1948_v54, %v1947_v44  ;;  %v4603_v50 = vpop.permute.xlu0 %1022  ;;  %v1695_v21 = vmul.f32 0.5, %v4546_v8  ;;  %v1696_v51 = vmul.f32 0.5, %v4557_v46 }
 0x1fd   : > { %v3538_v55 = vpop.eup %3537  ;;  %v1889_v11 = vadd.f32 1.0, %v3536_v14  ;;  %3126 = vmatpush3.bf16.msra.mxu1 %v5277_v19  ;;  %v3285_v26 = vpop.f32.mrb[32].mxu0  ;;  %3549 = verf.f32 %v1764_v5 }
 0x1fe   : > { %v3540_v45 = vpop.eup %3539  ;;  %v1887_v0 = vadd.f32 1.0, %v3538_v55  ;;  %v4596_v30 = vadd.f32 %v3285_v26, %v4398_v61  ;;  %v1544_v15 = vpop.f32.mrb[33].mxu0  ;;  %3127 = vmatprep.subr.bf16.mxu1 %v2001_v53 }
 0x1ff   : > { %v3542_v33 = vpop.eup %3541  ;;  %v1890_v28 = vadd.f32 1.0, %v3540_v45  ;;  %v4601_v7 = vadd.f32 %v1544_v15, %v4384_v38  ;;  %v3286_v49 = vpop.f32.mrb[34].mxu0  ;;  %v1953_v48 = vmul.f32 %v1889_v11, %v1697_v10  ;;  %v5278_v38 = vpack.c.bf16 %v4454_v62, %v4452_v27 }
 0x200   : > { %v1888_v61 = vadd.f32 1.0, %v3542_v33  ;;  %v1769_v24 = vmul.f32 0.70710677, %v4596_v30  ;;  %v1547_v3 = vpop.f32.mrb[35].mxu0  ;;  %v4610_v44 = vadd.f32 %v3286_v49, %v4405_v41  ;;  %v1951_v54 = vmul.f32 %v1887_v0, %v1695_v21  ;;  %v4618_v46 = vpop.permute.xlu1 %1107 }
 0x201   : > { %v1954_v17 = vmul.f32 %v1890_v28, %v1698_v13  ;;  %v1767_v37 = vmul.f32 0.70710677, %v4601_v7  ;;  %3128 = vmatpush3.bf16.msra.mxu1 %v5278_v38  ;;  %v4616_v8 = vadd.f32 %v1547_v3, %v4386_v43  ;;  %v5279_v27 = vpack.c.bf16 %v4446_v57, %v4444_v12  ;;  %v4625_v43 = vpop.permute.xlu0 %1112 }
 0x202   : > { %v1952_v6 = vmul.f32 %v1888_v61, %v1696_v51  ;;  %3551 = verf.f32 %v1769_v24  ;;  %3129 = vmatprep.subr.bf16.mxu1 %v2002_v58  ;;  %v1770_v14 = vmul.f32 0.70710677, %v4610_v44  ;;  %v1701_v0 = vmul.f32 0.5, %v4564_v1 }
 0x203   : > { %3553 = verf.f32 %v1767_v37  ;;  %v2004_v5 = vpack.c.bf16 %v1954_v17, %v1953_v48  ;;  %v1768_v41 = vmul.f32 0.70710677, %v4616_v8  ;;  %v1699_v57 = vmul.f32 0.5, %v4570_v16 }
 0x204   : > { %v3544_v55 = vpop.eup %3543  ;;  %v2003_v11 = vpack.c.bf16 %v1952_v6, %v1951_v54  ;;  %3555 = verf.f32 %v1770_v14  ;;  %v1702_v13 = vmul.f32 0.5, %v4578_v36  ;;  %v4637_v21 = vpop.permute.xlu1 %1027  ;;  %v1700_v51 = vmul.f32 0.5, %v4586_v20 }
 0x205   : > { %v3546_v19 = vpop.eup %3545  ;;  %3130 = vmatpush3.bf16.msra.mxu1 %v5279_v27  ;;  %v3289_v62 = vpop.f32.mrb[36].mxu0  ;;  %v1893_v58 = vadd.f32 1.0, %v3544_v55  ;;  %3557 = verf.f32 %v1768_v41  ;;  %v5280_v24 = vpack.c.bf16 %v4490_v22, %v4488_v63  ;;  %v5281_v22 = vpack.c.bf16 %v4482_v31, %v4480_v59 }
 0x206   : > { %v4628_v26 = vadd.f32 %v3289_v62, %v4500_v42  ;;  %v1560_v53 = vpop.f32.mrb[37].mxu0  ;;  %3131 = vmatprep.subr.bf16.mxu1 %v2003_v11  ;;  %v3548_v45 = vpop.eup %3547  ;;  %v1891_v15 = vadd.f32 1.0, %v3546_v19  ;;  %v1705_v19 = vmul.f32 0.5, %v4596_v30 }
 0x207   : > { %v4632_v33 = vadd.f32 %v1560_v53, %v4442_v40  ;;  %v3290_v10 = vpop.f32.mrb[38].mxu0  ;;  %v3550_v12 = vpop.eup %3549  ;;  %v1894_v28 = vadd.f32 1.0, %v3548_v45  ;;  %v1957_v16 = vmul.f32 %v1893_v58, %v1701_v0  ;;  %v1703_v58 = vmul.f32 0.5, %v4601_v7 }
 0x208   : > { %v1773_v49 = vmul.f32 0.70710677, %v4628_v26  ;;  %v1563_v42 = vpop.f32.mrb[39].mxu0  ;;  %v1892_v61 = vadd.f32 1.0, %v3550_v12  ;;  %v4642_v40 = vadd.f32 %v3290_v10, %v4509_v60  ;;  %v1955_v48 = vmul.f32 %v1891_v15, %v1699_v57  ;;  %v4651_v38 = vpop.permute.xlu0 %1032 }
 0x209   : > { %v1771_v1 = vmul.f32 0.70710677, %v4632_v33  ;;  %3132 = vmatpush3.bf16.msra.mxu1 %v5280_v24  ;;  %v1958_v36 = vmul.f32 %v1894_v28, %v1702_v13  ;;  %v4648_v3 = vadd.f32 %v1563_v42, %v4462_v34  ;;  %v4660_v11 = vpop.permute.xlu1 %1117  ;;  %v1706_v53 = vmul.f32 0.5, %v4610_v44  ;;  %v3407_v42 = vld [vmem:[%s5252_s5] ss:$16 sps:$4 sm:$0xff]  }
 0x20a   : > { %3559 = verf.f32 %v1773_v49  ;;  %3133 = vmatprep.subr.bf16.mxu1 %v2004_v5  ;;  %v1956_v17 = vmul.f32 %v1892_v61, %v1700_v51  ;;  %v1774_v20 = vmul.f32 0.70710677, %v4642_v40  ;;  %v1704_v15 = vmul.f32 0.5, %v4616_v8 }
 0x20b   : > { %3561 = verf.f32 %v1771_v1  ;;  %v1772_v60 = vmul.f32 0.70710677, %v4648_v3  ;;  %v2006_v54 = vpack.c.bf16 %v1958_v36, %v1957_v16  ;;  %v5283_v1 = vpack.c.bf16 %v4521_v9, %v4519_v23  ;;  %v3410_v16 = vld [vmem:[%s5252_s5 + $0x24] ss:$16 sps:$4 sm:$0xff]  }
 0x20c   : > { %v3552_v37 = vpop.eup %3551  ;;  %3563 = verf.f32 %v1774_v20  ;;  %v2005_v6 = vpack.c.bf16 %v1956_v17, %v1955_v48  ;;  %v4677_v57 = vpop.permute.xlu0 %1122 }
 0x20d   : > { %v3554_v63 = vpop.eup %3553  ;;  %3134 = vmatpush3.bf16.msra.mxu1 %v5281_v22  ;;  %v3293_v34 = vpop.f32.mrb[40].mxu0  ;;  %v1897_v14 = vadd.f32 1.0, %v3552_v37  ;;  %3565 = verf.f32 %v1772_v60  ;;  %v1709_v37 = vmul.f32 0.5, %v4628_v26  ;;  %v1707_v22 = vmul.f32 0.5, %v4632_v33 }
 0x20e   : > { %v4658_v5 = vadd.f32 %v3293_v34, %v4590_v56  ;;  %v1576_v55 = vpop.f32.mrb[41].mxu0  ;;  %v3556_v41 = vpop.eup %3555  ;;  %v1895_v27 = vadd.f32 1.0, %v3554_v63  ;;  %3135 = vmatprep.subr.bf16.mxu1 %v2005_v6  ;;  %v1710_v34 = vmul.f32 0.5, %v4642_v40 }
 0x20f   : > { %v4664_v62 = vadd.f32 %v1576_v55, %v4552_v2  ;;  %v3294_v59 = vpop.f32.mrb[42].mxu0  ;;  %v3558_v31 = vpop.eup %3557  ;;  %v1898_v45 = vadd.f32 1.0, %v3556_v41  ;;  %v5282_v2 = vpack.c.bf16 %v4530_v52, %v4528_v29  ;;  %v4679_v7 = vmul.f32 %v1897_v14, %v1705_v19 }
 0x210   : > { %v1777_v56 = vmul.f32 0.70710677, %v4658_v5  ;;  %v1579_v0 = vpop.f32.mrb[43].mxu0  ;;  %v1896_v10 = vadd.f32 1.0, %v3558_v31  ;;  %v4672_v12 = vadd.f32 %v3294_v59, %v4603_v50  ;;  %v4686_v8 = vmul.f32 %v1895_v27, %v1703_v58  ;;  %v1038_v51 = vpop.permute.xlu1 %1037 }
 0x211   : > { %v1775_v30 = vmul.f32 0.70710677, %v4664_v62  ;;  %3136 = vmatpush3.bf16.msra.mxu1 %v5282_v2  ;;  %v4681_v44 = vmul.f32 %v1898_v45, %v1706_v53  ;;  %v4684_v13 = vadd.f32 %v1579_v0, %v4561_v4  ;;  %v1043_v9 = vpop.permute.xlu0 %1042  ;;  %v1708_v41 = vmul.f32 0.5, %v4648_v3 }
 0x212   : > { %3567 = verf.f32 %v1777_v56  ;;  %3137 = vmatprep.subr.bf16.mxu1 %v2006_v54  ;;  %v4688_v28 = vmul.f32 %v1896_v10, %v1704_v15  ;;  %v1778_v50 = vmul.f32 0.70710677, %v4672_v12  ;;  %v3412_v56 = vld [vmem:[%s5252_s5 + $0x20] ss:$16 sps:$4 sm:$0xff]   ;;  %v3413_v10 = vld [vmem:[%s5252_s5 + $0x44] ss:$16 sps:$4 sm:$0xff]  }
 0x213   : > { %3569 = verf.f32 %v1775_v30  ;;  %v2008_v29 = vpack.c.bf16 %v4681_v44, %v4679_v7  ;;  %v1776_v49 = vmul.f32 0.70710677, %v4684_v13 }
 0x214   : > { %v3560_v52 = vpop.eup %3559  ;;  %v2007_v61 = vpack.c.bf16 %v4688_v28, %v4686_v8  ;;  %3571 = verf.f32 %v1778_v50 }
 0x215   : > { %v3562_v4 = vpop.eup %3561  ;;  %3138 = vmatpush3.bf16.msra.mxu1 %v5283_v1  ;;  %v3297_v24 = vpop.f32.mrb[44].mxu0  ;;  %v1901_v36 = vadd.f32 1.0, %v3560_v52  ;;  %3573 = verf.f32 %v1776_v49  ;;  %v1713_v49 = vmul.f32 0.5, %v4658_v5 }
 0x216   : > { %v4705_v48 = vadd.f32 %v3297_v24, %v1038_v51  ;;  %v1592_v17 = vpop.f32.mrb[45].mxu0  ;;  %v3564_v20 = vpop.eup %3563  ;;  %v1899_v60 = vadd.f32 1.0, %v3562_v4  ;;  %v1711_v24 = vmul.f32 0.5, %v4664_v62 }
 0x217   : > { %v4709_v54 = vadd.f32 %v1592_v17, %v4637_v21  ;;  %v3298_v63 = vpop.f32.mrb[46].mxu0  ;;  %v3566_v23 = vpop.eup %3565  ;;  %v1902_v6 = vadd.f32 1.0, %v3564_v20  ;;  %v4718_v21 = vmul.f32 %v1901_v36, %v1709_v37 }
 0x218   : > { %v1781_v14 = vmul.f32 0.70710677, %v4705_v48  ;;  %v1595_v55 = vpop.f32.mrb[47].mxu0  ;;  %2136 = vmatmul.mubr.bf16.vlgmr.msra.gmra.mrb[0].mxu1 %v3407_v42  ;;  %v1900_v19 = vadd.f32 1.0, %v3566_v23  ;;  %v4716_v27 = vadd.f32 %v3298_v63, %v1043_v9  ;;  %v4725_v40 = vmul.f32 %v1899_v60, %v1707_v22 }
 0x219   : > { %v1779_v26 = vmul.f32 0.70710677, %v4709_v54  ;;  %2143 = vmatprep.mubr.bf16.mxu1 %v3410_v16  ;;  %v4720_v59 = vmul.f32 %v1902_v6, %v1710_v34  ;;  %v4723_v33 = vadd.f32 %v1595_v55, %v4651_v38  ;;  %v1714_v16 = vmul.f32 0.5, %v4672_v12  ;;  %v3415_v34 = vld [vmem:[%s5252_s5 + $0x40] ss:$16 sps:$4 sm:$0xff]  }
 0x21a   : > { %3575 = verf.f32 %v1781_v14  ;;  %v4727_v31 = vmul.f32 %v1900_v19, %v1708_v41  ;;  %v1782_v3 = vmul.f32 0.70710677, %v4716_v27  ;;  %v3416_v55 = vld [vmem:[%s5252_s5 + $0x64] ss:$16 sps:$4 sm:$0xff]  }
 0x21b   : > { %3577 = verf.f32 %v1779_v26  ;;  %v2010_v53 = vpack.c.bf16 %v4720_v59, %v4718_v21  ;;  %v1780_v45 = vmul.f32 0.70710677, %v4723_v33  ;;  %v5284_v19 = vld [vmem:[#allocation9_spill] sm:$0xff] }
 0x21c   : > { %v3568_v58 = vpop.eup %3567  ;;  %v2009_v38 = vpack.c.bf16 %v4727_v31, %v4725_v40  ;;  %3579 = verf.f32 %v1782_v3 }
 0x21d   : > { %v3570_v0 = vpop.eup %3569  ;;  %v3301_v15 = vpop.f32.mrb[48].mxu0  ;;  %v1905_v30 = vadd.f32 1.0, %v3568_v58  ;;  %3581 = verf.f32 %v1780_v45  ;;  %v1717_v45 = vmul.f32 0.5, %v4705_v48 }
 0x21e   : > { %v4742_v2 = vadd.f32 %v3301_v15, %v4390_v47  ;;  %v1608_v50 = vpop.f32.mrb[49].mxu0  ;;  %v3572_v52 = vpop.eup %3571  ;;  %v1903_v42 = vadd.f32 1.0, %v3570_v0  ;;  %v1712_v47 = vmul.f32 0.5, %v4684_v13  ;;  %v5285_v0 = vld [vmem:[#allocation7_spill] sm:$0xff] }
 0x21f   : > { %v4746_v4 = vadd.f32 %v1608_v50, %v4380_v18  ;;  %v3302_v51 = vpop.f32.mrb[50].mxu0  ;;  %v3574_v1 = vpop.eup %3573  ;;  %v1906_v36 = vadd.f32 1.0, %v3572_v52  ;;  %v4756_v18 = vmul.f32 %v1905_v30, %v1713_v49  ;;  %v1715_v50 = vmul.f32 0.5, %v4709_v54  ;;  %v5287_v54 = vld [vmem:[#allocation8_spill] sm:$0xff] }
 0x220   : > { %v1785_v17 = vmul.f32 0.70710677, %v4742_v2  ;;  %v1611_v20 = vpop.f32.mrb[51].mxu0  ;;  %2144 = vmatmul.mubr.bf16.gmra.mrb[4].mxu1 %v3412_v56  ;;  %v1904_v37 = vadd.f32 1.0, %v3574_v1  ;;  %v4754_v60 = vadd.f32 %v3302_v51, %v4396_v25  ;;  %v4763_v12 = vmul.f32 %v1903_v42, %v1711_v24 }
 0x221   : > { %v1783_v5 = vmul.f32 0.70710677, %v4746_v4  ;;  %2151 = vmatprep.mubr.bf16.mxu1 %v3413_v10  ;;  %v4758_v63 = vmul.f32 %v1906_v36, %v1714_v16  ;;  %v4761_v62 = vadd.f32 %v1611_v20, %v4382_v32  ;;  %v1718_v52 = vmul.f32 0.5, %v4716_v27  ;;  %v5286_v16 = vld [vmem:[#allocation10_spill] sm:$0xff] }
 0x222   : > { %3583 = verf.f32 %v1785_v17  ;;  %v4765_v23 = vmul.f32 %v1904_v37, %v1712_v47  ;;  %v1786_v13 = vmul.f32 0.70710677, %v4754_v60  ;;  %v1716_v1 = vmul.f32 0.5, %v4723_v33 }
 0x223   : > { %3585 = verf.f32 %v1783_v5  ;;  %v2012_v25 = vpack.c.bf16 %v4758_v63, %v4756_v18  ;;  %v1784_v22 = vmul.f32 0.70710677, %v4761_v62  ;;  %v3422_v18 = vld [vmem:[%s5252_s5 + $0x2c] ss:$16 sps:$4 sm:$0xff]   ;;  %v3424_v63 = vld [vmem:[%s5252_s5 + $0x28] ss:$16 sps:$4 sm:$0xff]  }
 0x224   : > { %v3576_v9 = vpop.eup %3575  ;;  %v2011_v32 = vpack.c.bf16 %v4765_v23, %v4763_v12  ;;  %3587 = verf.f32 %v1786_v13  ;;  %v3419_v12 = vld [vmem:[%s5252_s5 + $0x8] ss:$16 sps:$4 sm:$0xff]   ;;  %v3425_v23 = vld [vmem:[%s5252_s5 + $0x4c] ss:$16 sps:$4 sm:$0xff]  }
 0x225   : > { %v3578_v6 = vpop.eup %3577  ;;  %v3305_v14 = vpop.f32.mrb[52].mxu0  ;;  %v1909_v41 = vadd.f32 1.0, %v3576_v9  ;;  %3589 = verf.f32 %v1784_v22  ;;  %v3418_v22 = vld [vmem:[%s5252_s5 + $0x60] ss:$16 sps:$4 sm:$0xff]  }
 0x226   : > { %v4780_v26 = vadd.f32 %v3305_v14, %v5284_v19  ;;  %v1624_v3 = vpop.f32.mrb[53].mxu0  ;;  %v3580_v58 = vpop.eup %3579  ;;  %v1907_v56 = vadd.f32 1.0, %v3578_v6 }
 0x227   : > { %v4784_v15 = vadd.f32 %v1624_v3, %v5285_v0  ;;  %v3306_v10 = vpop.f32.mrb[54].mxu0  ;;  %v3582_v30 = vpop.eup %3581  ;;  %v1910_v49 = vadd.f32 1.0, %v3580_v58  ;;  %v4794_v17 = vmul.f32 %v1909_v41, %v1717_v45  ;;  %v1721_v45 = vmul.f32 0.5, %v4742_v2  ;;  %v5288_v0 = vld [vmem:[#allocation11_spill] sm:$0xff] }
 0x228   : > { %v1789_v42 = vmul.f32 0.70710677, %v4780_v26  ;;  %v1627_v51 = vpop.f32.mrb[55].mxu0  ;;  %2152 = vmatmul.mubr.bf16.gmra.mrb[8].mxu1 %v3415_v34  ;;  %v1908_v24 = vadd.f32 1.0, %v3582_v30  ;;  %v4792_v36 = vadd.f32 %v3306_v10, %v5286_v16  ;;  %v4801_v47 = vmul.f32 %v1907_v56, %v1715_v50 }
 0x229   : > { %v1787_v48 = vmul.f32 0.70710677, %v4784_v15  ;;  %2159 = vmatprep.mubr.bf16.mxu1 %v3416_v55  ;;  %v4796_v20 = vmul.f32 %v1910_v49, %v1718_v52  ;;  %v4799_v27 = vadd.f32 %v1627_v51, %v5287_v54  ;;  %v3421_v55 = vld [vmem:[%s5252_s5 + $0xc] ss:$16 sps:$4 sm:$0xff]   ;;  %v1719_v52 = vmul.f32 0.5, %v4746_v4 }
 0x22a   : > { %3591 = verf.f32 %v1789_v42  ;;  %v4803_v37 = vmul.f32 %v1908_v24, %v1716_v1  ;;  %v1790_v33 = vmul.f32 0.70710677, %v4792_v36  ;;  %v1722_v49 = vmul.f32 0.5, %v4754_v60 }
 0x22b   : > { %3593 = verf.f32 %v1787_v48  ;;  %v2014_v13 = vpack.c.bf16 %v4796_v20, %v4794_v17  ;;  %v1788_v9 = vmul.f32 0.70710677, %v4799_v27  ;;  %v3430_v17 = vld [vmem:[%s5252_s5 + $0x68] ss:$16 sps:$4 sm:$0xff]   ;;  %v5290_v20 = vmov 0  }
 0x22c   : > { %v3584_v5 = vpop.eup %3583  ;;  %v2013_v6 = vpack.c.bf16 %v4803_v37, %v4801_v47  ;;  %3595 = verf.f32 %v1790_v33  ;;  %v5289_v33 = vld [vmem:[#allocation12_spill] sm:$0xff] }
 0x22d   : > { %v3586_v34 = vpop.eup %3585  ;;  %v3309_v14 = vpop.f32.mrb[56].mxu0  ;;  %v1913_v41 = vadd.f32 1.0, %v3584_v5  ;;  %3597 = verf.f32 %v1788_v9 }
 0x22e   : > { %v4818_v19 = vadd.f32 %v3309_v14, %v4566_v35  ;;  %v1640_v3 = vpop.f32.mrb[57].mxu0  ;;  %v3588_v58 = vpop.eup %3587  ;;  %v1911_v56 = vadd.f32 1.0, %v3586_v34  ;;  %v1720_v35 = vmul.f32 0.5, %v4761_v62 }
 0x22f   : > { %v4822_v10 = vadd.f32 %v1640_v3, %v5288_v0  ;;  %v3310_v30 = vpop.f32.mrb[58].mxu0  ;;  %v3590_v50 = vpop.eup %3589  ;;  %v1914_v42 = vadd.f32 1.0, %v3588_v58  ;;  %v1977_v16 = vmul.f32 %v1913_v41, %v1721_v45  ;;  %v1725_v45 = vmul.f32 0.5, %v4780_v26 }
 0x230   : > { %v1793_v51 = vmul.f32 0.70710677, %v4818_v19  ;;  %v1643_v1 = vpop.f32.mrb[59].mxu0  ;;  %2160 = vmatmul.mubr.bf16.gmra.mrb[12].mxu1 %v3418_v22  ;;  %v1912_v24 = vadd.f32 1.0, %v3590_v50  ;;  %v1652_v48 = vadd.f32 %v3310_v30, %v4583_v39  ;;  %v1975_v5 = vmul.f32 %v1911_v56, %v1719_v52 }
 0x231   : > { %v1791_v2 = vmul.f32 0.70710677, %v4822_v10  ;;  %2200 = vmatprep.mubr.bf16.mxu1 %v3421_v55  ;;  %v1978_v54 = vmul.f32 %v1914_v42, %v1722_v49  ;;  %v1644_v4 = vadd.f32 %v1643_v1, %v5289_v33  ;;  %v1723_v49 = vmul.f32 0.5, %v4784_v15 }
 0x232   : > { %3599 = verf.f32 %v1793_v51  ;;  %v1976_v60 = vmul.f32 %v1912_v24, %v1720_v35  ;;  %v1794_v9 = vmul.f32 0.70710677, %v1652_v48  ;;  %v1726_v42 = vmul.f32 0.5, %v4792_v36 }
 0x233   : > { %3601 = verf.f32 %v1791_v2  ;;  %v1792_v14 = vmul.f32 0.70710677, %v1644_v4  ;;  %v2016_v22 = vpack.c.bf16 %v1978_v54, %v1977_v16  ;;  %v1724_v35 = vmul.f32 0.5, %v4799_v27 }
 0x234   : > { %v3592_v34 = vpop.eup %3591  ;;  %3603 = verf.f32 %v1794_v9  ;;  %v2015_v58 = vpack.c.bf16 %v1976_v60, %v1975_v5  ;;  %v1727_v7 = vmul.f32 0.5, %v4822_v10  ;;  %v1728_v44 = vmul.f32 0.5, %v1644_v4 }
 0x235   : > { %v3594_v3 = vpop.eup %3593  ;;  %v3313_v62 = vpop.f32.mrb[60].mxu0  ;;  %v1917_v0 = vadd.f32 1.0, %v3592_v34  ;;  %3605 = verf.f32 %v1792_v14  ;;  %v1729_v34 = vmul.f32 0.5, %v4818_v19  ;;  %v1730_v14 = vmul.f32 0.5, %v1652_v48 }
 0x236   : > { %v1665_v39 = vadd.f32 %v3313_v62, %v4660_v11  ;;  %v1656_v55 = vpop.f32.mrb[61].mxu0  ;;  %v3596_v41 = vpop.eup %3595  ;;  %v1915_v30 = vadd.f32 1.0, %v3594_v3  ;;  %3163 = vmatprep.subr.bf16.mxu1 %v2015_v58 }
 0x237   : > { %v1657_v56 = vadd.f32 %v1656_v55, %v4618_v46  ;;  %v3314_v50 = vpop.f32.mrb[62].mxu0  ;;  %v3598_v52 = vpop.eup %3597  ;;  %v1918_v51 = vadd.f32 1.0, %v3596_v41  ;;  %3164 = vmatpush3.bf16.msra.mxu1 %v2007_v61  ;;  %v1981_v2 = vmul.f32 %v1917_v0, %v1725_v45 }
 0x238   : > { %v1797_v1 = vmul.f32 0.70710677, %v1665_v39  ;;  %v1659_v11 = vpop.f32.mrb[63].mxu0  ;;  %v1916_v26 = vadd.f32 1.0, %v3598_v52  ;;  %v1668_v46 = vadd.f32 %v3314_v50, %v4677_v57  ;;  %3165 = vmatprep.subr.bf16.mxu1 %v2016_v22  ;;  %v1979_v36 = vmul.f32 %v1915_v30, %v1723_v49 }
 0x239   : > { %v1795_v24 = vmul.f32 0.70710677, %v1657_v56  ;;  %v1982_v16 = vmul.f32 %v1918_v51, %v1726_v42  ;;  %v1660_v15 = vadd.f32 %v1659_v11, %v4625_v43  ;;  %v1733_v10 = vmul.f32 0.5, %v1665_v39 }
 0x23a   : > { %3607 = verf.f32 %v1797_v1  ;;  %v1980_v54 = vmul.f32 %v1916_v26, %v1724_v35  ;;  %v1798_v33 = vmul.f32 0.70710677, %v1668_v46  ;;  %v1734_v4 = vmul.f32 0.5, %v1668_v46 }
 0x23b   : > { %3609 = verf.f32 %v1795_v24  ;;  %v1796_v8 = vmul.f32 0.70710677, %v1660_v15  ;;  %3166 = vmatpush3.bf16.msra.mxu1 %v2008_v29  ;;  %v2018_v28 = vpack.c.bf16 %v1982_v16, %v1981_v2  ;;  %v1731_v50 = vmul.f32 0.5, %v1657_v56 }
 0x23c   : > { %v3600_v5 = vpop.eup %3599  ;;  %3611 = verf.f32 %v1798_v33  ;;  %v2017_v57 = vpack.c.bf16 %v1980_v54, %v1979_v36  ;;  %v1732_v52 = vmul.f32 0.5, %v1660_v15 }
 0x23d   : > { %v3602_v61 = vpop.eup %3601  ;;  %v1921_v27 = vadd.f32 1.0, %v3600_v5  ;;  %3613 = verf.f32 %v1796_v8 }
 0x23e   : > { %v3604_v60 = vpop.eup %3603  ;;  %v1919_v9 = vadd.f32 1.0, %v3602_v61  ;;  %3167 = vmatprep.subr.bf16.mxu1 %v2017_v57 }
 0x23f   : > { %v3606_v43 = vpop.eup %3605  ;;  %v1922_v22 = vadd.f32 1.0, %v3604_v60  ;;  %3168 = vmatpush3.bf16.msra.mxu1 %v2009_v38  ;;  %v1985_v3 = vmul.f32 %v1921_v27, %v1729_v34 }
 0x240   : > { %v1920_v29 = vadd.f32 1.0, %v3606_v43  ;;  %3169 = vmatprep.subr.bf16.mxu1 %v2018_v28  ;;  %v1983_v58 = vmul.f32 %v1919_v9, %v1727_v7 }
 0x241   : > { %v1986_v62 = vmul.f32 %v1922_v22, %v1730_v14 }
 0x242   : > { %v1984_v0 = vmul.f32 %v1920_v29, %v1728_v44  ;;  %v3663_v29 = vld [vmem:[%s3863_s24] sm:$0xff] }
 0x243   : > { %3170 = vmatpush3.bf16.msra.mxu1 %v2010_v53  ;;  %v2020_v19 = vpack.c.bf16 %v1986_v62, %v1985_v3 }
 0x244   : > { %v3608_v55 = vpop.eup %3607  ;;  %v2019_v41 = vpack.c.bf16 %v1984_v0, %v1983_v58  ;;  %v2244_v58 = vpop.permute.xlu1 %2243 }
 0x245   : > { %v3610_v48 = vpop.eup %3609  ;;  %v1925_v45 = vadd.f32 1.0, %v3608_v55  ;;  %v3664_v55 = vld [vmem:[%s3863_s24 + $0x8] sm:$0xff] }
 0x246   : > { %v3612_v40 = vpop.eup %3611  ;;  %v1923_v31 = vadd.f32 1.0, %v3610_v48  ;;  %3171 = vmatprep.subr.bf16.mxu1 %v2019_v41  ;;  %v2249_v41 = vpop.permute.xlu0 %2248 }
 0x247   : > { %v3614_v38 = vpop.eup %3613  ;;  %v1926_v30 = vadd.f32 1.0, %v3612_v40  ;;  %3172 = vmatpush3.bf16.msra.mxu1 %v2011_v32  ;;  %v1989_v21 = vmul.f32 %v1925_v45, %v1733_v10  ;;  %v3428_v32 = vld [vmem:[%s5252_s5 + $0x6c] ss:$16 sps:$4 sm:$0xff]  }
 0x248   : > { %v1924_v49 = vadd.f32 1.0, %v3614_v38  ;;  %3173 = vmatprep.subr.bf16.mxu1 %v2020_v19  ;;  %v1987_v53 = vmul.f32 %v1923_v31, %v1731_v50 }
 0x249   : > { %v1990_v59 = vmul.f32 %v1926_v30, %v1734_v4 }
 0x24a   : > { %v1988_v42 = vmul.f32 %v1924_v49, %v1732_v52  ;;  %v3665_v52 = vld [vmem:[%s3863_s24 + $0x10] sm:$0xff] }
 0x24b   : > { %3174 = vmatpush3.bf16.msra.mxu1 %v2012_v25  ;;  %v2022_v51 = vpack.c.bf16 %v1990_v59, %v1989_v21  ;;  %v3427_v25 = vld [vmem:[%s5252_s5 + $0x48] ss:$16 sps:$4 sm:$0xff]  }
 0x24c   : > { %v2021_v39 = vpack.c.bf16 %v1988_v42, %v1987_v53  ;;  %v2259_v53 = vpop.permute.xlu0 %2258  ;;  %v3666_v42 = vld [vmem:[%s3863_s24 + $0x18] sm:$0xff] }
 0x24e   : > { %3175 = vmatprep.subr.bf16.mxu1 %v2021_v39 }
 0x24f   : > { %3176 = vmatpush3.bf16.msra.mxu1 %v2013_v6 }
 0x250   : > { %3177 = vmatprep.subr.bf16.mxu1 %v2022_v51 }
 0x253   : > { %3178 = vmatpush3.bf16.msra.mxu1 %v2014_v13 }
 0x256   : > { %2201 = vmatmul.mubr.bf16.vlgmr.msra.gmra.mrb[16].mxu1 %v3419_v12  ;;  %v2254_v12 = vpop.permute.xlu1 %2253 }
 0x257   : > { %2208 = vmatprep.mubr.bf16.mxu1 %v3422_v18 }
 0x25e   : > { %2209 = vmatmul.mubr.bf16.gmra.mrb[20].mxu1 %v3424_v63 }
 0x25f   : > { %2216 = vmatprep.mubr.bf16.mxu1 %v3425_v23 }
 0x266   : > { %2217 = vmatmul.mubr.bf16.gmra.mrb[24].mxu1 %v3427_v25 }
 0x267   : > { %2224 = vmatprep.mubr.bf16.mxu1 %v3428_v32 }
 0x26e   : > { %2225 = vmatmul.mubr.bf16.gmra.mrb[28].mxu1 %v3430_v17 }
 0x26f   : > { %2556 = vmatprep.mubr.bf16.mxu1 %v5290_v20 }
 0x2eb   : > { %v3139_v47 = vpop.f32.mrb[0].mxu1 }
 0x2ec   : > { %v3140_v37 = vpop.f32.mrb[1].mxu1 }
 0x2ed   : > { %v3141_v13 = vadd.f32 %v3140_v37, %v3139_v47  ;;  %v3142_v6 = vpop.f32.mrb[2].mxu1 }
 0x2ee   : > { %v3143_v56 = vpop.f32.mrb[3].mxu1 }
 0x2ef   : > { %v3144_v1 = vadd.f32 %v3143_v56, %v3142_v6 }
 0x2f3   : > { %v3145_v11 = vpop.f32.mrb[4].mxu1 }
 0x2f4   : > { %v3146_v35 = vpop.f32.mrb[5].mxu1 }
 0x2f5   : > { %v3147_v26 = vadd.f32 %v3146_v35, %v3145_v11  ;;  %v3148_v24 = vpop.f32.mrb[6].mxu1  ;;  %v2269_v35 = vpop.permute.xlu0 %2268 }
 0x2f6   : > { %v3149_v46 = vpop.f32.mrb[7].mxu1 }
 0x2f7   : > { %v3150_v2 = vadd.f32 %v3149_v46, %v3148_v24 }
 0x2fb   : > { %v3151_v16 = vpop.f32.mrb[8].mxu1 }
 0x2fc   : > { %v3152_v15 = vpop.f32.mrb[9].mxu1 }
 0x2fd   : > { %v3153_v36 = vadd.f32 %v3152_v15, %v3151_v16  ;;  %v3154_v54 = vpop.f32.mrb[10].mxu1  ;;  %v3433_v15 = vld [vmem:[%s5256_s9 + $0x4] ss:$8 sps:$4 sm:$0xff]  }
 0x2fe   : > { %v3155_v33 = vpop.f32.mrb[11].mxu1  ;;  %2524 = vmatprep.subr.bf16.mxu1 %v3433_v15 }
 0x2ff   : > { %v3156_v5 = vadd.f32 %v3155_v33, %v3154_v54 }
 0x303   : > { %v3157_v8 = vpop.f32.mrb[12].mxu1 }
 0x304   : > { %v3158_v28 = vpop.f32.mrb[13].mxu1 }
 0x305   : > { %v4887_v61 = vadd.f32 %v3158_v28, %v3157_v8  ;;  %v3160_v57 = vpop.f32.mrb[14].mxu1  ;;  %v3431_v8 = vld [vmem:[%s5256_s9] ss:$8 sps:$4 sm:$0xff]  }
 0x306   : > { %v3161_v27 = vpop.f32.mrb[15].mxu1  ;;  %2525 = vmatpush1.bf16.msra.mxu1 %v3431_v8 }
 0x307   : > { %v4889_v60 = vadd.f32 %v3161_v27, %v3160_v57 }
 0x329   : > { %v3179_v9 = vpop.f32.mrb[16].mxu1 }
 0x32a   : > { %v3180_v43 = vpop.f32.mrb[17].mxu1 }
 0x32b   : > { %v3181_v34 = vadd.f32 %v3180_v43, %v3179_v9  ;;  %v3182_v14 = vpop.f32.mrb[18].mxu1  ;;  %v3436_v9 = vld [vmem:[%s5256_s9 + $0x14] ss:$8 sps:$4 sm:$0xff]  }
 0x32c   : > { %v3183_v22 = vpop.f32.mrb[19].mxu1  ;;  %v3669_v43 = vld [vmem:[%s3863_s24 + $0x30] sm:$0xff]  ;;  %2526 = vmatprep.subr.bf16.mxu1 %v3436_v9 }
 0x32d   : > { %v2203_v7 = vadd.f32 %v3181_v34, %v3141_v13  ;;  %v3184_v44 = vadd.f32 %v3183_v22, %v3182_v14  ;;  %v3667_v13 = vld [vmem:[%s3863_s24 + $0x20] sm:$0xff] }
 0x32f   : > { %v2233_v3 = vadd.f32 %v3663_v29, %v2203_v7  ;;  %v2206_v62 = vadd.f32 %v3184_v44, %v3144_v1  ;;  %v3434_v7 = vld [vmem:[%s5256_s9 + $0x10] ss:$8 sps:$4 sm:$0xff]  }
 0x330   : > { %v3670_v44 = vld [vmem:[%s3863_s24 + $0x38] sm:$0xff]  ;;  %2527 = vmatpush1.bf16.msra.mxu1 %v3434_v7 }
 0x331   : > { %v4892_v0 = vadd.f32 %v2244_v58, %v2233_v3  ;;  %v2234_v19 = vadd.f32 %v3664_v55, %v2206_v62  ;;  %v3185_v48 = vpop.f32.mrb[20].mxu1  ;;  %v2279_v62 = vpop.permute.xlu0 %2278 }
 0x332   : > { %v3186_v45 = vpop.f32.mrb[21].mxu1 }
 0x333   : > { %v4895_v40 = vadd.f32 %v2249_v41, %v2234_v19  ;;  %v3187_v31 = vadd.f32 %v3186_v45, %v3185_v48  ;;  %v3188_v38 = vpop.f32.mrb[22].mxu1  ;;  %2289 = vadd.xlane.f32.xlu1 %v4892_v0  ;;  %v2313_v59 = vmul.f32 %v4892_v0, %v4892_v0  ;;  %v3437_v19 = vld [vmem:[%s5256_s9 + $0x20] ss:$8 sps:$4 sm:$0xff]   ;;  %v3442_v48 = vld [vmem:[%s5256_s9 + $0x34] ss:$8 sps:$4 sm:$0xff]  }
 0x334   : > { %v3189_v10 = vpop.f32.mrb[23].mxu1 }
 0x335   : > { %v2211_v4 = vadd.f32 %v3187_v31, %v3147_v26  ;;  %v3190_v30 = vadd.f32 %v3189_v10, %v3188_v38  ;;  %2291 = vadd.xlane.f32.xlu0 %v4895_v40  ;;  %v2314_v50 = vmul.f32 %v4895_v40, %v4895_v40  ;;  %v3668_v26 = vld [vmem:[%s3863_s24 + $0x28] sm:$0xff]  ;;  %v3440_v31 = vld [vmem:[%s5256_s9 + $0x30] ss:$8 sps:$4 sm:$0xff]  }
 0x336   : > { %v3445_v38 = vld [vmem:[%s5256_s9 + $0x44] ss:$8 sps:$4 sm:$0xff]   ;;  %v3443_v10 = vld [vmem:[%s5256_s9 + $0x40] ss:$8 sps:$4 sm:$0xff]  }
 0x337   : > { %v2235_v49 = vadd.f32 %v3665_v52, %v2211_v4  ;;  %v2214_v21 = vadd.f32 %v3190_v30, %v3150_v2  ;;  %2323 = vadd.xlane.f32.xlu1 %v2314_v50  ;;  %v2264_v2 = vpop.permute.xlu1 %2263  ;;  %v3448_v4 = vld [vmem:[%s5256_s9 + $0x54] ss:$8 sps:$4 sm:$0xff]   ;;  %v3446_v30 = vld [vmem:[%s5256_s9 + $0x50] ss:$8 sps:$4 sm:$0xff]   ;;  %v3451_v50 = vld [vmem:[%s5256_s9 + $0x64] ss:$8 sps:$4 sm:$0xff]  }
 0x338   : > { %v3449_v52 = vld [vmem:[%s5256_s9 + $0x60] ss:$8 sps:$4 sm:$0xff]  }
 0x339   : > { %v2236_v51 = vadd.f32 %v3666_v42, %v2214_v21  ;;  %v3191_v39 = vpop.f32.mrb[24].mxu1  ;;  %2321 = vadd.xlane.f32.xlu0 %v2313_v59  ;;  %v4905_v63 = vadd.f32 %v2254_v12, %v2235_v49  ;;  %v3454_v49 = vld [vmem:[%s5256_s9 + $0x74] ss:$8 sps:$4 sm:$0xff]   ;;  %v3452_v21 = vld [vmem:[%s5256_s9 + $0x70] ss:$8 sps:$4 sm:$0xff]   ;;  %v3455_v59 = vld [vmem:[%s5258_s11 + $0x40] sm:$0xff]  }
 0x33a   : > { %v3192_v18 = vpop.f32.mrb[25].mxu1  ;;  %v5000_v42 = vld [vmem:[%s5258_s11 + $0x48] sm:$0xff]   ;;  %3203 = vmatprep.subr.bf16.mxu0 %v3455_v59  ;;  %v5018_v12 = vld [vmem:[%s5258_s11 + $0x10] sm:$0xff]  }
 0x33b   : > { %v4907_v23 = vadd.f32 %v2259_v53, %v2236_v51  ;;  %v3193_v25 = vadd.f32 %v3192_v18, %v3191_v39  ;;  %v3194_v32 = vpop.f32.mrb[26].mxu1  ;;  %v2315_v11 = vmul.f32 %v4905_v63, %v4905_v63  ;;  %v2274_v3 = vpop.permute.xlu1 %2273  ;;  %v4995_v53 = vld [vmem:[%s5258_s11] sm:$0xff]   ;;  %v5006_v51 = vld [vmem:[%s5258_s11 + $0x8] sm:$0xff]   ;;  %v5012_v39 = vld [vmem:[%s5258_s11 + $0x50] sm:$0xff]  }
 0x33c   : > { %v3195_v17 = vpop.f32.mrb[27].mxu1  ;;  %3204 = vmatpush3.bf16.msra.mxu0 %v4995_v53  ;;  %v5024_v18 = vld [vmem:[%s5258_s11 + $0x58] sm:$0xff]  }
 0x33d   : > { %v2219_v47 = vadd.f32 %v3193_v25, %v3153_v36  ;;  %v3196_v37 = vadd.f32 %v3195_v17, %v3194_v32  ;;  %2295 = vadd.xlane.f32.xlu1 %v4907_v23  ;;  %2293 = vadd.xlane.f32.xlu0 %v4905_v63  ;;  %v2316_v1 = vmul.f32 %v4907_v23, %v4907_v23  ;;  %v5030_v25 = vld [vmem:[%s5258_s11 + $0x18] sm:$0xff]   ;;  %v5036_v32 = vld [vmem:[%s5258_s11 + $0x60] sm:$0xff]  }
 0x33e   : > { %3205 = vmatprep.subr.bf16.mxu0 %v5000_v42  ;;  %v5042_v17 = vld [vmem:[%s5258_s11 + $0x20] sm:$0xff]  }
 0x33f   : > { %v2237_v6 = vadd.f32 %v3667_v13, %v2219_v47  ;;  %v2222_v56 = vadd.f32 %v3196_v37, %v3156_v5 }
 0x340   : > { %3206 = vmatpush3.bf16.msra.mxu0 %v5006_v51 }
 0x341   : > { %v2238_v24 = vadd.f32 %v3668_v26, %v2222_v56  ;;  %v3197_v46 = vpop.f32.mrb[28].mxu1  ;;  %2327 = vadd.xlane.f32.xlu1 %v2316_v1  ;;  %2325 = vadd.xlane.f32.xlu0 %v2315_v11  ;;  %v4920_v36 = vadd.f32 %v2264_v2, %v2237_v6 }
 0x342   : > { %v3198_v16 = vpop.f32.mrb[29].mxu1  ;;  %3207 = vmatprep.subr.bf16.mxu0 %v5012_v39 }
 0x343   : > { %v4922_v54 = vadd.f32 %v2269_v35, %v2238_v24  ;;  %v3199_v33 = vadd.f32 %v3198_v16, %v3197_v46  ;;  %v3200_v5 = vpop.f32.mrb[30].mxu1 }
 0x344   : > { %v3201_v28 = vpop.f32.mrb[31].mxu1  ;;  %3208 = vmatpush3.bf16.msra.mxu0 %v5018_v12 }
 0x345   : > { %v2227_v57 = vadd.f32 %v3199_v33, %v4887_v61  ;;  %v3202_v27 = vadd.f32 %v3201_v28, %v3200_v5  ;;  %2299 = vadd.xlane.f32.xlu1 %v4922_v54  ;;  %2297 = vadd.xlane.f32.xlu0 %v4920_v36  ;;  %v2318_v22 = vmul.f32 %v4922_v54, %v4922_v54 }
 0x346   : > { %v2317_v61 = vmul.f32 %v4920_v36, %v4920_v36  ;;  %3209 = vmatprep.subr.bf16.mxu0 %v5024_v18 }
 0x347   : > { %v2239_v34 = vadd.f32 %v3669_v43, %v2227_v57  ;;  %v2230_v14 = vadd.f32 %v3202_v27, %v4889_v60  ;;  %v3439_v60 = vld [vmem:[%s5256_s9 + $0x24] ss:$8 sps:$4 sm:$0xff]  }
 0x348   : > { %2528 = vmatprep.subr.bf16.mxu1 %v3439_v60  ;;  %3210 = vmatpush3.bf16.msra.mxu0 %v5030_v25 }
 0x349   : > { %v2240_v29 = vadd.f32 %v3670_v44, %v2230_v14  ;;  %2331 = vadd.xlane.f32.xlu1 %v2318_v22  ;;  %2329 = vadd.xlane.f32.xlu0 %v2317_v61  ;;  %v4946_v58 = vadd.f32 %v2274_v3, %v2239_v34 }
 0x34a   : > { %2529 = vmatpush1.bf16.msra.mxu1 %v3437_v19  ;;  %3211 = vmatprep.subr.bf16.mxu0 %v5036_v32 }
 0x34b   : > { %v4948_v55 = vadd.f32 %v2279_v62, %v2240_v29  ;;  %v2319_v45 = vmul.f32 %v4946_v58, %v4946_v58  ;;  %2530 = vmatprep.subr.bf16.mxu1 %v3442_v48 }
 0x34c   : > { %3212 = vmatpush3.bf16.msra.mxu0 %v5042_v17 }
 0x34d   : > { %2303 = vadd.xlane.f32.xlu1 %v4948_v55  ;;  %2301 = vadd.xlane.f32.xlu0 %v4946_v58  ;;  %v2320_v41 = vmul.f32 %v4948_v55, %v4948_v55 }
 0x34e   : > { %2531 = vmatpush1.bf16.msra.mxu1 %v3440_v31 }
 0x34f   : > { %2532 = vmatprep.subr.bf16.mxu1 %v3445_v38 }
 0x351   : > { %2335 = vadd.xlane.f32.xlu1 %v2320_v41  ;;  %2333 = vadd.xlane.f32.xlu0 %v2319_v45 }
 0x352   : > { %2533 = vmatpush1.bf16.msra.mxu1 %v3443_v10 }
 0x353   : > { %2534 = vmatprep.subr.bf16.mxu1 %v3448_v4 }
 0x356   : > { %2535 = vmatpush1.bf16.msra.mxu1 %v3446_v30 }
 0x357   : > { %2536 = vmatprep.subr.bf16.mxu1 %v3451_v50 }
 0x35a   : > { %2537 = vmatpush1.bf16.msra.mxu1 %v3449_v52 }
 0x35b   : > { %2538 = vmatprep.subr.bf16.mxu1 %v3454_v49 }
 0x35e   : > { %2539 = vmatpush1.bf16.msra.mxu1 %v3452_v21  ;;  %v5066_v21 = vld [vmem:[%s5254_s7] ss:$0 sm:$0xff] }
 0x35f   : > { %3315 = vmatprep.subr.bf16.mxu1 %v3455_v59 }
 0x3c0   : > { %v2290_v47 = vpop.xlane.xlu1 %2289 }
 0x3c1   : > { %v2305_v13 = vmul.f32 0.0078125, %v2290_v47 }
 0x3c2   : > { %v2292_v37 = vpop.xlane.xlu0 %2291 }
 0x3c3   : > { %v2306_v6 = vmul.f32 0.0078125, %v2292_v37  ;;  %v2345_v26 = vmul.f32 %v2305_v13, %v2305_v13  ;;  %v2369_v59 = vsub.f32 %v4892_v0, %v2305_v13  ;;  %v5077_v13 = vld [vmem:[%s5255_s8] ss:$0 sm:$0xff] }
 0x3c4   : > { %v2324_v56 = vpop.xlane.xlu1 %2323 }
 0x3c5   : > { %v2346_v1 = vmul.f32 %v2306_v6, %v2306_v6  ;;  %v2338_v11 = vmul.f32 0.0078125, %v2324_v56  ;;  %v2370_v31 = vsub.f32 %v4895_v40, %v2306_v6 }
 0x3c6   : > { %v2322_v35 = vpop.xlane.xlu0 %2321 }
 0x3c7   : > { %v2354_v24 = vsub.f32 %v2338_v11, %v2346_v1  ;;  %v2337_v46 = vmul.f32 0.0078125, %v2322_v35 }
 0x3c9   : > { %v2362_v2 = vmax.f32 %v2354_v24, 0.0  ;;  %v2353_v16 = vsub.f32 %v2337_v46, %v2345_v26 }
 0x3ca   : > { %v2294_v15 = vpop.xlane.xlu0 %2293  ;;  %v2296_v33 = vpop.xlane.xlu1 %2295 }
 0x3cb   : > { %v2378_v5 = vadd.f32 1e-05, %v2362_v2  ;;  %v2361_v8 = vmax.f32 %v2353_v16, 0.0  ;;  %v5046_v28 = vmul.f32 0.0078125, %v2294_v15  ;;  %v5048_v57 = vmul.f32 0.0078125, %v2296_v33 }
 0x3cd   : > { %3615 = vrsqrt.f32 %v2378_v5  ;;  %v2377_v27 = vadd.f32 1e-05, %v2361_v8  ;;  %v2347_v9 = vmul.f32 %v5046_v28, %v5046_v28  ;;  %v2348_v14 = vmul.f32 %v5048_v57, %v5048_v57 }
 0x3ce   : > { %v2326_v43 = vpop.xlane.xlu0 %2325  ;;  %v2328_v34 = vpop.xlane.xlu1 %2327 }
 0x3cf   : > { %3617 = vrsqrt.f32 %v2377_v27  ;;  %v2339_v22 = vmul.f32 0.0078125, %v2326_v43  ;;  %v2340_v61 = vmul.f32 0.0078125, %v2328_v34 }
 0x3d1   : > { %v2355_v7 = vsub.f32 %v2339_v22, %v2347_v9  ;;  %v2356_v44 = vsub.f32 %v2340_v61, %v2348_v14 }
 0x3d2   : > { %v2298_v29 = vpop.xlane.xlu0 %2297  ;;  %v2300_v3 = vpop.xlane.xlu1 %2299 }
 0x3d3   : > { %v2363_v62 = vmax.f32 %v2355_v7, 0.0  ;;  %v2364_v60 = vmax.f32 %v2356_v44, 0.0  ;;  %v5054_v19 = vmul.f32 0.0078125, %v2298_v29  ;;  %v5056_v48 = vmul.f32 0.0078125, %v2300_v3 }
 0x3d4   : > { %v2371_v7 = vsub.f32 %v4905_v63, %v5046_v28  ;;  %v2372_v3 = vsub.f32 %v4907_v23, %v5048_v57 }
 0x3d5   : > { %v2379_v41 = vadd.f32 1e-05, %v2363_v62  ;;  %v2380_v45 = vadd.f32 1e-05, %v2364_v60  ;;  %v2349_v38 = vmul.f32 %v5054_v19, %v5054_v19  ;;  %v2350_v50 = vmul.f32 %v5056_v48, %v5056_v48 }
 0x3d6   : > { %v2330_v10 = vpop.xlane.xlu0 %2329  ;;  %v2332_v4 = vpop.xlane.xlu1 %2331 }
 0x3d7   : > { %v3616_v30 = vpop.eup %3615  ;;  %3619 = vrsqrt.f32 %v2379_v41  ;;  %v2341_v52 = vmul.f32 0.0078125, %v2330_v10  ;;  %v2342_v49 = vmul.f32 0.0078125, %v2332_v4 }
 0x3d8   : > { %v2394_v47 = vmul.f32 %v3616_v30, %v2370_v31  ;;  %3621 = vrsqrt.f32 %v2380_v45 }
 0x3d9   : > { %v3618_v37 = vpop.eup %3617  ;;  %v2357_v6 = vsub.f32 %v2341_v52, %v2349_v38  ;;  %v2358_v56 = vsub.f32 %v2342_v49, %v2350_v50  ;;  %v2373_v49 = vsub.f32 %v4920_v36, %v5054_v19 }
 0x3da   : > { %v2393_v1 = vmul.f32 %v3618_v37, %v2369_v59  ;;  %v2302_v11 = vpop.xlane.xlu0 %2301  ;;  %v2304_v35 = vpop.xlane.xlu1 %2303  ;;  %v2408_v26 = vmul.f32 %v5066_v21, %v2394_v47 }
 0x3db   : > { %v2365_v24 = vmax.f32 %v2357_v6, 0.0  ;;  %v2366_v46 = vmax.f32 %v2358_v56, 0.0  ;;  %v5070_v2 = vmul.f32 0.0078125, %v2302_v11  ;;  %v5072_v16 = vmul.f32 0.0078125, %v2304_v35 }
 0x3dc   : > { %v2407_v15 = vmul.f32 %v5066_v21, %v2393_v1  ;;  %v2422_v34 = vadd.f32 %v5077_v13, %v2408_v26 }
 0x3dd   : > { %v2381_v33 = vadd.f32 1e-05, %v2365_v24  ;;  %v2382_v5 = vadd.f32 1e-05, %v2366_v46  ;;  %v2351_v8 = vmul.f32 %v5070_v2, %v5070_v2  ;;  %v2352_v14 = vmul.f32 %v5072_v16, %v5072_v16 }
 0x3de   : > { %v2334_v27 = vpop.xlane.xlu0 %2333  ;;  %v2336_v9 = vpop.xlane.xlu1 %2335  ;;  %v2421_v43 = vadd.f32 %v5077_v13, %v2407_v15  ;;  %v2376_v11 = vsub.f32 %v4948_v55, %v5072_v16  ;;  %v3470_v15 = vld [vmem:[%s5258_s11 + $0x38] sm:$0xff]  }
 0x3df   : > { %3623 = vrsqrt.f32 %v2381_v33  ;;  %v2343_v22 = vmul.f32 0.0078125, %v2334_v27  ;;  %v2344_v61 = vmul.f32 0.0078125, %v2336_v9  ;;  %v2434_v33 = vlaneseq  ;;  %v618_v27 = vld [vmem:[%s5257_s10] sm:$0x3] }
 0x3e0   : > { %3625 = vrsqrt.f32 %v2382_v5  ;;  %v2429_v44 = vpack.c.bf16 %v2422_v34, %v2421_v43 }
 0x3e1   : > { %v3620_v29 = vpop.eup %3619  ;;  %v2359_v62 = vsub.f32 %v2343_v22, %v2351_v8  ;;  %v2360_v60 = vsub.f32 %v2344_v61, %v2352_v14  ;;  %v2435_v5 = vshrl.u32 %v2434_v33, 7 }
 0x3e2   : > { %v3622_v41 = vpop.eup %3621  ;;  %2557 = vmatmul.mubr.bf16.vlgmr.msra.gmra.mrb[32].mxu1 %v2429_v44  ;;  %v2395_v45 = vmul.f32 %v3620_v29, %v2371_v7 }
 0x3e3   : > { %v2367_v31 = vmax.f32 %v2359_v62, 0.0  ;;  %v2368_v38 = vmax.f32 %v2360_v60, 0.0  ;;  %2566 = vmatprep.mubr.bf16.mxu1 %v5290_v20  ;;  %v2396_v10 = vmul.f32 %v3622_v41, %v2372_v3  ;;  %3323 = vmatpush3.bf16.msra.mxu1 %v4995_v53  ;;  %v2436_v8 = vsub.s32 0, %v2435_v5 }
 0x3e4   : > { %v2409_v28 = vmul.f32 %v5066_v21, %v2395_v45  ;;  %3316 = vmatprep.subr.bf16.mxu1 %v5000_v42  ;;  %v2374_v42 = vsub.f32 %v4922_v54, %v5056_v48  ;;  %v2375_v48 = vsub.f32 %v4946_v58, %v5070_v2  ;;  %v2440_v9 = vsub.s32 1, %v2435_v5 }
 0x3e5   : > { %v2383_v4 = vadd.f32 1e-05, %v2367_v31  ;;  %v2384_v30 = vadd.f32 1e-05, %v2368_v38  ;;  %v2410_v57 = vmul.f32 %v5066_v21, %v2396_v10  ;;  %v5143_v43 = vrot.slane %v618_v27, %v2436_v8 }
 0x3e6   : > { %v2423_v50 = vadd.f32 %v5077_v13, %v2409_v28  ;;  %v5145_v34 = vrot.slane %v618_v27, %v2440_v9 }
 0x3e7   : > { %3627 = vrsqrt.f32 %v2383_v4  ;;  %v2424_v52 = vadd.f32 %v5077_v13, %v2410_v57  ;;  %3324 = vmatpush3.bf16.msra.mxu1 %v5006_v51 }
 0x3e8   : > { %3629 = vrsqrt.f32 %v2384_v30  ;;  %3317 = vmatprep.subr.bf16.mxu1 %v5012_v39 }
 0x3e9   : > { %v3624_v53 = vpop.eup %3623  ;;  %v2430_v59 = vpack.c.bf16 %v2424_v52, %v2423_v50 }
 0x3ea   : > { %v3626_v47 = vpop.eup %3625  ;;  %v2397_v37 = vmul.f32 %v3624_v53, %v2373_v49 }
 0x3eb   : > { %2567 = vmatmul.mubr.bf16.gmra.mrb[36].mxu1 %v2430_v59  ;;  %v2398_v6 = vmul.f32 %v3626_v47, %v2374_v42 }
 0x3ec   : > { %2576 = vmatprep.mubr.bf16.mxu1 %v5290_v20  ;;  %v2411_v56 = vmul.f32 %v5066_v21, %v2397_v37  ;;  %3325 = vmatpush3.bf16.msra.mxu1 %v5018_v12 }
 0x3ed   : > { %v2412_v51 = vmul.f32 %v5066_v21, %v2398_v6  ;;  %3318 = vmatprep.subr.bf16.mxu1 %v5024_v18 }
 0x3ee   : > { %v2425_v39 = vadd.f32 %v5077_v13, %v2411_v56 }
 0x3ef   : > { %v2426_v19 = vadd.f32 %v5077_v13, %v2412_v51 }
 0x3f0   : > { %3326 = vmatpush3.bf16.msra.mxu1 %v5030_v25 }
 0x3f1   : > { %v3628_v1 = vpop.eup %3627  ;;  %v2431_v35 = vpack.c.bf16 %v2426_v19, %v2425_v39  ;;  %3319 = vmatprep.subr.bf16.mxu1 %v5036_v32  ;;  %v3465_v32 = vld [vmem:[%s5258_s11 + $0x68] sm:$0xff]  }
 0x3f2   : > { %v3630_v12 = vpop.eup %3629  ;;  %v2399_v26 = vmul.f32 %v3628_v1, %v2375_v48  ;;  %3213 = vmatprep.subr.bf16.mxu0 %v3465_v32 }
 0x3f3   : > { %2577 = vmatmul.mubr.bf16.gmra.mrb[40].mxu1 %v2431_v35  ;;  %v2400_v18 = vmul.f32 %v3630_v12, %v2376_v11 }
 0x3f4   : > { %2586 = vmatprep.mubr.bf16.mxu1 %v5290_v20  ;;  %v2413_v24 = vmul.f32 %v5066_v21, %v2399_v26  ;;  %3327 = vmatpush3.bf16.msra.mxu1 %v5042_v17  ;;  %v3466_v20 = vld [vmem:[%s5258_s11 + $0x28] sm:$0xff]   ;;  %v3467_v17 = vld [vmem:[%s5258_s11 + $0x70] sm:$0xff]  }
 0x3f5   : > { %v2414_v46 = vmul.f32 %v5066_v21, %v2400_v18  ;;  %3320 = vmatprep.subr.bf16.mxu1 %v3465_v32  ;;  %3214 = vmatpush3.bf16.msra.mxu0 %v3466_v20  ;;  %v3468_v21 = vld [vmem:[%s5258_s11 + $0x30] sm:$0xff]  }
 0x3f6   : > { %v2427_v25 = vadd.f32 %v5077_v13, %v2413_v24  ;;  %3215 = vmatprep.subr.bf16.mxu0 %v3467_v17 }
 0x3f7   : > { %v2428_v2 = vadd.f32 %v5077_v13, %v2414_v46  ;;  %v3469_v13 = vld [vmem:[%s5258_s11 + $0x78] sm:$0xff]  }
 0x3f8   : > { %3328 = vmatpush3.bf16.msra.mxu1 %v3466_v20 }
 0x3f9   : > { %v2432_v16 = vpack.c.bf16 %v2428_v2, %v2427_v25  ;;  %3321 = vmatprep.subr.bf16.mxu1 %v3467_v17  ;;  %3216 = vmatpush3.bf16.msra.mxu0 %v3468_v21 }
 0x3fa   : > { %3217 = vmatprep.subr.bf16.mxu0 %v3469_v13 }
 0x3fb   : > { %2587 = vmatmul.mubr.bf16.gmra.mrb[44].mxu1 %v2432_v16 }
 0x3fc   : > { %3329 = vmatpush3.bf16.msra.mxu1 %v3468_v21 }
 0x3fd   : > { %3322 = vmatprep.subr.bf16.mxu1 %v3469_v13  ;;  %3218 = vmatpush3.bf16.msra.mxu0 %v3470_v15 }
 0x400   : > { %3330 = vmatpush3.bf16.msra.mxu1 %v3470_v15 }
 0x4b5   : > { %v2558_v14 = vpop.f32.mrb[32].mxu1 }
 0x4b6   : > { %v2559_v22 = vadd.f32 %v2558_v14, %v5143_v43  ;;  %v2560_v61 = vpop.f32.mrb[33].mxu1 }
 0x4b7   : > { %v2561_v7 = vadd.f32 %v2560_v61, %v5145_v34  ;;  %v2562_v44 = vpop.f32.mrb[34].mxu1 }
 0x4b8   : > { %v2613_v29 = vmul.f32 0.70710677, %v2559_v22  ;;  %v2563_v3 = vadd.f32 %v2562_v44, %v5143_v43  ;;  %v2564_v62 = vpop.f32.mrb[35].mxu1  ;;  %v2597_v48 = vmul.f32 0.5, %v2559_v22 }
 0x4b9   : > { %v2614_v60 = vmul.f32 0.70710677, %v2561_v7  ;;  %v2565_v41 = vadd.f32 %v2564_v62, %v5145_v34  ;;  %v2598_v26 = vmul.f32 0.5, %v2561_v7 }
 0x4ba   : > { %3631 = verf.f32 %v2613_v29  ;;  %v2615_v45 = vmul.f32 0.70710677, %v2563_v3  ;;  %v2599_v1 = vmul.f32 0.5, %v2563_v3 }
 0x4bb   : > { %3633 = verf.f32 %v2614_v60  ;;  %v2616_v31 = vmul.f32 0.70710677, %v2565_v41  ;;  %v2600_v18 = vmul.f32 0.5, %v2565_v41 }
 0x4bc   : > { %3635 = verf.f32 %v2615_v45 }
 0x4bd   : > { %3637 = verf.f32 %v2616_v31 }
 0x4be   : > { %v2568_v38 = vpop.f32.mrb[36].mxu1 }
 0x4bf   : > { %v2569_v10 = vadd.f32 %v2568_v38, %v5143_v43  ;;  %v2570_v28 = vpop.f32.mrb[37].mxu1 }
 0x4c0   : > { %v2571_v4 = vadd.f32 %v2570_v28, %v5145_v34  ;;  %v2572_v30 = vpop.f32.mrb[38].mxu1 }
 0x4c1   : > { %v2617_v57 = vmul.f32 0.70710677, %v2569_v10  ;;  %v2573_v50 = vadd.f32 %v2572_v30, %v5143_v43  ;;  %v2574_v52 = vpop.f32.mrb[39].mxu1  ;;  %v2601_v41 = vmul.f32 0.5, %v2569_v10 }
 0x4c2   : > { %v2618_v49 = vmul.f32 0.70710677, %v2571_v4  ;;  %v2575_v53 = vadd.f32 %v2574_v52, %v5145_v34  ;;  %v2602_v30 = vmul.f32 0.5, %v2571_v4 }
 0x4c3   : > { %3639 = verf.f32 %v2617_v57  ;;  %v2619_v42 = vmul.f32 0.70710677, %v2573_v50  ;;  %v2603_v45 = vmul.f32 0.5, %v2573_v50 }
 0x4c4   : > { %v3632_v59 = vpop.eup %3631  ;;  %3641 = verf.f32 %v2618_v49  ;;  %v2620_v47 = vmul.f32 0.70710677, %v2575_v53  ;;  %v2604_v57 = vmul.f32 0.5, %v2575_v53 }
 0x4c5   : > { %v3634_v37 = vpop.eup %3633  ;;  %v2645_v6 = vadd.f32 1.0, %v3632_v59  ;;  %3643 = verf.f32 %v2619_v42 }
 0x4c6   : > { %v3636_v56 = vpop.eup %3635  ;;  %v2646_v51 = vadd.f32 1.0, %v3634_v37  ;;  %3645 = verf.f32 %v2620_v47  ;;  %v2578_v39 = vpop.f32.mrb[40].mxu1 }
 0x4c7   : > { %v3638_v19 = vpop.eup %3637  ;;  %v2647_v11 = vadd.f32 1.0, %v3636_v56  ;;  %v5156_v35 = vadd.f32 %v2578_v39, %v5143_v43  ;;  %v2580_v12 = vpop.f32.mrb[41].mxu1  ;;  %v2661_v2 = vmul.f32 %v2645_v6, %v2597_v48 }
 0x4c8   : > { %v2648_v24 = vadd.f32 1.0, %v3638_v19  ;;  %v5159_v46 = vadd.f32 %v2580_v12, %v5145_v34  ;;  %v2582_v25 = vpop.f32.mrb[42].mxu1  ;;  %v2662_v21 = vmul.f32 %v2646_v51, %v2598_v26 }
 0x4c9   : > { %v2663_v16 = vmul.f32 %v2647_v11, %v2599_v1  ;;  %v2621_v32 = vmul.f32 0.70710677, %v5156_v35  ;;  %v2583_v20 = vadd.f32 %v2582_v25, %v5143_v43  ;;  %v2584_v17 = vpop.f32.mrb[43].mxu1 }
 0x4ca   : > { %v2664_v13 = vmul.f32 %v2648_v24, %v2600_v18  ;;  %v2622_v15 = vmul.f32 0.70710677, %v5159_v46  ;;  %v2585_v33 = vadd.f32 %v2584_v17, %v5145_v34 }
 0x4cb   : > { %v2677_v5 = vpack.c.bf16 %v2663_v16, %v2661_v2  ;;  %3647 = verf.f32 %v2621_v32  ;;  %v2623_v8 = vmul.f32 0.70710677, %v2583_v20  ;;  %v2607_v18 = vmul.f32 0.5, %v2583_v20 }
 0x4cc   : > { %3649 = verf.f32 %v2622_v15  ;;  %v2624_v27 = vmul.f32 0.70710677, %v2585_v33  ;;  %v2678_v9 = vpack.c.bf16 %v2664_v13, %v2662_v21  ;;  %v2608_v25 = vmul.f32 0.5, %v2585_v33 }
 0x4cd   : > { %v3640_v14 = vpop.eup %3639  ;;  %3651 = verf.f32 %v2623_v8 }
 0x4ce   : > { %v3642_v22 = vpop.eup %3641  ;;  %v2649_v61 = vadd.f32 1.0, %v3640_v14  ;;  %3653 = verf.f32 %v2624_v27  ;;  %v2588_v7 = vpop.f32.mrb[44].mxu1  ;;  %2813 = vmatprep.mubr.bf16.mxu0 %v2678_v9 }
 0x4cf   : > { %v3644_v44 = vpop.eup %3643  ;;  %v2650_v29 = vadd.f32 1.0, %v3642_v22  ;;  %v2589_v3 = vadd.f32 %v2588_v7, %v5143_v43  ;;  %v2590_v62 = vpop.f32.mrb[45].mxu1  ;;  %2814 = vmatmul.mubr.bf16.vlgmr.msra.gmra.mrb[64].mxu0 %v2677_v5 }
 0x4d0   : > { %v3646_v60 = vpop.eup %3645  ;;  %v2651_v31 = vadd.f32 1.0, %v3644_v44  ;;  %v2591_v38 = vadd.f32 %v2590_v62, %v5145_v34  ;;  %v2592_v28 = vpop.f32.mrb[46].mxu1  ;;  %v2665_v59 = vmul.f32 %v2649_v61, %v2601_v41 }
 0x4d1   : > { %v2652_v52 = vadd.f32 1.0, %v3646_v60  ;;  %v2625_v49 = vmul.f32 0.70710677, %v2589_v3  ;;  %v2594_v42 = vpop.f32.mrb[47].mxu1  ;;  %v2593_v6 = vadd.f32 %v2592_v28, %v5143_v43  ;;  %v2666_v56 = vmul.f32 %v2650_v29, %v2602_v30 }
 0x4d2   : > { %v2667_v47 = vmul.f32 %v2651_v31, %v2603_v45  ;;  %v2626_v37 = vmul.f32 0.70710677, %v2591_v38  ;;  %v2595_v10 = vadd.f32 %v2594_v42, %v5145_v34  ;;  %v2605_v43 = vmul.f32 0.5, %v5156_v35 }
 0x4d3   : > { %v2668_v51 = vmul.f32 %v2652_v52, %v2604_v57  ;;  %3655 = verf.f32 %v2625_v49  ;;  %v2627_v39 = vmul.f32 0.70710677, %v2593_v6  ;;  %v2606_v34 = vmul.f32 0.5, %v5159_v46 }
 0x4d4   : > { %v2679_v50 = vpack.c.bf16 %v2667_v47, %v2665_v59  ;;  %3657 = verf.f32 %v2626_v37  ;;  %v2628_v48 = vmul.f32 0.70710677, %v2595_v10  ;;  %v2609_v20 = vmul.f32 0.5, %v2589_v3 }
 0x4d5   : > { %v3648_v19 = vpop.eup %3647  ;;  %v2680_v4 = vpack.c.bf16 %v2668_v51, %v2666_v56  ;;  %3659 = verf.f32 %v2627_v39  ;;  %v2611_v22 = vmul.f32 0.5, %v2593_v6  ;;  %v2610_v33 = vmul.f32 0.5, %v2591_v38  ;;  %v3077_v38 = vld [vmem:[%s5259_s12] ss:$0 sm:$0xff] }
 0x4d6   : > { %v3650_v53 = vpop.eup %3649  ;;  %v2653_v1 = vadd.f32 1.0, %v3648_v19  ;;  %3661 = verf.f32 %v2628_v48  ;;  %v2612_v61 = vmul.f32 0.5, %v2595_v10 }
 0x4d7   : > { %v3652_v11 = vpop.eup %3651  ;;  %v2654_v12 = vadd.f32 1.0, %v3650_v53  ;;  %2821 = vmatprep.mubr.bf16.mxu1 %v2680_v4 }
 0x4d8   : > { %v3654_v26 = vpop.eup %3653  ;;  %v2655_v24 = vadd.f32 1.0, %v3652_v11  ;;  %2822 = vmatmul.mubr.bf16.vlgmr.msra.gmra.mrb[48].mxu1 %v2679_v50  ;;  %v2669_v16 = vmul.f32 %v2653_v1, %v2605_v43 }
 0x4d9   : > { %v2656_v2 = vadd.f32 1.0, %v3654_v26  ;;  %v2670_v17 = vmul.f32 %v2654_v12, %v2606_v34 }
 0x4da   : > { %v2671_v32 = vmul.f32 %v2655_v24, %v2607_v18 }
 0x4db   : > { %v2672_v21 = vmul.f32 %v2656_v2, %v2608_v25 }
 0x4dc   : > { %v2681_v13 = vpack.c.bf16 %v2671_v32, %v2669_v16 }
 0x4dd   : > { %v3656_v15 = vpop.eup %3655  ;;  %v2682_v5 = vpack.c.bf16 %v2672_v21, %v2670_v17 }
 0x4de   : > { %v3658_v8 = vpop.eup %3657  ;;  %v2657_v27 = vadd.f32 1.0, %v3656_v15 }
 0x4df   : > { %2829 = vmatprep.mubr.bf16.mxu1 %v2682_v5  ;;  %v3660_v9 = vpop.eup %3659  ;;  %v2658_v14 = vadd.f32 1.0, %v3658_v8 }
 0x4e0   : > { %2830 = vmatmul.mubr.bf16.gmra.mrb[52].mxu1 %v2681_v13  ;;  %v3662_v35 = vpop.eup %3661  ;;  %v2659_v46 = vadd.f32 1.0, %v3660_v9  ;;  %v2673_v44 = vmul.f32 %v2657_v27, %v2609_v20 }
 0x4e1   : > { %v2660_v7 = vadd.f32 1.0, %v3662_v35  ;;  %v2674_v62 = vmul.f32 %v2658_v14, %v2610_v33 }
 0x4e2   : > { %v2675_v29 = vmul.f32 %v2659_v46, %v2611_v22 }
 0x4e3   : > { %v2676_v60 = vmul.f32 %v2660_v7, %v2612_v61 }
 0x4e4   : > { %v2683_v41 = vpack.c.bf16 %v2675_v29, %v2673_v44 }
 0x4e5   : > { %v2684_v45 = vpack.c.bf16 %v2676_v60, %v2674_v62 }
 0x4e7   : > { %2837 = vmatprep.mubr.bf16.mxu1 %v2684_v45 }
 0x4e8   : > { %2838 = vmatmul.mubr.bf16.gmra.mrb[56].mxu1 %v2683_v41 }
 0x5a2   : > { %v3219_v31 = vpop.f32.mrb[64].mxu0 }
 0x5a3   : > { %v3220_v28 = vpop.f32.mrb[65].mxu0 }
 0x5a4   : > { %v3221_v3 = vadd.f32 %v3220_v28, %v3219_v31  ;;  %v3222_v30 = vpop.f32.mrb[66].mxu0 }
 0x5a5   : > { %v3223_v57 = vpop.f32.mrb[67].mxu0 }
 0x5a6   : > { %v2846_v52 = vadd.f32 %v3221_v3, %v4892_v0  ;;  %v3224_v49 = vadd.f32 %v3223_v57, %v3222_v30 }
 0x5a8   : > { %v2860_v42 = vadd.f32 %v3077_v38, %v2846_v52  ;;  %v2847_v59 = vadd.f32 %v3224_v49, %v4895_v40 }
 0x5aa   : > { %2868 = vst [vmem:[%s5179_s16] sm:$0xff] %v2860_v42  ;;  %v2861_v47 = vadd.f32 %v3077_v38, %v2847_v59 }
 0x5ab   : > { %v3225_v37 = vpop.f32.mrb[48].mxu1 }
 0x5ac   : > { %2869 = vst [vmem:[%s5179_s16 + $0x8] sm:$0xff] %v2861_v47  ;;  %v3226_v6 = vpop.f32.mrb[49].mxu1 }
 0x5ad   : > { %v3227_v56 = vadd.f32 %v3226_v6, %v3225_v37  ;;  %v3228_v51 = vpop.f32.mrb[50].mxu1 }
 0x5ae   : > { %v3229_v10 = vpop.f32.mrb[51].mxu1 }
 0x5af   : > { %v2848_v0 = vadd.f32 %v3227_v56, %v4905_v63  ;;  %v3230_v50 = vadd.f32 %v3229_v10, %v3228_v51 }
 0x5b1   : > { %v2862_v39 = vadd.f32 %v3077_v38, %v2848_v0  ;;  %v2849_v40 = vadd.f32 %v3230_v50, %v4907_v23 }
 0x5b3   : > { %2870 = vst [vmem:[%s5179_s16 + $0x10] sm:$0xff] %v2862_v39  ;;  %v2863_v19 = vadd.f32 %v3077_v38, %v2849_v40  ;;  %v3231_v48 = vpop.f32.mrb[52].mxu1 }
 0x5b4   : > { %v3232_v4 = vpop.f32.mrb[53].mxu1 }
 0x5b5   : > { %2871 = vst [vmem:[%s5179_s16 + $0x18] sm:$0xff] %v2863_v19  ;;  %v3233_v53 = vadd.f32 %v3232_v4, %v3231_v48  ;;  %v3234_v1 = vpop.f32.mrb[54].mxu1 }
 0x5b6   : > { %v3235_v11 = vpop.f32.mrb[55].mxu1 }
 0x5b7   : > { %v2850_v12 = vadd.f32 %v3233_v53, %v4920_v36  ;;  %v3236_v26 = vadd.f32 %v3235_v11, %v3234_v1 }
 0x5b9   : > { %v2864_v63 = vadd.f32 %v3077_v38, %v2850_v12  ;;  %v2851_v43 = vadd.f32 %v3236_v26, %v4922_v54 }
 0x5bb   : > { %2872 = vst [vmem:[%s5179_s16 + $0x20] sm:$0xff] %v2864_v63  ;;  %v2865_v23 = vadd.f32 %v3077_v38, %v2851_v43  ;;  %v3237_v18 = vpop.f32.mrb[56].mxu1 }
 0x5bc   : > { %v3238_v24 = vpop.f32.mrb[57].mxu1 }
 0x5bd   : > { %2873 = vst [vmem:[%s5179_s16 + $0x28] sm:$0xff] %v2865_v23  ;;  %v3239_v34 = vadd.f32 %v3238_v24, %v3237_v18  ;;  %v3240_v25 = vpop.f32.mrb[58].mxu1 }
 0x5be   : > { %v3241_v2 = vpop.f32.mrb[59].mxu1 }
 0x5bf   : > { %v2852_v16 = vadd.f32 %v3239_v34, %v4946_v58  ;;  %v3242_v32 = vadd.f32 %v3241_v2, %v3240_v25 }
 0x5c1   : > { %v2866_v36 = vadd.f32 %v3077_v38, %v2852_v16  ;;  %v2853_v54 = vadd.f32 %v3242_v32, %v4948_v55 }
 0x5c3   : > { %2874 = vst [vmem:[%s5179_s16 + $0x30] sm:$0xff] %v2866_v36  ;;  %v2867_v17 = vadd.f32 %v3077_v38, %v2853_v54 }
 0x5c5   : > { %2875 = vst [vmem:[%s5179_s16 + $0x38] sm:$0xff] %v2867_v17 }
 0x5c6   : > { %3684 = shalt.err (!%p3681_p3)
}
 0x5c7   : > { %s3685_s27 = scalar_lea.hbm %s5198_s0, 1024  ;;  %s3689_s22 = scalar_lea.hbm %s5260_s13, 2048 }
 0x5c8   : > { %p3686_p4 = scmp.ne.s32.totalorder %s5198_s0, %s3685_s27  ;;  %p3690_p9 = scmp.lt.u32.totalorder %s5198_s0, %s5260_s13 }
 0x5c9   : > { %p3691_p10 = scmp.lt.u32.totalorder %s3689_s22, %s3685_s27  ;;  %p3693_p12 = scmp.lt.u32.totalorder %s3685_s27, %s5198_s0 }
 0x5ca   : > { %p3687_p7 = pnand %p3686_p4, %p3847_p5 }
 0x5cb   : > { %p3692_p11 = por %p3691_p10, %p3690_p9 }
 0x5cc   : > { %p3688_p8 = pneg %p3687_p7 }
 0x5cd   : > { %p3694_p13 = por %p3693_p12, %p3692_p11 }
 0x5cf   : > { %p3695_p0 = pnand %p3694_p13, %p3688_p8 }
 0x5d1   : > { %3698 = shalt.err (!%p3695_p0)
}
 0x5d2   : > { %s3737_s29 = smov 128   ;;  %s3738_s30 = smov 8  }
 0x5d3   : > { %3331 = dma.vmem_to_hbm [thread:$0]  (%p3847_p5), %s5200_s21, 1024, %s5198_s0, %s5206_s23, %s3737_s29, %s3737_s29, %s3738_s30  }
 0x5d4 PF: > { %p3337_p1 = scmp.ge.s32.totalorder %s3733_s28, 2  ;;  %s2906_s15 = sand.u32 1, %s3721_s25  }
 0x5d5   : > { %s2907_s27 = scalar_lea.sflag [#allocation3], %s2906_s15 }
 0x5d6   : > { %p3334_p2 = pnand %p3337_p1, %p3851_p6 }
 0x5d8   : > { %3716 = dma.done.wait (!%p3334_p2), %s2907_s27, 1024  }
 0x5d9   : > { %3718 = vsyncadd (!%p3334_p2), %s2907_s27, 4294966272  ;;  %s5291_s16 = sld [smem:[#allocation5_spill]]  ;;  %s5292_s27 = sld [smem:[#allocation6_spill]] }
 0x5da   : > { %p23_p3 = scmp.ge.s32.totalorder %s3834_s14, 4   ;;  %s5293_s25 = smov %s3725_s26 }
 0x5db   : > { %s5295_s28 = smov %s3834_s14 }
 0x5dc   :  { %25 = sbr.rel (!%p23_p3) target bundleno = 5 (0x5), region = 107 }
 0x5df   : > { %s5294_s26 = smov %s5291_s16 }
 0x5e3   :  { %2912 = vsyncpa [#allocation3], 1 }
 0x5e4   :  { %2914 = vsyncpa [#allocation3 + $0x1], 1 }

// kernel: tpu_custom_call.1
= control target key start
LH: loop header
LB: loop body
LE: loop exit
PB: predicated region body
PF: predicated region fallthrough
CT: control target
= control target key end

     0   :  { %s5247_s0 = inlined_call_operand.vmem [shape: f32[8,16,128], index: 0, kind: input, shape index: {}]   ;;  %s5248_s1 = inlined_call_operand.vmem [shape: f32[1,128], index: 1, kind: input, shape index: {}]   ;;  %s5249_s2 = inlined_call_operand.vmem [shape: f32[1,128], index: 2, kind: input, shape index: {}]   ;;  %s5250_s3 = inlined_call_operand.vmem [shape: bf16[512,64], index: 3, kind: input, shape index: {}]   ;;  %s5251_s4 = inlined_call_operand.vmem [shape: f32[512,1], index: 4, kind: input, shape index: {}]   ;;  %s5252_s5 = inlined_call_operand.vmem [shape: bf16[64,512], index: 5, kind: input, shape index: {}]   ;;  %s5253_s6 = inlined_call_operand.vmem [shape: f32[64,1], index: 6, kind: input, shape index: {}]   ;;  %s5254_s7 = inlined_call_operand.vmem [shape: f32[1,128], index: 7, kind: input, shape index: {}]   ;;  %s5255_s8 = inlined_call_operand.vmem [shape: f32[1,128], index: 8, kind: input, shape index: {}]   ;;  %s5256_s9 = inlined_call_operand.vmem [shape: bf16[128,256], index: 9, kind: input, shape index: {}]   ;;  %s5257_s10 = inlined_call_operand.vmem [shape: f32[1,256], index: 10, kind: input, shape index: {}]   ;;  %s5258_s11 = inlined_call_operand.vmem [shape: bf16[256,128], index: 11, kind: input, shape index: {}]   ;;  %s5259_s12 = inlined_call_operand.vmem [shape: f32[1,128], index: 12, kind: input, shape index: {}]   ;;  %s5260_s13 = inlined_call_operand.hbm [shape: f32[8,16,128], index: 13, kind: output, shape index: {}]  }
   0x1   :  { %5264 = sst [smem:[#allocation13_spill]] %s5247_s0 }
   0x2   :  { %18 = vsyncpa [#allocation3], 0 }
   0x3   :  { %20 = vsyncpa [#allocation3 + $0x1], 0  ;;  %s3809_s25 = smov 0   ;;  %s3811_s26 = smov 0  }
   0x4   :  { %s3813_s27 = smov 0   ;;  %s3815_s28 = smov 0  }
   0x5 LB: > { %5265 = sst [smem:[#allocation5_spill]] %s3729_s27  ;;  %s3830_s29 = sadd.s32 4294967295, %s3733_s28   ;;  %s3733_s28 = sphi %s3815_s28, %s5295_s28   ;;  %s3729_s27 = sphi %s3813_s27, %s5292_s27   ;;  %s3725_s26 = sphi %s3811_s26, %s5294_s26   ;;  %s3721_s25 = sphi %s3809_s25, %s5293_s25  }
   0x6   : > { %s2953_s30 = sadd.s32 4294967294, %s3733_s28   ;;  %s3834_s14 = sadd.s32 1, %s3733_s28  }
   0x7   : > { %s311_s15 = sadd.s32 1, %s3729_s27  ;;  %s308_s16 = ssub.s32 %s3733_s28, %s3834_s14 }
   0x8   : > { %p321_p0 = scmp.ne.s32.totalorder %s3729_s27, %s3725_s26  ;;  %p309_p1 = scmp.eq.s32.totalorder %s308_s16, 0 }
   0x9   : > { %p322_p2 = scmp.eq.s32.totalorder %s3830_s29, 1  ;;  %p327_p3 = scmp.ne.s32.totalorder %s3725_s26, %s3721_s25 }
   0xa   : > { %p328_p4 = scmp.eq.s32.totalorder %s2953_s30, 1  ;;  %p2956_p7 = scmp.ge.s32.totalorder %s3733_s28, 1 }
   0xb   : > { %s3845_s17 = scalar_select %p309_p1, %s3729_s27, %s311_s15  }
   0xc   : > { %p3847_p5 = por %p322_p2, %p321_p0  ;;  %p3851_p6 = por %p328_p4, %p327_p3 }
   0xd   : > { %5266 = sst [smem:[#allocation6_spill]] %s3845_s17  ;;  %p392_p8 = scmp.lt.s32.totalorder %s3733_s28, 3 }
   0xf   : > { %p393_p9 = pnand %p2956_p7, %p392_p8 }
  0x11   : > { %396 = sbr.rel (%p393_p9) target bundleno = 1492 (0x5d4), region = 72 }
  0x18   : > { %s2958_s20 = sshll.u32 %s3830_s29, 2  ;;  %v5262_v0 = vmov 0   ;;  %s5269_s0 = sld [smem:[#allocation13_spill]]  ;;  %v531_v17 = vld [vmem:[%s5251_s4 + $0x88] sm:$0xff]  ;;  %v514_v18 = vld [vmem:[%s5251_s4] sm:$0xff]  ;;  %v532_v22 = vld [vmem:[%s5251_s4 + $0x90] sm:$0xff] }
  0x19   : > { %p438_p10 = scmp.lt.s32.totalorder %s2958_s20, 7  ;;  %3374 = vset.pattern.permute.xlu1 %v5262_v0  ;;  %3373 = vset.pattern.permute.xlu0 %v5262_v0  ;;  %v530_v19 = vld [vmem:[%s5251_s4 + $0x80] sm:$0xff]  ;;  %v515_v20 = vld [vmem:[%s5251_s4 + $0x8] sm:$0xff]  ;;  %v533_v24 = vld [vmem:[%s5251_s4 + $0x98] sm:$0xff]  ;;  %vm1285_vm0 = vcmask 523264   ;;  %s434_s27 = sand.u32 1, %s3725_s26  }
  0x1a   : > { %v535_v21 = vld [vmem:[%s5251_s4 + $0xa8] sm:$0xff]  ;;  %v537_v25 = vld [vmem:[%s5251_s4 + $0xb8] sm:$0xff]  ;;  %v516_v26 = vld [vmem:[%s5251_s4 + $0x10] sm:$0xff]  ;;  %s2957_s17 = sshll.u32 %s434_s27, 6  ;;  %s5206_s23 = scalar_lea.sflag [#allocation3], %s434_s27 }
  0x1b   : > { %s5297_s20 = smov (!%p438_p10, %s2958_s20), 7  ;;  %v519_v23 = vld [vmem:[%s5251_s4 + $0x28] sm:$0xff]  ;;  %v521_v27 = vld [vmem:[%s5251_s4 + $0x38] sm:$0xff]  ;;  %v534_v30 = vld [vmem:[%s5251_s4 + $0xa0] sm:$0xff]  ;;  %s5179_s16 = scalar_lea.vmem [#allocation2], %s2957_s17 }
  0x1c   : > { %s3084_s21 = sshll.u32 %s5297_s20, 4  ;;  %v517_v28 = vld [vmem:[%s5251_s4 + $0x18] sm:$0xff]  ;;  %v539_v29 = vld [vmem:[%s5251_s4 + $0xc8] sm:$0xff]  ;;  %v3375_v32 = vld [vmem:[%s5250_s3] sm:$0xff]   ;;  %s3086_s20 = sshll.u32 %s3830_s29, 10 }
  0x1d   : > { %v523_v31 = vld [vmem:[%s5251_s4 + $0x48] sm:$0xff]  ;;  %3251 = vmatprep.mubr.msk.bf16.mxu0 %vm1285_vm0, %v3375_v32  ;;  %v518_v33 = vld [vmem:[%s5251_s4 + $0x20] sm:$0xff]  ;;  %v541_v34 = vld [vmem:[%s5251_s4 + $0xd8] sm:$0xff]  ;;  %s3736_s17 = smov [#allocation2]  }
  0x1e   : > { %s3863_s24 = scalar_lea.vmem %s5269_s0, %s3084_s21  ;;  %v536_v35 = vld [vmem:[%s5251_s4 + $0xb0] sm:$0xff]  ;;  %v525_v36 = vld [vmem:[%s5251_s4 + $0x58] sm:$0xff]  ;;  %v543_v38 = vld [vmem:[%s5251_s4 + $0xe8] sm:$0xff]  ;;  %s2891_s21 = sshll.u32 %s5179_s16, 4  ;;  %s5200_s21 = int_to_ptr.vmem [resolvable:$true] %s2891_s21 }
  0x1f   : > { %v3866_v1 = vld [vmem:[%s3863_s24 + $0x18] sm:$0xff]  ;;  %v3869_v2 = vld [vmem:[%s3863_s24] sm:$0xff]  ;;  %v3876_v4 = vld [vmem:[%s3863_s24 + $0x8] sm:$0xff]  ;;  %s5198_s0 = scalar_lea.hbm %s5260_s13, %s3086_s20  ;;  %s3671_s29 = scalar_lea.vmem %s5200_s21, 1024 }
  0x20   : > { %666 = vadd.xlane.f32.xlu1 %v3866_v1  ;;  %660 = vadd.xlane.f32.xlu0 %v3869_v2  ;;  %v685_v3 = vmul.f32 %v3869_v2, %v3869_v2  ;;  %v3879_v5 = vld [vmem:[%s3863_s24 + $0x10] sm:$0xff]  ;;  %v686_v6 = vmul.f32 %v3876_v4, %v3876_v4  ;;  %v688_v8 = vmul.f32 %v3866_v1, %v3866_v1  ;;  %v3890_v9 = vld [vmem:[%s3863_s24 + $0x20] sm:$0xff]  ;;  %v3893_v10 = vld [vmem:[%s3863_s24 + $0x28] sm:$0xff]  ;;  %p3672_p11 = scmp.ne.s32.totalorder %s5200_s21, %s3671_s29  ;;  %s3675_s30 = sshll.u32 %s3736_s17, 4  ;;  %s3676_s30 = int_to_ptr.vmem [resolvable:$false] %s3675_s30 }
  0x21   : > { %v687_v7 = vmul.f32 %v3879_v5, %v3879_v5  ;;  %v689_v11 = vmul.f32 %v3890_v9, %v3890_v9  ;;  %v690_v12 = vmul.f32 %v3893_v10, %v3893_v10  ;;  %v3902_v13 = vld [vmem:[%s3863_s24 + $0x30] sm:$0xff]  ;;  %v3905_v14 = vld [vmem:[%s3863_s24 + $0x38] sm:$0xff]  ;;  %v538_v39 = vld [vmem:[%s5251_s4 + $0xc0] sm:$0xff]  ;;  %s3677_s15 = scalar_lea.vmem %s3676_s30, 2048  ;;  %p3678_p0 = scmp.lt.s32.totalorder %s5200_s21, %s3676_s30 }
  0x22   : > { %v691_v15 = vmul.f32 %v3902_v13, %v3902_v13  ;;  %v692_v16 = vmul.f32 %v3905_v14, %v3905_v14  ;;  %v520_v37 = vld [vmem:[%s5251_s4 + $0x30] sm:$0xff]  ;;  %v527_v40 = vld [vmem:[%s5251_s4 + $0x68] sm:$0xff]  ;;  %v522_v41 = vld [vmem:[%s5251_s4 + $0x40] sm:$0xff]  ;;  %p3673_p12 = pnand %p3672_p11, %p3847_p5  ;;  %p3679_p1 = scmp.lt.s32.totalorder %s3677_s15, %s3671_s29 }
  0x23   : > { %v545_v42 = vld [vmem:[%s5251_s4 + $0xf8] sm:$0xff]  ;;  %v540_v43 = vld [vmem:[%s5251_s4 + $0xd0] sm:$0xff]  ;;  %v563_v46 = vld [vmem:[%s5251_s4 + $0x188] sm:$0xff] }
  0x24   : > { %662 = vadd.xlane.f32.xlu0 %v3876_v4  ;;  %693 = vadd.xlane.f32.xlu1 %v685_v3  ;;  %v529_v44 = vld [vmem:[%s5251_s4 + $0x78] sm:$0xff]  ;;  %v524_v45 = vld [vmem:[%s5251_s4 + $0x50] sm:$0xff]  ;;  %v542_v47 = vld [vmem:[%s5251_s4 + $0xe0] sm:$0xff]  ;;  %p3674_p13 = pneg %p3673_p12  ;;  %p3680_p2 = por %p3679_p1, %p3678_p0 }
  0x25   : > { %v547_v48 = vld [vmem:[%s5251_s4 + $0x108] sm:$0xff]  ;;  %v526_v49 = vld [vmem:[%s5251_s4 + $0x60] sm:$0xff]  ;;  %v565_v50 = vld [vmem:[%s5251_s4 + $0x198] sm:$0xff] }
  0x26   : > { %v544_v51 = vld [vmem:[%s5251_s4 + $0xf0] sm:$0xff]  ;;  %v549_v52 = vld [vmem:[%s5251_s4 + $0x118] sm:$0xff]  ;;  %v567_v54 = vld [vmem:[%s5251_s4 + $0x1a8] sm:$0xff]  ;;  %p3681_p3 = pnand %p3680_p2, %p3674_p13 }
  0x27   : > { %v528_v53 = vld [vmem:[%s5251_s4 + $0x70] sm:$0xff]  ;;  %v562_v55 = vld [vmem:[%s5251_s4 + $0x180] sm:$0xff]  ;;  %v551_v56 = vld [vmem:[%s5251_s4 + $0x128] sm:$0xff] }
  0x28   : > { %664 = vadd.xlane.f32.xlu0 %v3879_v5  ;;  %695 = vadd.xlane.f32.xlu1 %v686_v6  ;;  %v546_v57 = vld [vmem:[%s5251_s4 + $0x100] sm:$0xff]  ;;  %v569_v58 = vld [vmem:[%s5251_s4 + $0x1b8] sm:$0xff]  ;;  %v564_v59 = vld [vmem:[%s5251_s4 + $0x190] sm:$0xff] }
  0x29   : > { %v553_v60 = vld [vmem:[%s5251_s4 + $0x138] sm:$0xff]  ;;  %v548_v61 = vld [vmem:[%s5251_s4 + $0x110] sm:$0xff]  ;;  %v571_v62 = vld [vmem:[%s5251_s4 + $0x1c8] sm:$0xff] }
  0x2a   : > { %v566_v63 = vld [vmem:[%s5251_s4 + $0x1a0] sm:$0xff]  ;;  %v555_v3 = vld [vmem:[%s5251_s4 + $0x148] sm:$0xff] }
  0x2b   : > { %v550_v6 = vld [vmem:[%s5251_s4 + $0x120] sm:$0xff] }
  0x2c   : > { %697 = vadd.xlane.f32.xlu0 %v687_v7  ;;  %699 = vadd.xlane.f32.xlu1 %v688_v8  ;;  %v573_v7 = vld [vmem:[%s5251_s4 + $0x1d8] sm:$0xff]  ;;  %v570_v32 = vld [vmem:[%s5251_s4 + $0x1c0] sm:$0xff] }
  0x30   : > { %668 = vadd.xlane.f32.xlu0 %v3890_v9  ;;  %670 = vadd.xlane.f32.xlu1 %v3893_v10 }
  0x34   : > { %701 = vadd.xlane.f32.xlu0 %v689_v11  ;;  %703 = vadd.xlane.f32.xlu1 %v690_v12 }
  0x38   : > { %672 = vadd.xlane.f32.xlu0 %v3902_v13  ;;  %674 = vadd.xlane.f32.xlu1 %v3905_v14 }
  0x3c   : > { %705 = vadd.xlane.f32.xlu0 %v691_v15  ;;  %707 = vadd.xlane.f32.xlu1 %v692_v16  ;;  %v568_v15 = vld [vmem:[%s5251_s4 + $0x1b0] sm:$0xff]  ;;  %v557_v16 = vld [vmem:[%s5251_s4 + $0x158] sm:$0xff] }
  0x4d   : > { %892 = vperm.xlu1 %3374, %v531_v17  }
  0x51   : > { %807 = vperm.xlu1 %3374, %v514_v18  }
  0x52   : > { %887 = vperm.xlu0 %3373, %v530_v19  }
  0x55   : > { %812 = vperm.xlu1 %3374, %v515_v20  }
  0x56   : > { %912 = vperm.xlu0 %3373, %v535_v21  }
  0x59   : > { %897 = vperm.xlu1 %3374, %v532_v22   ;;  %v552_v22 = vld [vmem:[%s5251_s4 + $0x130] sm:$0xff] }
  0x5a   : > { %832 = vperm.xlu0 %3373, %v519_v23   ;;  %v575_v23 = vld [vmem:[%s5251_s4 + $0x1e8] sm:$0xff] }
  0x5d   : > { %902 = vperm.xlu1 %3374, %v533_v24  }
  0x5e   : > { %922 = vperm.xlu0 %3373, %v537_v25  }
  0x61   : > { %817 = vperm.xlu1 %3374, %v516_v26  }
  0x62   : > { %842 = vperm.xlu0 %3373, %v521_v27  }
  0x65   : > { %822 = vperm.xlu1 %3374, %v517_v28  }
  0x66   : > { %932 = vperm.xlu0 %3373, %v539_v29  }
  0x69   : > { %907 = vperm.xlu1 %3374, %v534_v30  }
  0x6a   : > { %852 = vperm.xlu0 %3373, %v523_v31  }
  0x6d   : > { %827 = vperm.xlu1 %3374, %v518_v33   ;;  %v559_v33 = vld [vmem:[%s5251_s4 + $0x168] sm:$0xff] }
  0x6e   : > { %942 = vperm.xlu0 %3373, %v541_v34  }
  0x71   : > { %917 = vperm.xlu1 %3374, %v536_v35  }
  0x72   : > { %862 = vperm.xlu0 %3373, %v525_v36  }
  0x75   : > { %837 = vperm.xlu1 %3374, %v520_v37  }
  0x76   : > { %952 = vperm.xlu0 %3373, %v543_v38  }
  0x79   : > { %927 = vperm.xlu1 %3374, %v538_v39  }
  0x7a   : > { %872 = vperm.xlu0 %3373, %v527_v40  }
  0x7d   : > { %847 = vperm.xlu1 %3374, %v522_v41  }
  0x7e   : > { %962 = vperm.xlu0 %3373, %v545_v42  }
  0x81   : > { %937 = vperm.xlu1 %3374, %v540_v43   ;;  %v554_v43 = vld [vmem:[%s5251_s4 + $0x140] sm:$0xff] }
  0x82   : > { %882 = vperm.xlu0 %3373, %v529_v44   ;;  %v577_v44 = vld [vmem:[%s5251_s4 + $0x1f8] sm:$0xff] }
  0x85   : > { %857 = vperm.xlu1 %3374, %v524_v45  }
  0x86   : > { %1052 = vperm.xlu0 %3373, %v563_v46  }
  0x89   : > { %947 = vperm.xlu1 %3374, %v542_v47  }
  0x8a   : > { %972 = vperm.xlu0 %3373, %v547_v48  }
  0x8d   : > { %867 = vperm.xlu1 %3374, %v526_v49  }
  0x8e   : > { %1062 = vperm.xlu0 %3373, %v565_v50  }
  0x91   : > { %957 = vperm.xlu1 %3374, %v544_v51  }
  0x92   : > { %982 = vperm.xlu0 %3373, %v549_v52  }
  0x95   : > { %877 = vperm.xlu1 %3374, %v528_v53   ;;  %v572_v53 = vld [vmem:[%s5251_s4 + $0x1d0] sm:$0xff] }
  0x96   : > { %1072 = vperm.xlu0 %3373, %v567_v54  }
  0x99   : > { %1047 = vperm.xlu1 %3374, %v562_v55   ;;  %v561_v55 = vld [vmem:[%s5251_s4 + $0x178] sm:$0xff] }
  0x9a   : > { %992 = vperm.xlu0 %3373, %v551_v56  }
  0x9d   : > { %967 = vperm.xlu1 %3374, %v546_v57  }
  0x9e   : > { %1082 = vperm.xlu0 %3373, %v569_v58  }
  0xa1   : > { %1057 = vperm.xlu1 %3374, %v564_v59  }
  0xa2   : > { %1002 = vperm.xlu0 %3373, %v553_v60  }
  0xa5   : > { %977 = vperm.xlu1 %3374, %v548_v61  }
  0xa6   : > { %1092 = vperm.xlu0 %3373, %v571_v62  }
  0xa9   : > { %1067 = vperm.xlu1 %3374, %v566_v63  }
  0xaa   : > { %1012 = vperm.xlu0 %3373, %v555_v3   ;;  %v556_v3 = vld [vmem:[%s5251_s4 + $0x150] sm:$0xff] }
  0xad   : > { %v667_v8 = vpop.xlane.xlu1 %666  ;;  %v661_v11 = vpop.xlane.xlu0 %660  ;;  %987 = vperm.xlu1 %3374, %v550_v6  }
  0xae   : > { %v4064_v12 = vmul.f32 0.0078125, %v661_v11  ;;  %1102 = vperm.xlu0 %3373, %v573_v7   ;;  %v4082_v25 = vmul.f32 0.0078125, %v667_v8  ;;  %v595_v7 = vld [vmem:[%s5253_s6 + $0x8] sm:$0xff] }
  0xb0   : > { %v717_v19 = vmul.f32 %v4064_v12, %v4064_v12  ;;  %v720_v36 = vmul.f32 %v4082_v25, %v4082_v25  ;;  %v741_v6 = vsub.f32 %v3869_v2, %v4064_v12 }
  0xb1   : > { %v663_v17 = vpop.xlane.xlu0 %662  ;;  %v694_v18 = vpop.xlane.xlu1 %693  ;;  %1077 = vperm.xlu1 %3374, %v568_v15  }
  0xb2   : > { %v4074_v20 = vmul.f32 0.0078125, %v663_v17  ;;  %v709_v21 = vmul.f32 0.0078125, %v694_v18  ;;  %1022 = vperm.xlu0 %3373, %v557_v16   ;;  %v4129_v18 = vld [vmem:[%s5248_s1] ss:$0 sm:$0xff] }
  0xb4   : > { %v725_v24 = vsub.f32 %v709_v21, %v717_v19  ;;  %v718_v28 = vmul.f32 %v4074_v20, %v4074_v20 }
  0xb5   : > { %v665_v26 = vpop.xlane.xlu0 %664  ;;  %v696_v27 = vpop.xlane.xlu1 %695  ;;  %997 = vperm.xlu1 %3374, %v552_v22  }
  0xb6   : > { %v733_v29 = vmax.f32 %v725_v24, 0.0  ;;  %v4086_v30 = vmul.f32 0.0078125, %v665_v26  ;;  %v710_v31 = vmul.f32 0.0078125, %v696_v27  ;;  %1112 = vperm.xlu0 %3373, %v575_v23   ;;  %v574_v23 = vld [vmem:[%s5251_s4 + $0x1e0] sm:$0xff]  ;;  %v742_v24 = vsub.f32 %v3876_v4, %v4074_v20  ;;  %v597_v26 = vld [vmem:[%s5253_s6 + $0x18] sm:$0xff] }
  0xb8   : > { %v749_v34 = vadd.f32 1e-05, %v733_v29  ;;  %v726_v35 = vsub.f32 %v710_v31, %v718_v28  ;;  %v719_v37 = vmul.f32 %v4086_v30, %v4086_v30 }
  0xb9   : > { %v698_v38 = vpop.xlane.xlu0 %697  ;;  %v700_v39 = vpop.xlane.xlu1 %699  ;;  %1087 = vperm.xlu1 %3374, %v570_v32  }
  0xba   : > { %3471 = vrsqrt.f32 %v749_v34  ;;  %v734_v40 = vmax.f32 %v726_v35, 0.0  ;;  %v711_v41 = vmul.f32 0.0078125, %v698_v38  ;;  %v712_v42 = vmul.f32 0.0078125, %v700_v39  ;;  %1032 = vperm.xlu0 %3373, %v559_v33   ;;  %v558_v38 = vld [vmem:[%s5251_s4 + $0x160] sm:$0xff] }
  0xbb   : > { %v743_v39 = vsub.f32 %v3879_v5, %v4086_v30 }
  0xbc   : > { %v750_v45 = vadd.f32 1e-05, %v734_v40  ;;  %v727_v46 = vsub.f32 %v711_v41, %v719_v37  ;;  %v728_v47 = vsub.f32 %v712_v42, %v720_v36  ;;  %v4151_v37 = vld [vmem:[%s5249_s2] ss:$0 sm:$0xff]  ;;  %v599_v41 = vld [vmem:[%s5253_s6 + $0x28] sm:$0xff] }
  0xbd   : > { %v669_v48 = vpop.xlane.xlu0 %668  ;;  %v671_v49 = vpop.xlane.xlu1 %670  ;;  %1007 = vperm.xlu1 %3374, %v554_v43   ;;  %v744_v43 = vsub.f32 %v3866_v1, %v4082_v25  ;;  %v601_v25 = vld [vmem:[%s5253_s6 + $0x38] sm:$0xff] }
  0xbe   : > { %3473 = vrsqrt.f32 %v750_v45  ;;  %v735_v50 = vmax.f32 %v727_v46, 0.0  ;;  %v736_v51 = vmax.f32 %v728_v47, 0.0  ;;  %v4104_v52 = vmul.f32 0.0078125, %v669_v48  ;;  %1122 = vperm.xlu0 %3373, %v577_v44  }
  0xbf   : > { %v4109_v54 = vmul.f32 0.0078125, %v671_v49 }
  0xc0   : > { %v751_v56 = vadd.f32 1e-05, %v735_v50  ;;  %v752_v57 = vadd.f32 1e-05, %v736_v51  ;;  %v721_v58 = vmul.f32 %v4104_v52, %v4104_v52  ;;  %v576_v51 = vld [vmem:[%s5251_s4 + $0x1f0] sm:$0xff] }
  0xc1   : > { %v702_v59 = vpop.xlane.xlu0 %701  ;;  %v704_v60 = vpop.xlane.xlu1 %703  ;;  %1097 = vperm.xlu1 %3374, %v572_v53   ;;  %v722_v61 = vmul.f32 %v4109_v54, %v4109_v54 }
  0xc2   : > { %3475 = vrsqrt.f32 %v751_v56  ;;  %v713_v62 = vmul.f32 0.0078125, %v702_v59  ;;  %v714_v63 = vmul.f32 0.0078125, %v704_v60  ;;  %1042 = vperm.xlu0 %3373, %v561_v55   ;;  %v560_v60 = vld [vmem:[%s5251_s4 + $0x170] sm:$0xff] }
  0xc3   : > { %3477 = vrsqrt.f32 %v752_v57 }
  0xc4   : > { %v3472_v8 = vpop.eup %3471  ;;  %v729_v11 = vsub.f32 %v713_v62, %v721_v58  ;;  %v730_v15 = vsub.f32 %v714_v63, %v722_v61  ;;  %v745_v61 = vsub.f32 %v3890_v9, %v4104_v52  ;;  %v746_v63 = vsub.f32 %v3893_v10, %v4109_v54  ;;  %v596_v54 = vld [vmem:[%s5253_s6 + $0x10] sm:$0xff] }
  0xc5   : > { %v673_v16 = vpop.xlane.xlu0 %672  ;;  %v675_v17 = vpop.xlane.xlu1 %674  ;;  %v765_v19 = vmul.f32 %v3472_v8, %v741_v6  ;;  %1017 = vperm.xlu1 %3374, %v556_v3  }
  0xc6   : > { %v737_v21 = vmax.f32 %v729_v11, 0.0  ;;  %v738_v22 = vmax.f32 %v730_v15, 0.0  ;;  %v4131_v2 = vmul.f32 0.0078125, %v673_v16  ;;  %v4133_v12 = vmul.f32 0.0078125, %v675_v17  ;;  %2248 = vperm.xlu0 %3373, %v595_v7   ;;  %v594_v11 = vld [vmem:[%s5253_s6] sm:$0xff] }
  0xc7   : > { %v779_v35 = vmul.f32 %v4129_v18, %v765_v19 }
  0xc8   : > { %v3474_v27 = vpop.eup %3473  ;;  %v753_v28 = vadd.f32 1e-05, %v737_v21  ;;  %v754_v29 = vadd.f32 1e-05, %v738_v22  ;;  %v723_v31 = vmul.f32 %v4131_v2, %v4131_v2  ;;  %v724_v4 = vmul.f32 %v4133_v12, %v4133_v12 }
  0xc9   : > { %v706_v32 = vpop.xlane.xlu0 %705  ;;  %v708_v33 = vpop.xlane.xlu1 %707  ;;  %v766_v34 = vmul.f32 %v3474_v27, %v742_v24  ;;  %1107 = vperm.xlu1 %3374, %v574_v23   ;;  %v793_v47 = vadd.f32 %v4151_v37, %v779_v35  ;;  %v747_v16 = vsub.f32 %v3902_v13, %v4131_v2  ;;  %v748_v19 = vsub.f32 %v3905_v14, %v4133_v12  ;;  %v600_v2 = vld [vmem:[%s5253_s6 + $0x30] sm:$0xff]  ;;  %v3382_v35 = vld [vmem:[%s5250_s3 + $0x38] sm:$0xff]  }
  0xca   : > { %3479 = vrsqrt.f32 %v753_v28  ;;  %v715_v20 = vmul.f32 0.0078125, %v706_v32  ;;  %v716_v36 = vmul.f32 0.0078125, %v708_v33  ;;  %2258 = vperm.xlu0 %3373, %v597_v26   ;;  %v598_v26 = vld [vmem:[%s5253_s6 + $0x20] sm:$0xff]  ;;  %v3380_v33 = vld [vmem:[%s5250_s3 + $0x28] sm:$0xff]  }
  0xcb   : > { %3481 = vrsqrt.f32 %v754_v29  ;;  %v780_v40 = vmul.f32 %v4129_v18, %v766_v34  ;;  %v3376_v29 = vld [vmem:[%s5250_s3 + $0x8] sm:$0xff]   ;;  %v3379_v32 = vld [vmem:[%s5250_s3 + $0x20] sm:$0xff]   ;;  %v3381_v34 = vld [vmem:[%s5250_s3 + $0x30] sm:$0xff]  }
  0xcc   : > { %v3476_v42 = vpop.eup %3475  ;;  %v731_v44 = vsub.f32 %v715_v20, %v723_v31  ;;  %v732_v45 = vsub.f32 %v716_v36, %v724_v4  ;;  %v3378_v31 = vld [vmem:[%s5250_s3 + $0x18] sm:$0xff]   ;;  %v3383_v4 = vld [vmem:[%s5250_s3 + $0x40] sm:$0xff]   ;;  %v3384_v20 = vld [vmem:[%s5250_s3 + $0x48] sm:$0xff]  }
  0xcd   : > { %v3478_v46 = vpop.eup %3477  ;;  %v794_v48 = vadd.f32 %v4151_v37, %v780_v40  ;;  %v767_v49 = vmul.f32 %v3476_v42, %v743_v39  ;;  %1027 = vperm.xlu1 %3374, %v558_v38   ;;  %v3385_v36 = vld [vmem:[%s5250_s3 + $0x50] sm:$0xff]   ;;  %v3387_v38 = vld [vmem:[%s5250_s3 + $0x60] sm:$0xff]   ;;  %v3388_v39 = vld [vmem:[%s5250_s3 + $0x68] sm:$0xff]  }
  0xce   : > { %v739_v5 = vmax.f32 %v731_v44, 0.0  ;;  %v740_v30 = vmax.f32 %v732_v45, 0.0  ;;  %v768_v50 = vmul.f32 %v3478_v46, %v744_v43  ;;  %2268 = vperm.xlu0 %3373, %v599_v41   ;;  %v3389_v40 = vld [vmem:[%s5250_s3 + $0x70] sm:$0xff]   ;;  %v3390_v41 = vld [vmem:[%s5250_s3 + $0x78] sm:$0xff]   ;;  %v3391_v42 = vld [vmem:[%s5250_s3 + $0x80] sm:$0xff]  }
  0xcf   : > { %v801_v53 = vpack.c.bf16 %v794_v48, %v793_v47  ;;  %v781_v1 = vmul.f32 %v4129_v18, %v767_v49  ;;  %v3392_v43 = vld [vmem:[%s5250_s3 + $0x88] sm:$0xff]   ;;  %v3393_v44 = vld [vmem:[%s5250_s3 + $0x90] sm:$0xff]   ;;  %v3394_v45 = vld [vmem:[%s5250_s3 + $0x98] sm:$0xff]  }
  0xd0   : > { %v755_v55 = vadd.f32 1e-05, %v739_v5  ;;  %v756_v56 = vadd.f32 1e-05, %v740_v30  ;;  %v782_v57 = vmul.f32 %v4129_v18, %v768_v50  ;;  %v3395_v46 = vld [vmem:[%s5250_s3 + $0xa0] sm:$0xff]   ;;  %v3396_v47 = vld [vmem:[%s5250_s3 + $0xa8] sm:$0xff]  }
  0xd1   : > { %3243 = vmatprep.subr.bf16.mxu0 %v801_v53  ;;  %v795_v58 = vadd.f32 %v4151_v37, %v781_v1  ;;  %1117 = vperm.xlu1 %3374, %v576_v51   ;;  %v3397_v48 = vld [vmem:[%s5250_s3 + $0xb0] sm:$0xff]   ;;  %v3398_v49 = vld [vmem:[%s5250_s3 + $0xb8] sm:$0xff]   ;;  %v3399_v5 = vld [vmem:[%s5250_s3 + $0xc0] sm:$0xff]   ;;  %v4309_v51 = vpop.permute.xlu1 %892 }
  0xd2   : > { %3483 = vrsqrt.f32 %v755_v55  ;;  %3244 = vmatpush3.bf16.msra.mxu0 %v801_v53  ;;  %v796_v59 = vadd.f32 %v4151_v37, %v782_v57  ;;  %2278 = vperm.xlu0 %3373, %v601_v25   ;;  %v3400_v30 = vld [vmem:[%s5250_s3 + $0xc8] sm:$0xff]   ;;  %v3401_v50 = vld [vmem:[%s5250_s3 + $0xd0] sm:$0xff]   ;;  %v3402_v53 = vld [vmem:[%s5250_s3 + $0xd8] sm:$0xff]  }
  0xd3   : > { %3485 = vrsqrt.f32 %v756_v56  ;;  %v3403_v25 = vld [vmem:[%s5250_s3 + $0xe0] sm:$0xff]   ;;  %v3404_v56 = vld [vmem:[%s5250_s3 + $0xe8] sm:$0xff]   ;;  %v3405_v57 = vld [vmem:[%s5250_s3 + $0xf0] sm:$0xff]  }
  0xd4   : > { %v3480_v62 = vpop.eup %3479  ;;  %v802_v3 = vpack.c.bf16 %v796_v59, %v795_v58  ;;  %v3406_v59 = vld [vmem:[%s5250_s3 + $0xf8] sm:$0xff]  }
  0xd5   : > { %v3482_v6 = vpop.eup %3481  ;;  %v769_v7 = vmul.f32 %v3480_v62, %v745_v61  ;;  %1037 = vperm.xlu1 %3374, %v560_v60   ;;  %v808_v1 = vpop.permute.xlu1 %807 }
  0xd6   : > { %3245 = vmatprep.subr.bf16.mxu0 %v802_v3  ;;  %v770_v8 = vmul.f32 %v3482_v6, %v746_v63  ;;  %v4337_v63 = vpop.permute.xlu0 %887 }
  0xd7   : > { %3246 = vmatpush3.bf16.msra.mxu0 %v802_v3  ;;  %v783_v15 = vmul.f32 %v4129_v18, %v769_v7 }
  0xd8   : > { %v784_v9 = vmul.f32 %v4129_v18, %v770_v8 }
  0xd9   : > { %v797_v52 = vadd.f32 %v4151_v37, %v783_v15  ;;  %2243 = vperm.xlu1 %3374, %v594_v11   ;;  %v813_v55 = vpop.permute.xlu1 %812 }
  0xda   : > { %v798_v10 = vadd.f32 %v4151_v37, %v784_v9  ;;  %v4341_v6 = vpop.permute.xlu0 %912 }
  0xdc   : > { %v3484_v17 = vpop.eup %3483  ;;  %v803_v21 = vpack.c.bf16 %v798_v10, %v797_v52 }
  0xdd   : > { %v3486_v22 = vpop.eup %3485  ;;  %v771_v23 = vmul.f32 %v3484_v17, %v747_v16  ;;  %2253 = vperm.xlu1 %3374, %v596_v54   ;;  %v4328_v58 = vpop.permute.xlu1 %897 }
  0xde   : > { %3247 = vmatprep.subr.bf16.mxu0 %v803_v21  ;;  %v772_v24 = vmul.f32 %v3486_v22, %v748_v19  ;;  %v833_v8 = vpop.permute.xlu0 %832 }
  0xdf   : > { %3248 = vmatpush3.bf16.msra.mxu0 %v803_v21  ;;  %v785_v27 = vmul.f32 %v4129_v18, %v771_v23 }
  0xe0   : > { %v786_v28 = vmul.f32 %v4129_v18, %v772_v24  ;;  %v3377_v18 = vld [vmem:[%s5250_s3 + $0x10] sm:$0xff]  }
  0xe1   : > { %v799_v13 = vadd.f32 %v4151_v37, %v785_v27  ;;  %2263 = vperm.xlu1 %3374, %v598_v26   ;;  %v4334_v60 = vpop.permute.xlu1 %902 }
  0xe2   : > { %v800_v14 = vadd.f32 %v4151_v37, %v786_v28  ;;  %v3386_v37 = vld [vmem:[%s5250_s3 + $0x58] sm:$0xff]   ;;  %v4345_v15 = vpop.permute.xlu0 %922 }
  0xe4   : > { %v804_v12 = vpack.c.bf16 %v800_v14, %v799_v13 }
  0xe5   : > { %2273 = vperm.xlu1 %3374, %v600_v2   ;;  %v818_v61 = vpop.permute.xlu1 %817  ;;  %v3409_v2 = vld [vmem:[%s5252_s5 + $0x4] ss:$16 sps:$4 sm:$0xff]  }
  0xe6   : > { %3249 = vmatprep.subr.bf16.mxu0 %v804_v12  ;;  %v843_v52 = vpop.permute.xlu0 %842  ;;  %2135 = vmatprep.mubr.bf16.mxu1 %v3409_v2 }
  0xe7   : > { %3250 = vmatpush3.bf16.msra.mxu0 %v804_v12 }
  0xe9   : > { %v823_v62 = vpop.permute.xlu1 %822 }
  0xea   : > { %3252 = vmatmul.mubr.msk.bf16.vlgmr.msra.gmra.mrb[0].mxu0 %vm1285_vm0, %v3376_v29  ;;  %v4349_v54 = vpop.permute.xlu0 %932 }
  0xeb   : > { %3255 = vmatprep.mubr.msk.bf16.mxu0 %vm1285_vm0, %v3377_v18 }
  0xed   : > { %v4339_v3 = vpop.permute.xlu1 %907 }
  0xee   : > { %v4353_v17 = vpop.permute.xlu0 %852 }
  0xf1   : > { %v828_v7 = vpop.permute.xlu1 %827 }
  0xf2   : > { %3256 = vmatmul.mubr.msk.bf16.gmra.mrb[4].mxu0 %vm1285_vm0, %v3378_v31  ;;  %v4357_v21 = vpop.permute.xlu0 %942 }
  0xf3   : > { %3259 = vmatprep.mubr.msk.bf16.mxu0 %vm1285_vm0, %v3379_v32 }
  0xf5   : > { %v4343_v11 = vpop.permute.xlu1 %917 }
  0xf6   : > { %v4359_v23 = vpop.permute.xlu0 %862 }
  0xf9   : > { %v838_v9 = vpop.permute.xlu1 %837 }
  0xfa   : > { %3260 = vmatmul.mubr.msk.bf16.gmra.mrb[8].mxu0 %vm1285_vm0, %v3380_v33  ;;  %v4363_v26 = vpop.permute.xlu0 %952 }
  0xfb   : > { %3263 = vmatprep.mubr.msk.bf16.mxu0 %vm1285_vm0, %v3381_v34 }
  0xfd   : > { %v4347_v10 = vpop.permute.xlu1 %927 }
  0xfe   : > { %v4367_v28 = vpop.permute.xlu0 %872 }
 0x101   : > { %v4351_v16 = vpop.permute.xlu1 %847 }
 0x102   : > { %3264 = vmatmul.mubr.msk.bf16.gmra.mrb[12].mxu0 %vm1285_vm0, %v3382_v35  ;;  %v4371_v14 = vpop.permute.xlu0 %962 }
 0x103   : > { %3267 = vmatprep.mubr.msk.bf16.mxu0 %vm1285_vm0, %v3383_v4 }
 0x105   : > { %v4355_v19 = vpop.permute.xlu1 %937 }
 0x106   : > { %v4378_v29 = vpop.permute.xlu0 %882 }
 0x109   : > { %v858_v22 = vpop.permute.xlu1 %857 }
 0x10a   : > { %3268 = vmatmul.mubr.msk.bf16.gmra.mrb[16].mxu0 %vm1285_vm0, %v3384_v20  ;;  %v4382_v32 = vpop.permute.xlu0 %1052 }
 0x10b   : > { %3271 = vmatprep.mubr.msk.bf16.mxu0 %vm1285_vm0, %v3385_v36 }
 0x10d   : > { %v4361_v24 = vpop.permute.xlu1 %947 }
 0x111   : > { %v4365_v27 = vpop.permute.xlu1 %867 }
 0x112   : > { %3272 = vmatmul.mubr.msk.bf16.gmra.mrb[20].mxu0 %vm1285_vm0, %v3386_v37 }
 0x113   : > { %3275 = vmatprep.mubr.msk.bf16.mxu0 %vm1285_vm0, %v3387_v38 }
 0x115   : > { %v4369_v13 = vpop.permute.xlu1 %957 }
 0x119   : > { %v4376_v12 = vpop.permute.xlu1 %877 }
 0x11a   : > { %3276 = vmatmul.mubr.msk.bf16.gmra.mrb[24].mxu0 %vm1285_vm0, %v3388_v39 }
 0x11b   : > { %3279 = vmatprep.mubr.msk.bf16.mxu0 %vm1285_vm0, %v3389_v40 }
 0x11d   : > { %v4380_v18 = vpop.permute.xlu1 %1047 }
 0x121   : > { %v4384_v38 = vpop.permute.xlu1 %967 }
 0x122   : > { %3280 = vmatmul.mubr.msk.bf16.gmra.mrb[28].mxu0 %vm1285_vm0, %v3390_v41 }
 0x123   : > { %3283 = vmatprep.mubr.msk.bf16.mxu0 %vm1285_vm0, %v3391_v42 }
 0x12a   : > { %3284 = vmatmul.mubr.msk.bf16.gmra.mrb[32].mxu0 %vm1285_vm0, %v3392_v43  ;;  %v4386_v43 = vpop.permute.xlu0 %972 }
 0x12b   : > { %3287 = vmatprep.mubr.msk.bf16.mxu0 %vm1285_vm0, %v3393_v44 }
 0x132   : > { %3288 = vmatmul.mubr.msk.bf16.gmra.mrb[36].mxu0 %vm1285_vm0, %v3394_v45 }
 0x133   : > { %3291 = vmatprep.mubr.msk.bf16.mxu0 %vm1285_vm0, %v3395_v46 }
 0x13a   : > { %3292 = vmatmul.mubr.msk.bf16.gmra.mrb[40].mxu0 %vm1285_vm0, %v3396_v47  ;;  %v4390_v47 = vpop.permute.xlu1 %1057 }
 0x13b   : > { %3295 = vmatprep.mubr.msk.bf16.mxu0 %vm1285_vm0, %v3397_v48 }
 0x142   : > { %3296 = vmatmul.mubr.msk.bf16.gmra.mrb[44].mxu0 %vm1285_vm0, %v3398_v49 }
 0x143   : > { %3299 = vmatprep.mubr.msk.bf16.mxu0 %vm1285_vm0, %v3399_v5 }
 0x14a   : > { %3300 = vmatmul.mubr.msk.bf16.gmra.mrb[48].mxu0 %vm1285_vm0, %v3400_v30 }
 0x14b   : > { %3303 = vmatprep.mubr.msk.bf16.mxu0 %vm1285_vm0, %v3401_v50 }
 0x152   : > { %3304 = vmatmul.mubr.msk.bf16.gmra.mrb[52].mxu0 %vm1285_vm0, %v3402_v53 }
 0x153   : > { %3307 = vmatprep.mubr.msk.bf16.mxu0 %vm1285_vm0, %v3403_v25  ;;  %v4396_v25 = vpop.permute.xlu0 %1062 }
 0x15a   : > { %3308 = vmatmul.mubr.msk.bf16.gmra.mrb[56].mxu0 %vm1285_vm0, %v3404_v56 }
 0x15b   : > { %3311 = vmatprep.mubr.msk.bf16.mxu0 %vm1285_vm0, %v3405_v57 }
 0x162   : > { %3312 = vmatmul.mubr.msk.bf16.gmra.mrb[60].mxu0 %vm1285_vm0, %v3406_v59 }
 0x1bd   : > { %v3253_v31 = vpop.f32.mrb[0].mxu0 }
 0x1be   : > { %v1425_v33 = vadd.f32 %v3253_v31, %v818_v61  ;;  %v1416_v34 = vpop.f32.mrb[1].mxu0  ;;  %v4398_v61 = vpop.permute.xlu1 %977 }
 0x1bf   : > { %v1417_v35 = vadd.f32 %v1416_v34, %v808_v1  ;;  %v3254_v4 = vpop.f32.mrb[2].mxu0 }
 0x1c0   : > { %v1737_v20 = vmul.f32 0.70710677, %v1425_v33  ;;  %v1428_v36 = vadd.f32 %v3254_v4, %v823_v62  ;;  %v1419_v37 = vpop.f32.mrb[3].mxu0 }
 0x1c1   : > { %v1735_v39 = vmul.f32 0.70710677, %v1417_v35  ;;  %v1420_v40 = vadd.f32 %v1419_v37, %v813_v55 }
 0x1c2   : > { %3487 = verf.f32 %v1737_v20  ;;  %v1738_v41 = vmul.f32 0.70710677, %v1428_v36  ;;  %v1674_v34 = vmul.f32 0.5, %v1428_v36 }
 0x1c3   : > { %3489 = verf.f32 %v1735_v39  ;;  %v1736_v42 = vmul.f32 0.70710677, %v1420_v40 }
 0x1c4   : > { %3491 = verf.f32 %v1738_v41  ;;  %v4405_v41 = vpop.permute.xlu0 %982 }
 0x1c5   : > { %3493 = verf.f32 %v1736_v42  ;;  %v3257_v44 = vpop.f32.mrb[4].mxu0  ;;  %v1671_v42 = vmul.f32 0.5, %v1417_v35 }
 0x1c6   : > { %v4388_v45 = vadd.f32 %v3257_v44, %v838_v9  ;;  %v1432_v46 = vpop.f32.mrb[5].mxu0  ;;  %v1673_v9 = vmul.f32 0.5, %v1425_v33 }
 0x1c7   : > { %v4392_v48 = vadd.f32 %v1432_v46, %v828_v7  ;;  %v3258_v49 = vpop.f32.mrb[6].mxu0 }
 0x1c8   : > { %v1741_v5 = vmul.f32 0.70710677, %v4388_v45  ;;  %v1444_v30 = vadd.f32 %v3258_v49, %v843_v52  ;;  %v1435_v50 = vpop.f32.mrb[7].mxu0 }
 0x1c9   : > { %v1739_v53 = vmul.f32 0.70710677, %v4392_v48  ;;  %v1436_v1 = vadd.f32 %v1435_v50, %v833_v8 }
 0x1ca   : > { %3495 = verf.f32 %v1741_v5  ;;  %v1742_v55 = vmul.f32 0.70710677, %v1444_v30  ;;  %v1672_v5 = vmul.f32 0.5, %v1420_v40 }
 0x1cb   : > { %3497 = verf.f32 %v1739_v53  ;;  %v1740_v56 = vmul.f32 0.70710677, %v1436_v1  ;;  %v4420_v53 = vpop.permute.xlu1 %1067 }
 0x1cc   : > { %v3488_v57 = vpop.eup %3487  ;;  %3499 = verf.f32 %v1742_v55  ;;  %5270 = vst [vmem:[#allocation7_spill] sm:$0xff] %v4420_v53 }
 0x1cd   : > { %v3490_v59 = vpop.eup %3489  ;;  %3501 = verf.f32 %v1740_v56  ;;  %v3261_v62 = vpop.f32.mrb[8].mxu0  ;;  %v1865_v52 = vadd.f32 1.0, %v3488_v57 }
 0x1ce   : > { %v3492_v7 = vpop.eup %3491  ;;  %v4400_v2 = vadd.f32 %v3261_v62, %v858_v22  ;;  %v1448_v31 = vpop.f32.mrb[9].mxu0  ;;  %v1863_v39 = vadd.f32 1.0, %v3490_v59 }
 0x1cf   : > { %v3494_v8 = vpop.eup %3493  ;;  %v1866_v4 = vadd.f32 1.0, %v3492_v7  ;;  %v4403_v20 = vadd.f32 %v1448_v31, %v4351_v16  ;;  %v3262_v37 = vpop.f32.mrb[10].mxu0  ;;  %v4417_v50 = vmul.f32 %v1865_v52, %v1673_v9 }
 0x1d0   : > { %v1745_v44 = vmul.f32 0.70710677, %v4400_v2  ;;  %v4409_v46 = vadd.f32 %v3262_v37, %v4359_v23  ;;  %v1451_v33 = vpop.f32.mrb[11].mxu0  ;;  %v1864_v22 = vadd.f32 1.0, %v3494_v8  ;;  %v4423_v55 = vmul.f32 %v1863_v39, %v1671_v42  ;;  %v4431_v52 = vpop.permute.xlu0 %1072 }
 0x1d1   : > { %v4411_v49 = vmul.f32 %v1866_v4, %v1674_v34  ;;  %v1743_v36 = vmul.f32 0.70710677, %v4403_v20  ;;  %v4415_v16 = vadd.f32 %v1451_v33, %v4353_v17  ;;  %5271 = vst [vmem:[#allocation8_spill] sm:$0xff] %v4431_v52  ;;  %v1677_v37 = vmul.f32 0.5, %v4388_v45 }
 0x1d2   : > { %3503 = verf.f32 %v1745_v44  ;;  %v1746_v35 = vmul.f32 0.70710677, %v4409_v46  ;;  %v4425_v56 = vmul.f32 %v1864_v22, %v1672_v5  ;;  %v1678_v39 = vmul.f32 0.5, %v1444_v30 }
 0x1d3   : > { %3505 = verf.f32 %v1743_v36  ;;  %v1744_v23 = vmul.f32 0.70710677, %v4415_v16  ;;  %v1675_v22 = vmul.f32 0.5, %v4392_v48  ;;  %v1676_v5 = vmul.f32 0.5, %v1436_v1 }
 0x1d4   : > { %v3496_v40 = vpop.eup %3495  ;;  %3507 = verf.f32 %v1746_v35 }
 0x1d5   : > { %v3498_v57 = vpop.eup %3497  ;;  %v1869_v59 = vadd.f32 1.0, %v3496_v40  ;;  %3509 = verf.f32 %v1744_v23  ;;  %v3265_v62 = vpop.f32.mrb[12].mxu0 }
 0x1d6   : > { %v3500_v9 = vpop.eup %3499  ;;  %v1867_v31 = vadd.f32 1.0, %v3498_v57  ;;  %v4434_v8 = vadd.f32 %v3265_v62, %v4376_v12  ;;  %v1464_v34 = vpop.f32.mrb[13].mxu0 }
 0x1d7   : > { %v3502_v4 = vpop.eup %3501  ;;  %v1870_v42 = vadd.f32 1.0, %v3500_v9  ;;  %v4438_v44 = vadd.f32 %v1464_v34, %v4365_v27  ;;  %v3266_v33 = vpop.f32.mrb[14].mxu0  ;;  %v4444_v12 = vmul.f32 %v1869_v59, %v1677_v37 }
 0x1d8   : > { %v1868_v36 = vadd.f32 1.0, %v3502_v4  ;;  %v1749_v35 = vmul.f32 0.70710677, %v4434_v8  ;;  %v1467_v23 = vpop.f32.mrb[15].mxu0  ;;  %v4442_v40 = vpop.permute.xlu1 %987  ;;  %v4450_v30 = vadd.f32 %v3266_v33, %v4378_v29  ;;  %v4452_v27 = vmul.f32 %v1867_v31, %v1675_v22 }
 0x1d9   : > { %v4446_v57 = vmul.f32 %v1870_v42, %v1678_v39  ;;  %v1747_v45 = vmul.f32 0.70710677, %v4438_v44  ;;  %v4457_v48 = vadd.f32 %v1467_v23, %v4367_v28  ;;  %v4462_v34 = vpop.permute.xlu0 %992  ;;  %v1682_v23 = vmul.f32 0.5, %v4409_v46 }
 0x1da   : > { %v4454_v62 = vmul.f32 %v1868_v36, %v1676_v5  ;;  %3511 = verf.f32 %v1749_v35  ;;  %v1750_v1 = vmul.f32 0.70710677, %v4450_v30  ;;  %v1681_v35 = vmul.f32 0.5, %v4400_v2 }
 0x1db   : > { %3513 = verf.f32 %v1747_v45  ;;  %v1748_v29 = vmul.f32 0.70710677, %v4457_v48  ;;  %v1684_v17 = vmul.f32 0.5, %v4457_v48 }
 0x1dc   : > { %v3504_v9 = vpop.eup %3503  ;;  %3515 = verf.f32 %v1750_v1  ;;  %v4470_v36 = vpop.permute.xlu1 %1077 }
 0x1dd   : > { %v3506_v4 = vpop.eup %3505  ;;  %v1873_v37 = vadd.f32 1.0, %v3504_v9  ;;  %v3269_v39 = vpop.f32.mrb[16].mxu0  ;;  %3517 = verf.f32 %v1748_v29  ;;  %5272 = vst [vmem:[#allocation9_spill] sm:$0xff] %v4470_v36  ;;  %v1679_v9 = vmul.f32 0.5, %v4403_v20  ;;  %v1680_v29 = vmul.f32 0.5, %v4415_v16 }
 0x1de   : > { %v3508_v28 = vpop.eup %3507  ;;  %v1871_v42 = vadd.f32 1.0, %v3506_v4  ;;  %v4468_v33 = vadd.f32 %v3269_v39, %v4328_v58  ;;  %v1480_v22 = vpop.f32.mrb[17].mxu0 }
 0x1df   : > { %v3510_v5 = vpop.eup %3509  ;;  %v1874_v45 = vadd.f32 1.0, %v3508_v28  ;;  %v4475_v0 = vadd.f32 %v1480_v22, %v4337_v63  ;;  %v3270_v1 = vpop.f32.mrb[18].mxu0  ;;  %v4480_v59 = vmul.f32 %v1873_v37, %v1681_v35 }
 0x1e0   : > { %v1872_v4 = vadd.f32 1.0, %v3510_v5  ;;  %v1753_v58 = vmul.f32 0.70710677, %v4468_v33  ;;  %v1483_v39 = vpop.f32.mrb[19].mxu0  ;;  %v1492_v46 = vadd.f32 %v3270_v1, %v4334_v60  ;;  %v4486_v28 = vpop.permute.xlu0 %1082  ;;  %v4488_v63 = vmul.f32 %v1871_v42, %v1679_v9 }
 0x1e1   : > { %v4482_v31 = vmul.f32 %v1874_v45, %v1682_v23  ;;  %v1751_v2 = vmul.f32 0.70710677, %v4475_v0  ;;  %5273 = vst [vmem:[#allocation10_spill] sm:$0xff] %v4486_v28  ;;  %v4493_v20 = vadd.f32 %v1483_v39, %v4309_v51  ;;  %v4500_v42 = vpop.permute.xlu1 %997 }
 0x1e2   : > { %v4490_v22 = vmul.f32 %v1872_v4, %v1680_v29  ;;  %3519 = verf.f32 %v1753_v58  ;;  %v1754_v16 = vmul.f32 0.70710677, %v1492_v46  ;;  %v1685_v4 = vmul.f32 0.5, %v4434_v8 }
 0x1e3   : > { %3521 = verf.f32 %v1751_v2  ;;  %v1752_v35 = vmul.f32 0.70710677, %v4493_v20 }
 0x1e4   : > { %v3512_v5 = vpop.eup %3511  ;;  %3523 = verf.f32 %v1754_v16  ;;  %v4509_v60 = vpop.permute.xlu0 %1002  ;;  %v1683_v16 = vmul.f32 0.5, %v4438_v44 }
 0x1e5   : > { %v3514_v23 = vpop.eup %3513  ;;  %v3273_v45 = vpop.f32.mrb[20].mxu0  ;;  %v1877_v1 = vadd.f32 1.0, %v3512_v5  ;;  %3525 = verf.f32 %v1752_v35  ;;  %v1686_v5 = vmul.f32 0.5, %v4450_v30 }
 0x1e6   : > { %v4503_v51 = vadd.f32 %v3273_v45, %v4343_v11  ;;  %v1496_v9 = vpop.f32.mrb[21].mxu0  ;;  %v3516_v29 = vpop.eup %3515  ;;  %v1875_v58 = vadd.f32 1.0, %v3514_v23 }
 0x1e7   : > { %v4507_v39 = vadd.f32 %v1496_v9, %v4339_v3  ;;  %v3274_v2 = vpop.f32.mrb[22].mxu0  ;;  %v3518_v37 = vpop.eup %3517  ;;  %v1878_v35 = vadd.f32 1.0, %v3516_v29  ;;  %v4519_v23 = vmul.f32 %v1877_v1, %v1685_v4 }
 0x1e8   : > { %v1757_v11 = vmul.f32 0.70710677, %v4503_v51  ;;  %v1499_v45 = vpop.f32.mrb[23].mxu0  ;;  %v1876_v7 = vadd.f32 1.0, %v3518_v37  ;;  %v4517_v3 = vadd.f32 %v3274_v2, %v4345_v15  ;;  %v4526_v30 = vpop.permute.xlu1 %1087  ;;  %v4528_v29 = vmul.f32 %v1875_v58, %v1683_v16 }
 0x1e9   : > { %v1755_v8 = vmul.f32 0.70710677, %v4507_v39  ;;  %v4521_v9 = vmul.f32 %v1878_v35, %v1686_v5  ;;  %v4524_v44 = vadd.f32 %v1499_v45, %v4341_v6  ;;  %5274 = vst [vmem:[#allocation11_spill] sm:$0xff] %v4526_v30  ;;  %v4538_v5 = vpop.permute.xlu0 %1092  ;;  %v1689_v35 = vmul.f32 0.5, %v4468_v33 }
 0x1ea   : > { %3527 = verf.f32 %v1757_v11  ;;  %v4530_v52 = vmul.f32 %v1876_v7, %v1684_v17  ;;  %v1758_v48 = vmul.f32 0.70710677, %v4517_v3  ;;  %5275 = vst [vmem:[#allocation12_spill] sm:$0xff] %v4538_v5  ;;  %v1687_v11 = vmul.f32 0.5, %v4475_v0 }
 0x1eb   : > { %3529 = verf.f32 %v1755_v8  ;;  %v1756_v15 = vmul.f32 0.70710677, %v4524_v44  ;;  %v1690_v45 = vmul.f32 0.5, %v1492_v46  ;;  %v1688_v33 = vmul.f32 0.5, %v4493_v20 }
 0x1ec   : > { %v3520_v37 = vpop.eup %3519  ;;  %3531 = verf.f32 %v1758_v48 }
 0x1ed   : > { %v3522_v4 = vpop.eup %3521  ;;  %v3277_v2 = vpop.f32.mrb[24].mxu0  ;;  %v1881_v58 = vadd.f32 1.0, %v3520_v37  ;;  %3533 = verf.f32 %v1756_v15 }
 0x1ee   : > { %v4541_v17 = vadd.f32 %v3277_v2, %v4355_v19  ;;  %v1512_v7 = vpop.f32.mrb[25].mxu0  ;;  %v3524_v16 = vpop.eup %3523  ;;  %v1879_v15 = vadd.f32 1.0, %v3522_v4 }
 0x1ef   : > { %v4546_v8 = vadd.f32 %v1512_v7, %v4347_v10  ;;  %v3278_v48 = vpop.f32.mrb[26].mxu0  ;;  %v3526_v1 = vpop.eup %3525  ;;  %v1882_v6 = vadd.f32 1.0, %v3524_v16  ;;  %v1945_v7 = vmul.f32 %v1881_v58, %v1689_v35 }
 0x1f0   : > { %v1761_v5 = vmul.f32 0.70710677, %v4541_v17  ;;  %v4550_v37 = vadd.f32 %v3278_v48, %v4357_v21  ;;  %v1515_v19 = vpop.f32.mrb[27].mxu0  ;;  %v4552_v2 = vpop.permute.xlu1 %1007  ;;  %v1880_v10 = vadd.f32 1.0, %v3526_v1  ;;  %v1943_v28 = vmul.f32 %v1879_v15, %v1687_v11 }
 0x1f1   : > { %v1759_v0 = vmul.f32 0.70710677, %v4546_v8  ;;  %v4557_v46 = vadd.f32 %v1515_v19, %v4349_v54  ;;  %v1946_v30 = vmul.f32 %v1882_v6, %v1690_v45  ;;  %v4561_v4 = vpop.permute.xlu0 %1012  ;;  %v1693_v45 = vmul.f32 0.5, %v4503_v51 }
 0x1f2   : > { %3535 = verf.f32 %v1761_v5  ;;  %v1762_v16 = vmul.f32 0.70710677, %v4550_v37  ;;  %v1944_v20 = vmul.f32 %v1880_v10, %v1688_v33  ;;  %v1691_v15 = vmul.f32 0.5, %v4507_v39 }
 0x1f3   : > { %3537 = verf.f32 %v1759_v0  ;;  %v1760_v21 = vmul.f32 0.70710677, %v4557_v46  ;;  %v2000_v53 = vpack.c.bf16 %v1946_v30, %v1945_v7  ;;  %v1694_v33 = vmul.f32 0.5, %v4517_v3 }
 0x1f4   : > { %v3528_v48 = vpop.eup %3527  ;;  %3539 = verf.f32 %v1762_v16  ;;  %v1999_v5 = vpack.c.bf16 %v1944_v20, %v1943_v28  ;;  %v4566_v35 = vpop.permute.xlu1 %1097  ;;  %v1692_v7 = vmul.f32 0.5, %v4524_v44 }
 0x1f5   : > { %v3530_v36 = vpop.eup %3529  ;;  %3541 = verf.f32 %v1760_v21  ;;  %v3281_v54 = vpop.f32.mrb[28].mxu0  ;;  %v1885_v19 = vadd.f32 1.0, %v3528_v48 }
 0x1f6   : > { %v4564_v1 = vadd.f32 %v3281_v54, %v4369_v13  ;;  %v1528_v6 = vpop.f32.mrb[29].mxu0  ;;  %v3532_v58 = vpop.eup %3531  ;;  %v1883_v0 = vadd.f32 1.0, %v3530_v36  ;;  %3123 = vmatprep.subr.bf16.mxu1 %v1999_v5 }
 0x1f7   : > { %v4570_v16 = vadd.f32 %v1528_v6, %v4361_v24  ;;  %v3282_v11 = vpop.f32.mrb[30].mxu0  ;;  %v3534_v30 = vpop.eup %3533  ;;  %v1886_v10 = vadd.f32 1.0, %v3532_v58  ;;  %v5276_v24 = vpack.c.bf16 %v4425_v56, %v4423_v55  ;;  %v1949_v3 = vmul.f32 %v1885_v19, %v1693_v45 }
 0x1f8   : > { %v1765_v13 = vmul.f32 0.70710677, %v4564_v1  ;;  %v1531_v28 = vpop.f32.mrb[31].mxu0  ;;  %v1884_v21 = vadd.f32 1.0, %v3534_v30  ;;  %v4578_v36 = vadd.f32 %v3282_v11, %v4371_v14  ;;  %v4583_v39 = vpop.permute.xlu0 %1102  ;;  %v1947_v44 = vmul.f32 %v1883_v0, %v1691_v15 }
 0x1f9   : > { %v1763_v51 = vmul.f32 0.70710677, %v4570_v16  ;;  %3124 = vmatpush3.bf16.msra.mxu1 %v5276_v24  ;;  %v1950_v48 = vmul.f32 %v1886_v10, %v1694_v33  ;;  %v4586_v20 = vadd.f32 %v1531_v28, %v4363_v26  ;;  %v4590_v56 = vpop.permute.xlu1 %1017  ;;  %v5277_v19 = vpack.c.bf16 %v4411_v49, %v4417_v50 }
 0x1fa   : > { %3543 = verf.f32 %v1765_v13  ;;  %3125 = vmatprep.subr.bf16.mxu1 %v2000_v53  ;;  %v1948_v54 = vmul.f32 %v1884_v21, %v1692_v7  ;;  %v1766_v6 = vmul.f32 0.70710677, %v4578_v36  ;;  %v1697_v10 = vmul.f32 0.5, %v4541_v17 }
 0x1fb   : > { %3545 = verf.f32 %v1763_v51  ;;  %v1764_v5 = vmul.f32 0.70710677, %v4586_v20  ;;  %v2002_v58 = vpack.c.bf16 %v1950_v48, %v1949_v3  ;;  %v1698_v13 = vmul.f32 0.5, %v4550_v37 }
 0x1fc   : > { %v3536_v14 = vpop.eup %3535  ;;  %3547 = verf.f32 %v1766_v6  ;;  %v2001_v53 = vpack.c.bf16 %v1948_v54, %v1947_v44  ;;  %v4603_v50 = vpop.permute.xlu0 %1022  ;;  %v1695_v21 = vmul.f32 0.5, %v4546_v8  ;;  %v1696_v51 = vmul.f32 0.5, %v4557_v46 }
 0x1fd   : > { %v3538_v55 = vpop.eup %3537  ;;  %v1889_v11 = vadd.f32 1.0, %v3536_v14  ;;  %3126 = vmatpush3.bf16.msra.mxu1 %v5277_v19  ;;  %v3285_v26 = vpop.f32.mrb[32].mxu0  ;;  %3549 = verf.f32 %v1764_v5 }
 0x1fe   : > { %v3540_v45 = vpop.eup %3539  ;;  %v1887_v0 = vadd.f32 1.0, %v3538_v55  ;;  %v4596_v30 = vadd.f32 %v3285_v26, %v4398_v61  ;;  %v1544_v15 = vpop.f32.mrb[33].mxu0  ;;  %3127 = vmatprep.subr.bf16.mxu1 %v2001_v53 }
 0x1ff   : > { %v3542_v33 = vpop.eup %3541  ;;  %v1890_v28 = vadd.f32 1.0, %v3540_v45  ;;  %v4601_v7 = vadd.f32 %v1544_v15, %v4384_v38  ;;  %v3286_v49 = vpop.f32.mrb[34].mxu0  ;;  %v1953_v48 = vmul.f32 %v1889_v11, %v1697_v10  ;;  %v5278_v38 = vpack.c.bf16 %v4454_v62, %v4452_v27 }
 0x200   : > { %v1888_v61 = vadd.f32 1.0, %v3542_v33  ;;  %v1769_v24 = vmul.f32 0.70710677, %v4596_v30  ;;  %v1547_v3 = vpop.f32.mrb[35].mxu0  ;;  %v4610_v44 = vadd.f32 %v3286_v49, %v4405_v41  ;;  %v1951_v54 = vmul.f32 %v1887_v0, %v1695_v21  ;;  %v4618_v46 = vpop.permute.xlu1 %1107 }
 0x201   : > { %v1954_v17 = vmul.f32 %v1890_v28, %v1698_v13  ;;  %v1767_v37 = vmul.f32 0.70710677, %v4601_v7  ;;  %3128 = vmatpush3.bf16.msra.mxu1 %v5278_v38  ;;  %v4616_v8 = vadd.f32 %v1547_v3, %v4386_v43  ;;  %v5279_v27 = vpack.c.bf16 %v4446_v57, %v4444_v12  ;;  %v4625_v43 = vpop.permute.xlu0 %1112 }
 0x202   : > { %v1952_v6 = vmul.f32 %v1888_v61, %v1696_v51  ;;  %3551 = verf.f32 %v1769_v24  ;;  %3129 = vmatprep.subr.bf16.mxu1 %v2002_v58  ;;  %v1770_v14 = vmul.f32 0.70710677, %v4610_v44  ;;  %v1701_v0 = vmul.f32 0.5, %v4564_v1 }
 0x203   : > { %3553 = verf.f32 %v1767_v37  ;;  %v2004_v5 = vpack.c.bf16 %v1954_v17, %v1953_v48  ;;  %v1768_v41 = vmul.f32 0.70710677, %v4616_v8  ;;  %v1699_v57 = vmul.f32 0.5, %v4570_v16 }
 0x204   : > { %v3544_v55 = vpop.eup %3543  ;;  %v2003_v11 = vpack.c.bf16 %v1952_v6, %v1951_v54  ;;  %3555 = verf.f32 %v1770_v14  ;;  %v1702_v13 = vmul.f32 0.5, %v4578_v36  ;;  %v4637_v21 = vpop.permute.xlu1 %1027  ;;  %v1700_v51 = vmul.f32 0.5, %v4586_v20 }
 0x205   : > { %v3546_v19 = vpop.eup %3545  ;;  %3130 = vmatpush3.bf16.msra.mxu1 %v5279_v27  ;;  %v3289_v62 = vpop.f32.mrb[36].mxu0  ;;  %v1893_v58 = vadd.f32 1.0, %v3544_v55  ;;  %3557 = verf.f32 %v1768_v41  ;;  %v5280_v24 = vpack.c.bf16 %v4490_v22, %v4488_v63  ;;  %v5281_v22 = vpack.c.bf16 %v4482_v31, %v4480_v59 }
 0x206   : > { %v4628_v26 = vadd.f32 %v3289_v62, %v4500_v42  ;;  %v1560_v53 = vpop.f32.mrb[37].mxu0  ;;  %3131 = vmatprep.subr.bf16.mxu1 %v2003_v11  ;;  %v3548_v45 = vpop.eup %3547  ;;  %v1891_v15 = vadd.f32 1.0, %v3546_v19  ;;  %v1705_v19 = vmul.f32 0.5, %v4596_v30 }
 0x207   : > { %v4632_v33 = vadd.f32 %v1560_v53, %v4442_v40  ;;  %v3290_v10 = vpop.f32.mrb[38].mxu0  ;;  %v3550_v12 = vpop.eup %3549  ;;  %v1894_v28 = vadd.f32 1.0, %v3548_v45  ;;  %v1957_v16 = vmul.f32 %v1893_v58, %v1701_v0  ;;  %v1703_v58 = vmul.f32 0.5, %v4601_v7 }
 0x208   : > { %v1773_v49 = vmul.f32 0.70710677, %v4628_v26  ;;  %v1563_v42 = vpop.f32.mrb[39].mxu0  ;;  %v1892_v61 = vadd.f32 1.0, %v3550_v12  ;;  %v4642_v40 = vadd.f32 %v3290_v10, %v4509_v60  ;;  %v1955_v48 = vmul.f32 %v1891_v15, %v1699_v57  ;;  %v4651_v38 = vpop.permute.xlu0 %1032 }
 0x209   : > { %v1771_v1 = vmul.f32 0.70710677, %v4632_v33  ;;  %3132 = vmatpush3.bf16.msra.mxu1 %v5280_v24  ;;  %v1958_v36 = vmul.f32 %v1894_v28, %v1702_v13  ;;  %v4648_v3 = vadd.f32 %v1563_v42, %v4462_v34  ;;  %v4660_v11 = vpop.permute.xlu1 %1117  ;;  %v1706_v53 = vmul.f32 0.5, %v4610_v44  ;;  %v3407_v42 = vld [vmem:[%s5252_s5] ss:$16 sps:$4 sm:$0xff]  }
 0x20a   : > { %3559 = verf.f32 %v1773_v49  ;;  %3133 = vmatprep.subr.bf16.mxu1 %v2004_v5  ;;  %v1956_v17 = vmul.f32 %v1892_v61, %v1700_v51  ;;  %v1774_v20 = vmul.f32 0.70710677, %v4642_v40  ;;  %v1704_v15 = vmul.f32 0.5, %v4616_v8 }
 0x20b   : > { %3561 = verf.f32 %v1771_v1  ;;  %v1772_v60 = vmul.f32 0.70710677, %v4648_v3  ;;  %v2006_v54 = vpack.c.bf16 %v1958_v36, %v1957_v16  ;;  %v5283_v1 = vpack.c.bf16 %v4521_v9, %v4519_v23  ;;  %v3410_v16 = vld [vmem:[%s5252_s5 + $0x24] ss:$16 sps:$4 sm:$0xff]  }
 0x20c   : > { %v3552_v37 = vpop.eup %3551  ;;  %3563 = verf.f32 %v1774_v20  ;;  %v2005_v6 = vpack.c.bf16 %v1956_v17, %v1955_v48  ;;  %v4677_v57 = vpop.permute.xlu0 %1122 }
 0x20d   : > { %v3554_v63 = vpop.eup %3553  ;;  %3134 = vmatpush3.bf16.msra.mxu1 %v5281_v22  ;;  %v3293_v34 = vpop.f32.mrb[40].mxu0  ;;  %v1897_v14 = vadd.f32 1.0, %v3552_v37  ;;  %3565 = verf.f32 %v1772_v60  ;;  %v1709_v37 = vmul.f32 0.5, %v4628_v26  ;;  %v1707_v22 = vmul.f32 0.5, %v4632_v33 }
 0x20e   : > { %v4658_v5 = vadd.f32 %v3293_v34, %v4590_v56  ;;  %v1576_v55 = vpop.f32.mrb[41].mxu0  ;;  %v3556_v41 = vpop.eup %3555  ;;  %v1895_v27 = vadd.f32 1.0, %v3554_v63  ;;  %3135 = vmatprep.subr.bf16.mxu1 %v2005_v6  ;;  %v1710_v34 = vmul.f32 0.5, %v4642_v40 }
 0x20f   : > { %v4664_v62 = vadd.f32 %v1576_v55, %v4552_v2  ;;  %v3294_v59 = vpop.f32.mrb[42].mxu0  ;;  %v3558_v31 = vpop.eup %3557  ;;  %v1898_v45 = vadd.f32 1.0, %v3556_v41  ;;  %v5282_v2 = vpack.c.bf16 %v4530_v52, %v4528_v29  ;;  %v4679_v7 = vmul.f32 %v1897_v14, %v1705_v19 }
 0x210   : > { %v1777_v56 = vmul.f32 0.70710677, %v4658_v5  ;;  %v1579_v0 = vpop.f32.mrb[43].mxu0  ;;  %v1896_v10 = vadd.f32 1.0, %v3558_v31  ;;  %v4672_v12 = vadd.f32 %v3294_v59, %v4603_v50  ;;  %v4686_v8 = vmul.f32 %v1895_v27, %v1703_v58  ;;  %v1038_v51 = vpop.permute.xlu1 %1037 }
 0x211   : > { %v1775_v30 = vmul.f32 0.70710677, %v4664_v62  ;;  %3136 = vmatpush3.bf16.msra.mxu1 %v5282_v2  ;;  %v4681_v44 = vmul.f32 %v1898_v45, %v1706_v53  ;;  %v4684_v13 = vadd.f32 %v1579_v0, %v4561_v4  ;;  %v1043_v9 = vpop.permute.xlu0 %1042  ;;  %v1708_v41 = vmul.f32 0.5, %v4648_v3 }
 0x212   : > { %3567 = verf.f32 %v1777_v56  ;;  %3137 = vmatprep.subr.bf16.mxu1 %v2006_v54  ;;  %v4688_v28 = vmul.f32 %v1896_v10, %v1704_v15  ;;  %v1778_v50 = vmul.f32 0.70710677, %v4672_v12  ;;  %v3412_v56 = vld [vmem:[%s5252_s5 + $0x20] ss:$16 sps:$4 sm:$0xff]   ;;  %v3413_v10 = vld [vmem:[%s5252_s5 + $0x44] ss:$16 sps:$4 sm:$0xff]  }
 0x213   : > { %3569 = verf.f32 %v1775_v30  ;;  %v2008_v29 = vpack.c.bf16 %v4681_v44, %v4679_v7  ;;  %v1776_v49 = vmul.f32 0.70710677, %v4684_v13 }
 0x214   : > { %v3560_v52 = vpop.eup %3559  ;;  %v2007_v61 = vpack.c.bf16 %v4688_v28, %v4686_v8  ;;  %3571 = verf.f32 %v1778_v50 }
 0x215   : > { %v3562_v4 = vpop.eup %3561  ;;  %3138 = vmatpush3.bf16.msra.mxu1 %v5283_v1  ;;  %v3297_v24 = vpop.f32.mrb[44].mxu0  ;;  %v1901_v36 = vadd.f32 1.0, %v3560_v52  ;;  %3573 = verf.f32 %v1776_v49  ;;  %v1713_v49 = vmul.f32 0.5, %v4658_v5 }
 0x216   : > { %v4705_v48 = vadd.f32 %v3297_v24, %v1038_v51  ;;  %v1592_v17 = vpop.f32.mrb[45].mxu0  ;;  %v3564_v20 = vpop.eup %3563  ;;  %v1899_v60 = vadd.f32 1.0, %v3562_v4  ;;  %v1711_v24 = vmul.f32 0.5, %v4664_v62 }
 0x217   : > { %v4709_v54 = vadd.f32 %v1592_v17, %v4637_v21  ;;  %v3298_v63 = vpop.f32.mrb[46].mxu0  ;;  %v3566_v23 = vpop.eup %3565  ;;  %v1902_v6 = vadd.f32 1.0, %v3564_v20  ;;  %v4718_v21 = vmul.f32 %v1901_v36, %v1709_v37 }
 0x218   : > { %v1781_v14 = vmul.f32 0.70710677, %v4705_v48  ;;  %v1595_v55 = vpop.f32.mrb[47].mxu0  ;;  %2136 = vmatmul.mubr.bf16.vlgmr.msra.gmra.mrb[0].mxu1 %v3407_v42  ;;  %v1900_v19 = vadd.f32 1.0, %v3566_v23  ;;  %v4716_v27 = vadd.f32 %v3298_v63, %v1043_v9  ;;  %v4725_v40 = vmul.f32 %v1899_v60, %v1707_v22 }
 0x219   : > { %v1779_v26 = vmul.f32 0.70710677, %v4709_v54  ;;  %2143 = vmatprep.mubr.bf16.mxu1 %v3410_v16  ;;  %v4720_v59 = vmul.f32 %v1902_v6, %v1710_v34  ;;  %v4723_v33 = vadd.f32 %v1595_v55, %v4651_v38  ;;  %v1714_v16 = vmul.f32 0.5, %v4672_v12  ;;  %v3415_v34 = vld [vmem:[%s5252_s5 + $0x40] ss:$16 sps:$4 sm:$0xff]  }
 0x21a   : > { %3575 = verf.f32 %v1781_v14  ;;  %v4727_v31 = vmul.f32 %v1900_v19, %v1708_v41  ;;  %v1782_v3 = vmul.f32 0.70710677, %v4716_v27  ;;  %v3416_v55 = vld [vmem:[%s5252_s5 + $0x64] ss:$16 sps:$4 sm:$0xff]  }
 0x21b   : > { %3577 = verf.f32 %v1779_v26  ;;  %v2010_v53 = vpack.c.bf16 %v4720_v59, %v4718_v21  ;;  %v1780_v45 = vmul.f32 0.70710677, %v4723_v33  ;;  %v5284_v19 = vld [vmem:[#allocation9_spill] sm:$0xff] }
 0x21c   : > { %v3568_v58 = vpop.eup %3567  ;;  %v2009_v38 = vpack.c.bf16 %v4727_v31, %v4725_v40  ;;  %3579 = verf.f32 %v1782_v3 }
 0x21d   : > { %v3570_v0 = vpop.eup %3569  ;;  %v3301_v15 = vpop.f32.mrb[48].mxu0  ;;  %v1905_v30 = vadd.f32 1.0, %v3568_v58  ;;  %3581 = verf.f32 %v1780_v45  ;;  %v1717_v45 = vmul.f32 0.5, %v4705_v48 }
 0x21e   : > { %v4742_v2 = vadd.f32 %v3301_v15, %v4390_v47  ;;  %v1608_v50 = vpop.f32.mrb[49].mxu0  ;;  %v3572_v52 = vpop.eup %3571  ;;  %v1903_v42 = vadd.f32 1.0, %v3570_v0  ;;  %v1712_v47 = vmul.f32 0.5, %v4684_v13  ;;  %v5285_v0 = vld [vmem:[#allocation7_spill] sm:$0xff] }
 0x21f   : > { %v4746_v4 = vadd.f32 %v1608_v50, %v4380_v18  ;;  %v3302_v51 = vpop.f32.mrb[50].mxu0  ;;  %v3574_v1 = vpop.eup %3573  ;;  %v1906_v36 = vadd.f32 1.0, %v3572_v52  ;;  %v4756_v18 = vmul.f32 %v1905_v30, %v1713_v49  ;;  %v1715_v50 = vmul.f32 0.5, %v4709_v54  ;;  %v5287_v54 = vld [vmem:[#allocation8_spill] sm:$0xff] }
 0x220   : > { %v1785_v17 = vmul.f32 0.70710677, %v4742_v2  ;;  %v1611_v20 = vpop.f32.mrb[51].mxu0  ;;  %2144 = vmatmul.mubr.bf16.gmra.mrb[4].mxu1 %v3412_v56  ;;  %v1904_v37 = vadd.f32 1.0, %v3574_v1  ;;  %v4754_v60 = vadd.f32 %v3302_v51, %v4396_v25  ;;  %v4763_v12 = vmul.f32 %v1903_v42, %v1711_v24 }
 0x221   : > { %v1783_v5 = vmul.f32 0.70710677, %v4746_v4  ;;  %2151 = vmatprep.mubr.bf16.mxu1 %v3413_v10  ;;  %v4758_v63 = vmul.f32 %v1906_v36, %v1714_v16  ;;  %v4761_v62 = vadd.f32 %v1611_v20, %v4382_v32  ;;  %v1718_v52 = vmul.f32 0.5, %v4716_v27  ;;  %v5286_v16 = vld [vmem:[#allocation10_spill] sm:$0xff] }
 0x222   : > { %3583 = verf.f32 %v1785_v17  ;;  %v4765_v23 = vmul.f32 %v1904_v37, %v1712_v47  ;;  %v1786_v13 = vmul.f32 0.70710677, %v4754_v60  ;;  %v1716_v1 = vmul.f32 0.5, %v4723_v33 }
 0x223   : > { %3585 = verf.f32 %v1783_v5  ;;  %v2012_v25 = vpack.c.bf16 %v4758_v63, %v4756_v18  ;;  %v1784_v22 = vmul.f32 0.70710677, %v4761_v62  ;;  %v3422_v18 = vld [vmem:[%s5252_s5 + $0x2c] ss:$16 sps:$4 sm:$0xff]   ;;  %v3424_v63 = vld [vmem:[%s5252_s5 + $0x28] ss:$16 sps:$4 sm:$0xff]  }
 0x224   : > { %v3576_v9 = vpop.eup %3575  ;;  %v2011_v32 = vpack.c.bf16 %v4765_v23, %v4763_v12  ;;  %3587 = verf.f32 %v1786_v13  ;;  %v3419_v12 = vld [vmem:[%s5252_s5 + $0x8] ss:$16 sps:$4 sm:$0xff]   ;;  %v3425_v23 = vld [vmem:[%s5252_s5 + $0x4c] ss:$16 sps:$4 sm:$0xff]  }
 0x225   : > { %v3578_v6 = vpop.eup %3577  ;;  %v3305_v14 = vpop.f32.mrb[52].mxu0  ;;  %v1909_v41 = vadd.f32 1.0, %v3576_v9  ;;  %3589 = verf.f32 %v1784_v22  ;;  %v3418_v22 = vld [vmem:[%s5252_s5 + $0x60] ss:$16 sps:$4 sm:$0xff]  }
 0x226   : > { %v4780_v26 = vadd.f32 %v3305_v14, %v5284_v19  ;;  %v1624_v3 = vpop.f32.mrb[53].mxu0  ;;  %v3580_v58 = vpop.eup %3579  ;;  %v1907_v56 = vadd.f32 1.0, %v3578_v6 }
 0x227   : > { %v4784_v15 = vadd.f32 %v1624_v3, %v5285_v0  ;;  %v3306_v10 = vpop.f32.mrb[54].mxu0  ;;  %v3582_v30 = vpop.eup %3581  ;;  %v1910_v49 = vadd.f32 1.0, %v3580_v58  ;;  %v4794_v17 = vmul.f32 %v1909_v41, %v1717_v45  ;;  %v1721_v45 = vmul.f32 0.5, %v4742_v2  ;;  %v5288_v0 = vld [vmem:[#allocation11_spill] sm:$0xff] }
 0x228   : > { %v1789_v42 = vmul.f32 0.70710677, %v4780_v26  ;;  %v1627_v51 = vpop.f32.mrb[55].mxu0  ;;  %2152 = vmatmul.mubr.bf16.gmra.mrb[8].mxu1 %v3415_v34  ;;  %v1908_v24 = vadd.f32 1.0, %v3582_v30  ;;  %v4792_v36 = vadd.f32 %v3306_v10, %v5286_v16  ;;  %v4801_v47 = vmul.f32 %v1907_v56, %v1715_v50 }
 0x229   : > { %v1787_v48 = vmul.f32 0.70710677, %v4784_v15  ;;  %2159 = vmatprep.mubr.bf16.mxu1 %v3416_v55  ;;  %v4796_v20 = vmul.f32 %v1910_v49, %v1718_v52  ;;  %v4799_v27 = vadd.f32 %v1627_v51, %v5287_v54  ;;  %v3421_v55 = vld [vmem:[%s5252_s5 + $0xc] ss:$16 sps:$4 sm:$0xff]   ;;  %v1719_v52 = vmul.f32 0.5, %v4746_v4 }
 0x22a   : > { %3591 = verf.f32 %v1789_v42  ;;  %v4803_v37 = vmul.f32 %v1908_v24, %v1716_v1  ;;  %v1790_v33 = vmul.f32 0.70710677, %v4792_v36  ;;  %v1722_v49 = vmul.f32 0.5, %v4754_v60 }
 0x22b   : > { %3593 = verf.f32 %v1787_v48  ;;  %v2014_v13 = vpack.c.bf16 %v4796_v20, %v4794_v17  ;;  %v1788_v9 = vmul.f32 0.70710677, %v4799_v27  ;;  %v3430_v17 = vld [vmem:[%s5252_s5 + $0x68] ss:$16 sps:$4 sm:$0xff]   ;;  %v5290_v20 = vmov 0  }
 0x22c   : > { %v3584_v5 = vpop.eup %3583  ;;  %v2013_v6 = vpack.c.bf16 %v4803_v37, %v4801_v47  ;;  %3595 = verf.f32 %v1790_v33  ;;  %v5289_v33 = vld [vmem:[#allocation12_spill] sm:$0xff] }
 0x22d   : > { %v3586_v34 = vpop.eup %3585  ;;  %v3309_v14 = vpop.f32.mrb[56].mxu0  ;;  %v1913_v41 = vadd.f32 1.0, %v3584_v5  ;;  %3597 = verf.f32 %v1788_v9 }
 0x22e   : > { %v4818_v19 = vadd.f32 %v3309_v14, %v4566_v35  ;;  %v1640_v3 = vpop.f32.mrb[57].mxu0  ;;  %v3588_v58 = vpop.eup %3587  ;;  %v1911_v56 = vadd.f32 1.0, %v3586_v34  ;;  %v1720_v35 = vmul.f32 0.5, %v4761_v62 }
 0x22f   : > { %v4822_v10 = vadd.f32 %v1640_v3, %v5288_v0  ;;  %v3310_v30 = vpop.f32.mrb[58].mxu0  ;;  %v3590_v50 = vpop.eup %3589  ;;  %v1914_v42 = vadd.f32 1.0, %v3588_v58  ;;  %v1977_v16 = vmul.f32 %v1913_v41, %v1721_v45  ;;  %v1725_v45 = vmul.f32 0.5, %v4780_v26 }
 0x230   : > { %v1793_v51 = vmul.f32 0.70710677, %v4818_v19  ;;  %v1643_v1 = vpop.f32.mrb[59].mxu0  ;;  %2160 = vmatmul.mubr.bf16.gmra.mrb[12].mxu1 %v3418_v22  ;;  %v1912_v24 = vadd.f32 1.0, %v3590_v50  ;;  %v1652_v48 = vadd.f32 %v3310_v30, %v4583_v39  ;;  %v1975_v5 = vmul.f32 %v1911_v56, %v1719_v52 }
 0x231   : > { %v1791_v2 = vmul.f32 0.70710677, %v4822_v10  ;;  %2200 = vmatprep.mubr.bf16.mxu1 %v3421_v55  ;;  %v1978_v54 = vmul.f32 %v1914_v42, %v1722_v49  ;;  %v1644_v4 = vadd.f32 %v1643_v1, %v5289_v33  ;;  %v1723_v49 = vmul.f32 0.5, %v4784_v15 }
 0x232   : > { %3599 = verf.f32 %v1793_v51  ;;  %v1976_v60 = vmul.f32 %v1912_v24, %v1720_v35  ;;  %v1794_v9 = vmul.f32 0.70710677, %v1652_v48  ;;  %v1726_v42 = vmul.f32 0.5, %v4792_v36 }
 0x233   : > { %3601 = verf.f32 %v1791_v2  ;;  %v1792_v14 = vmul.f32 0.70710677, %v1644_v4  ;;  %v2016_v22 = vpack.c.bf16 %v1978_v54, %v1977_v16  ;;  %v1724_v35 = vmul.f32 0.5, %v4799_v27 }
 0x234   : > { %v3592_v34 = vpop.eup %3591  ;;  %3603 = verf.f32 %v1794_v9  ;;  %v2015_v58 = vpack.c.bf16 %v1976_v60, %v1975_v5  ;;  %v1727_v7 = vmul.f32 0.5, %v4822_v10  ;;  %v1728_v44 = vmul.f32 0.5, %v1644_v4 }
 0x235   : > { %v3594_v3 = vpop.eup %3593  ;;  %v3313_v62 = vpop.f32.mrb[60].mxu0  ;;  %v1917_v0 = vadd.f32 1.0, %v3592_v34  ;;  %3605 = verf.f32 %v1792_v14  ;;  %v1729_v34 = vmul.f32 0.5, %v4818_v19  ;;  %v1730_v14 = vmul.f32 0.5, %v1652_v48 }
 0x236   : > { %v1665_v39 = vadd.f32 %v3313_v62, %v4660_v11  ;;  %v1656_v55 = vpop.f32.mrb[61].mxu0  ;;  %v3596_v41 = vpop.eup %3595  ;;  %v1915_v30 = vadd.f32 1.0, %v3594_v3  ;;  %3163 = vmatprep.subr.bf16.mxu1 %v2015_v58 }
 0x237   : > { %v1657_v56 = vadd.f32 %v1656_v55, %v4618_v46  ;;  %v3314_v50 = vpop.f32.mrb[62].mxu0  ;;  %v3598_v52 = vpop.eup %3597  ;;  %v1918_v51 = vadd.f32 1.0, %v3596_v41  ;;  %3164 = vmatpush3.bf16.msra.mxu1 %v2007_v61  ;;  %v1981_v2 = vmul.f32 %v1917_v0, %v1725_v45 }
 0x238   : > { %v1797_v1 = vmul.f32 0.70710677, %v1665_v39  ;;  %v1659_v11 = vpop.f32.mrb[63].mxu0  ;;  %v1916_v26 = vadd.f32 1.0, %v3598_v52  ;;  %v1668_v46 = vadd.f32 %v3314_v50, %v4677_v57  ;;  %3165 = vmatprep.subr.bf16.mxu1 %v2016_v22  ;;  %v1979_v36 = vmul.f32 %v1915_v30, %v1723_v49 }
 0x239   : > { %v1795_v24 = vmul.f32 0.70710677, %v1657_v56  ;;  %v1982_v16 = vmul.f32 %v1918_v51, %v1726_v42  ;;  %v1660_v15 = vadd.f32 %v1659_v11, %v4625_v43  ;;  %v1733_v10 = vmul.f32 0.5, %v1665_v39 }
 0x23a   : > { %3607 = verf.f32 %v1797_v1  ;;  %v1980_v54 = vmul.f32 %v1916_v26, %v1724_v35  ;;  %v1798_v33 = vmul.f32 0.70710677, %v1668_v46  ;;  %v1734_v4 = vmul.f32 0.5, %v1668_v46 }
 0x23b   : > { %3609 = verf.f32 %v1795_v24  ;;  %v1796_v8 = vmul.f32 0.70710677, %v1660_v15  ;;  %3166 = vmatpush3.bf16.msra.mxu1 %v2008_v29  ;;  %v2018_v28 = vpack.c.bf16 %v1982_v16, %v1981_v2  ;;  %v1731_v50 = vmul.f32 0.5, %v1657_v56 }
 0x23c   : > { %v3600_v5 = vpop.eup %3599  ;;  %3611 = verf.f32 %v1798_v33  ;;  %v2017_v57 = vpack.c.bf16 %v1980_v54, %v1979_v36  ;;  %v1732_v52 = vmul.f32 0.5, %v1660_v15 }
 0x23d   : > { %v3602_v61 = vpop.eup %3601  ;;  %v1921_v27 = vadd.f32 1.0, %v3600_v5  ;;  %3613 = verf.f32 %v1796_v8 }
 0x23e   : > { %v3604_v60 = vpop.eup %3603  ;;  %v1919_v9 = vadd.f32 1.0, %v3602_v61  ;;  %3167 = vmatprep.subr.bf16.mxu1 %v2017_v57 }
 0x23f   : > { %v3606_v43 = vpop.eup %3605  ;;  %v1922_v22 = vadd.f32 1.0, %v3604_v60  ;;  %3168 = vmatpush3.bf16.msra.mxu1 %v2009_v38  ;;  %v1985_v3 = vmul.f32 %v1921_v27, %v1729_v34 }
 0x240   : > { %v1920_v29 = vadd.f32 1.0, %v3606_v43  ;;  %3169 = vmatprep.subr.bf16.mxu1 %v2018_v28  ;;  %v1983_v58 = vmul.f32 %v1919_v9, %v1727_v7 }
 0x241   : > { %v1986_v62 = vmul.f32 %v1922_v22, %v1730_v14 }
 0x242   : > { %v1984_v0 = vmul.f32 %v1920_v29, %v1728_v44  ;;  %v3663_v29 = vld [vmem:[%s3863_s24] sm:$0xff] }
 0x243   : > { %3170 = vmatpush3.bf16.msra.mxu1 %v2010_v53  ;;  %v2020_v19 = vpack.c.bf16 %v1986_v62, %v1985_v3 }
 0x244   : > { %v3608_v55 = vpop.eup %3607  ;;  %v2019_v41 = vpack.c.bf16 %v1984_v0, %v1983_v58  ;;  %v2244_v58 = vpop.permute.xlu1 %2243 }
 0x245   : > { %v3610_v48 = vpop.eup %3609  ;;  %v1925_v45 = vadd.f32 1.0, %v3608_v55  ;;  %v3664_v55 = vld [vmem:[%s3863_s24 + $0x8] sm:$0xff] }
 0x246   : > { %v3612_v40 = vpop.eup %3611  ;;  %v1923_v31 = vadd.f32 1.0, %v3610_v48  ;;  %3171 = vmatprep.subr.bf16.mxu1 %v2019_v41  ;;  %v2249_v41 = vpop.permute.xlu0 %2248 }
 0x247   : > { %v3614_v38 = vpop.eup %3613  ;;  %v1926_v30 = vadd.f32 1.0, %v3612_v40  ;;  %3172 = vmatpush3.bf16.msra.mxu1 %v2011_v32  ;;  %v1989_v21 = vmul.f32 %v1925_v45, %v1733_v10  ;;  %v3428_v32 = vld [vmem:[%s5252_s5 + $0x6c] ss:$16 sps:$4 sm:$0xff]  }
 0x248   : > { %v1924_v49 = vadd.f32 1.0, %v3614_v38  ;;  %3173 = vmatprep.subr.bf16.mxu1 %v2020_v19  ;;  %v1987_v53 = vmul.f32 %v1923_v31, %v1731_v50 }
 0x249   : > { %v1990_v59 = vmul.f32 %v1926_v30, %v1734_v4 }
 0x24a   : > { %v1988_v42 = vmul.f32 %v1924_v49, %v1732_v52  ;;  %v3665_v52 = vld [vmem:[%s3863_s24 + $0x10] sm:$0xff] }
 0x24b   : > { %3174 = vmatpush3.bf16.msra.mxu1 %v2012_v25  ;;  %v2022_v51 = vpack.c.bf16 %v1990_v59, %v1989_v21  ;;  %v3427_v25 = vld [vmem:[%s5252_s5 + $0x48] ss:$16 sps:$4 sm:$0xff]  }
 0x24c   : > { %v2021_v39 = vpack.c.bf16 %v1988_v42, %v1987_v53  ;;  %v2259_v53 = vpop.permute.xlu0 %2258  ;;  %v3666_v42 = vld [vmem:[%s3863_s24 + $0x18] sm:$0xff] }
 0x24e   : > { %3175 = vmatprep.subr.bf16.mxu1 %v2021_v39 }
 0x24f   : > { %3176 = vmatpush3.bf16.msra.mxu1 %v2013_v6 }
 0x250   : > { %3177 = vmatprep.subr.bf16.mxu1 %v2022_v51 }
 0x253   : > { %3178 = vmatpush3.bf16.msra.mxu1 %v2014_v13 }
 0x256   : > { %2201 = vmatmul.mubr.bf16.vlgmr.msra.gmra.mrb[16].mxu1 %v3419_v12  ;;  %v2254_v12 = vpop.permute.xlu1 %2253 }
 0x257   : > { %2208 = vmatprep.mubr.bf16.mxu1 %v3422_v18 }
 0x25e   : > { %2209 = vmatmul.mubr.bf16.gmra.mrb[20].mxu1 %v3424_v63 }
 0x25f   : > { %2216 = vmatprep.mubr.bf16.mxu1 %v3425_v23 }
 0x266   : > { %2217 = vmatmul.mubr.bf16.gmra.mrb[24].mxu1 %v3427_v25 }
 0x267   : > { %2224 = vmatprep.mubr.bf16.mxu1 %v3428_v32 }
 0x26e   : > { %2225 = vmatmul.mubr.bf16.gmra.mrb[28].mxu1 %v3430_v17 }
 0x26f   : > { %2556 = vmatprep.mubr.bf16.mxu1 %v5290_v20 }
 0x2eb   : > { %v3139_v47 = vpop.f32.mrb[0].mxu1 }
 0x2ec   : > { %v3140_v37 = vpop.f32.mrb[1].mxu1 }
 0x2ed   : > { %v3141_v13 = vadd.f32 %v3140_v37, %v3139_v47  ;;  %v3142_v6 = vpop.f32.mrb[2].mxu1 }
 0x2ee   : > { %v3143_v56 = vpop.f32.mrb[3].mxu1 }
 0x2ef   : > { %v3144_v1 = vadd.f32 %v3143_v56, %v3142_v6 }
 0x2f3   : > { %v3145_v11 = vpop.f32.mrb[4].mxu1 }
 0x2f4   : > { %v3146_v35 = vpop.f32.mrb[5].mxu1 }
 0x2f5   : > { %v3147_v26 = vadd.f32 %v3146_v35, %v3145_v11  ;;  %v3148_v24 = vpop.f32.mrb[6].mxu1  ;;  %v2269_v35 = vpop.permute.xlu0 %2268 }
 0x2f6   : > { %v3149_v46 = vpop.f32.mrb[7].mxu1 }
 0x2f7   : > { %v3150_v2 = vadd.f32 %v3149_v46, %v3148_v24 }
 0x2fb   : > { %v3151_v16 = vpop.f32.mrb[8].mxu1 }
 0x2fc   : > { %v3152_v15 = vpop.f32.mrb[9].mxu1 }
 0x2fd   : > { %v3153_v36 = vadd.f32 %v3152_v15, %v3151_v16  ;;  %v3154_v54 = vpop.f32.mrb[10].mxu1  ;;  %v3433_v15 = vld [vmem:[%s5256_s9 + $0x4] ss:$8 sps:$4 sm:$0xff]  }
 0x2fe   : > { %v3155_v33 = vpop.f32.mrb[11].mxu1  ;;  %2524 = vmatprep.subr.bf16.mxu1 %v3433_v15 }
 0x2ff   : > { %v3156_v5 = vadd.f32 %v3155_v33, %v3154_v54 }
 0x303   : > { %v3157_v8 = vpop.f32.mrb[12].mxu1 }
 0x304   : > { %v3158_v28 = vpop.f32.mrb[13].mxu1 }
 0x305   : > { %v4887_v61 = vadd.f32 %v3158_v28, %v3157_v8  ;;  %v3160_v57 = vpop.f32.mrb[14].mxu1  ;;  %v3431_v8 = vld [vmem:[%s5256_s9] ss:$8 sps:$4 sm:$0xff]  }
 0x306   : > { %v3161_v27 = vpop.f32.mrb[15].mxu1  ;;  %2525 = vmatpush1.bf16.msra.mxu1 %v3431_v8 }
 0x307   : > { %v4889_v60 = vadd.f32 %v3161_v27, %v3160_v57 }
 0x329   : > { %v3179_v9 = vpop.f32.mrb[16].mxu1 }
 0x32a   : > { %v3180_v43 = vpop.f32.mrb[17].mxu1 }
 0x32b   : > { %v3181_v34 = vadd.f32 %v3180_v43, %v3179_v9  ;;  %v3182_v14 = vpop.f32.mrb[18].mxu1  ;;  %v3436_v9 = vld [vmem:[%s5256_s9 + $0x14] ss:$8 sps:$4 sm:$0xff]  }
 0x32c   : > { %v3183_v22 = vpop.f32.mrb[19].mxu1  ;;  %v3669_v43 = vld [vmem:[%s3863_s24 + $0x30] sm:$0xff]  ;;  %2526 = vmatprep.subr.bf16.mxu1 %v3436_v9 }
 0x32d   : > { %v2203_v7 = vadd.f32 %v3181_v34, %v3141_v13  ;;  %v3184_v44 = vadd.f32 %v3183_v22, %v3182_v14  ;;  %v3667_v13 = vld [vmem:[%s3863_s24 + $0x20] sm:$0xff] }
 0x32f   : > { %v2233_v3 = vadd.f32 %v3663_v29, %v2203_v7  ;;  %v2206_v62 = vadd.f32 %v3184_v44, %v3144_v1  ;;  %v3434_v7 = vld [vmem:[%s5256_s9 + $0x10] ss:$8 sps:$4 sm:$0xff]  }
 0x330   : > { %v3670_v44 = vld [vmem:[%s3863_s24 + $0x38] sm:$0xff]  ;;  %2527 = vmatpush1.bf16.msra.mxu1 %v3434_v7 }
 0x331   : > { %v4892_v0 = vadd.f32 %v2244_v58, %v2233_v3  ;;  %v2234_v19 = vadd.f32 %v3664_v55, %v2206_v62  ;;  %v3185_v48 = vpop.f32.mrb[20].mxu1  ;;  %v2279_v62 = vpop.permute.xlu0 %2278 }
 0x332   : > { %v3186_v45 = vpop.f32.mrb[21].mxu1 }
 0x333   : > { %v4895_v40 = vadd.f32 %v2249_v41, %v2234_v19  ;;  %v3187_v31 = vadd.f32 %v3186_v45, %v3185_v48  ;;  %v3188_v38 = vpop.f32.mrb[22].mxu1  ;;  %2289 = vadd.xlane.f32.xlu1 %v4892_v0  ;;  %v2313_v59 = vmul.f32 %v4892_v0, %v4892_v0  ;;  %v3437_v19 = vld [vmem:[%s5256_s9 + $0x20] ss:$8 sps:$4 sm:$0xff]   ;;  %v3442_v48 = vld [vmem:[%s5256_s9 + $0x34] ss:$8 sps:$4 sm:$0xff]  }
 0x334   : > { %v3189_v10 = vpop.f32.mrb[23].mxu1 }
 0x335   : > { %v2211_v4 = vadd.f32 %v3187_v31, %v3147_v26  ;;  %v3190_v30 = vadd.f32 %v3189_v10, %v3188_v38  ;;  %2291 = vadd.xlane.f32.xlu0 %v4895_v40  ;;  %v2314_v50 = vmul.f32 %v4895_v40, %v4895_v40  ;;  %v3668_v26 = vld [vmem:[%s3863_s24 + $0x28] sm:$0xff]  ;;  %v3440_v31 = vld [vmem:[%s5256_s9 + $0x30] ss:$8 sps:$4 sm:$0xff]  }
 0x336   : > { %v3445_v38 = vld [vmem:[%s5256_s9 + $0x44] ss:$8 sps:$4 sm:$0xff]   ;;  %v3443_v10 = vld [vmem:[%s5256_s9 + $0x40] ss:$8 sps:$4 sm:$0xff]  }
 0x337   : > { %v2235_v49 = vadd.f32 %v3665_v52, %v2211_v4  ;;  %v2214_v21 = vadd.f32 %v3190_v30, %v3150_v2  ;;  %2323 = vadd.xlane.f32.xlu1 %v2314_v50  ;;  %v2264_v2 = vpop.permute.xlu1 %2263  ;;  %v3448_v4 = vld [vmem:[%s5256_s9 + $0x54] ss:$8 sps:$4 sm:$0xff]   ;;  %v3446_v30 = vld [vmem:[%s5256_s9 + $0x50] ss:$8 sps:$4 sm:$0xff]   ;;  %v3451_v50 = vld [vmem:[%s5256_s9 + $0x64] ss:$8 sps:$4 sm:$0xff]  }
 0x338   : > { %v3449_v52 = vld [vmem:[%s5256_s9 + $0x60] ss:$8 sps:$4 sm:$0xff]  }
 0x339   : > { %v2236_v51 = vadd.f32 %v3666_v42, %v2214_v21  ;;  %v3191_v39 = vpop.f32.mrb[24].mxu1  ;;  %2321 = vadd.xlane.f32.xlu0 %v2313_v59  ;;  %v4905_v63 = vadd.f32 %v2254_v12, %v2235_v49  ;;  %v3454_v49 = vld [vmem:[%s5256_s9 + $0x74] ss:$8 sps:$4 sm:$0xff]   ;;  %v3452_v21 = vld [vmem:[%s5256_s9 + $0x70] ss:$8 sps:$4 sm:$0xff]   ;;  %v3455_v59 = vld [vmem:[%s5258_s11 + $0x40] sm:$0xff]  }
 0x33a   : > { %v3192_v18 = vpop.f32.mrb[25].mxu1  ;;  %v5000_v42 = vld [vmem:[%s5258_s11 + $0x48] sm:$0xff]   ;;  %3203 = vmatprep.subr.bf16.mxu0 %v3455_v59  ;;  %v5018_v12 = vld [vmem:[%s5258_s11 + $0x10] sm:$0xff]  }
 0x33b   : > { %v4907_v23 = vadd.f32 %v2259_v53, %v2236_v51  ;;  %v3193_v25 = vadd.f32 %v3192_v18, %v3191_v39  ;;  %v3194_v32 = vpop.f32.mrb[26].mxu1  ;;  %v2315_v11 = vmul.f32 %v4905_v63, %v4905_v63  ;;  %v2274_v3 = vpop.permute.xlu1 %2273  ;;  %v4995_v53 = vld [vmem:[%s5258_s11] sm:$0xff]   ;;  %v5006_v51 = vld [vmem:[%s5258_s11 + $0x8] sm:$0xff]   ;;  %v5012_v39 = vld [vmem:[%s5258_s11 + $0x50] sm:$0xff]  }
 0x33c   : > { %v3195_v17 = vpop.f32.mrb[27].mxu1  ;;  %3204 = vmatpush3.bf16.msra.mxu0 %v4995_v53  ;;  %v5024_v18 = vld [vmem:[%s5258_s11 + $0x58] sm:$0xff]  }
 0x33d   : > { %v2219_v47 = vadd.f32 %v3193_v25, %v3153_v36  ;;  %v3196_v37 = vadd.f32 %v3195_v17, %v3194_v32  ;;  %2295 = vadd.xlane.f32.xlu1 %v4907_v23  ;;  %2293 = vadd.xlane.f32.xlu0 %v4905_v63  ;;  %v2316_v1 = vmul.f32 %v4907_v23, %v4907_v23  ;;  %v5030_v25 = vld [vmem:[%s5258_s11 + $0x18] sm:$0xff]   ;;  %v5036_v32 = vld [vmem:[%s5258_s11 + $0x60] sm:$0xff]  }
 0x33e   : > { %3205 = vmatprep.subr.bf16.mxu0 %v5000_v42  ;;  %v5042_v17 = vld [vmem:[%s5258_s11 + $0x20] sm:$0xff]  }
 0x33f   : > { %v2237_v6 = vadd.f32 %v3667_v13, %v2219_v47  ;;  %v2222_v56 = vadd.f32 %v3196_v37, %v3156_v5 }
 0x340   : > { %3206 = vmatpush3.bf16.msra.mxu0 %v5006_v51 }
 0x341   : > { %v2238_v24 = vadd.f32 %v3668_v26, %v2222_v56  ;;  %v3197_v46 = vpop.f32.mrb[28].mxu1  ;;  %2327 = vadd.xlane.f32.xlu1 %v2316_v1  ;;  %2325 = vadd.xlane.f32.xlu0 %v2315_v11  ;;  %v4920_v36 = vadd.f32 %v2264_v2, %v2237_v6 }
 0x342   : > { %v3198_v16 = vpop.f32.mrb[29].mxu1  ;;  %3207 = vmatprep.subr.bf16.mxu0 %v5012_v39 }
 0x343   : > { %v4922_v54 = vadd.f32 %v2269_v35, %v2238_v24  ;;  %v3199_v33 = vadd.f32 %v3198_v16, %v3197_v46  ;;  %v3200_v5 = vpop.f32.mrb[30].mxu1 }
 0x344   : > { %v3201_v28 = vpop.f32.mrb[31].mxu1  ;;  %3208 = vmatpush3.bf16.msra.mxu0 %v5018_v12 }
 0x345   : > { %v2227_v57 = vadd.f32 %v3199_v33, %v4887_v61  ;;  %v3202_v27 = vadd.f32 %v3201_v28, %v3200_v5  ;;  %2299 = vadd.xlane.f32.xlu1 %v4922_v54  ;;  %2297 = vadd.xlane.f32.xlu0 %v4920_v36  ;;  %v2318_v22 = vmul.f32 %v4922_v54, %v4922_v54 }
 0x346   : > { %v2317_v61 = vmul.f32 %v4920_v36, %v4920_v36  ;;  %3209 = vmatprep.subr.bf16.mxu0 %v5024_v18 }
 0x347   : > { %v2239_v34 = vadd.f32 %v3669_v43, %v2227_v57  ;;  %v2230_v14 = vadd.f32 %v3202_v27, %v4889_v60  ;;  %v3439_v60 = vld [vmem:[%s5256_s9 + $0x24] ss:$8 sps:$4 sm:$0xff]  }
 0x348   : > { %2528 = vmatprep.subr.bf16.mxu1 %v3439_v60  ;;  %3210 = vmatpush3.bf16.msra.mxu0 %v5030_v25 }
 0x349   : > { %v2240_v29 = vadd.f32 %v3670_v44, %v2230_v14  ;;  %2331 = vadd.xlane.f32.xlu1 %v2318_v22  ;;  %2329 = vadd.xlane.f32.xlu0 %v2317_v61  ;;  %v4946_v58 = vadd.f32 %v2274_v3, %v2239_v34 }
 0x34a   : > { %2529 = vmatpush1.bf16.msra.mxu1 %v3437_v19  ;;  %3211 = vmatprep.subr.bf16.mxu0 %v5036_v32 }
 0x34b   : > { %v4948_v55 = vadd.f32 %v2279_v62, %v2240_v29  ;;  %v2319_v45 = vmul.f32 %v4946_v58, %v4946_v58  ;;  %2530 = vmatprep.subr.bf16.mxu1 %v3442_v48 }
 0x34c   : > { %3212 = vmatpush3.bf16.msra.mxu0 %v5042_v17 }
 0x34d   : > { %2303 = vadd.xlane.f32.xlu1 %v4948_v55  ;;  %2301 = vadd.xlane.f32.xlu0 %v4946_v58  ;;  %v2320_v41 = vmul.f32 %v4948_v55, %v4948_v55 }
 0x34e   : > { %2531 = vmatpush1.bf16.msra.mxu1 %v3440_v31 }
 0x34f   : > { %2532 = vmatprep.subr.bf16.mxu1 %v3445_v38 }
 0x351   : > { %2335 = vadd.xlane.f32.xlu1 %v2320_v41  ;;  %2333 = vadd.xlane.f32.xlu0 %v2319_v45 }
 0x352   : > { %2533 = vmatpush1.bf16.msra.mxu1 %v3443_v10 }
 0x353   : > { %2534 = vmatprep.subr.bf16.mxu1 %v3448_v4 }
 0x356   : > { %2535 = vmatpush1.bf16.msra.mxu1 %v3446_v30 }
 0x357   : > { %2536 = vmatprep.subr.bf16.mxu1 %v3451_v50 }
 0x35a   : > { %2537 = vmatpush1.bf16.msra.mxu1 %v3449_v52 }
 0x35b   : > { %2538 = vmatprep.subr.bf16.mxu1 %v3454_v49 }
 0x35e   : > { %2539 = vmatpush1.bf16.msra.mxu1 %v3452_v21  ;;  %v5066_v21 = vld [vmem:[%s5254_s7] ss:$0 sm:$0xff] }
 0x35f   : > { %3315 = vmatprep.subr.bf16.mxu1 %v3455_v59 }
 0x3c0   : > { %v2290_v47 = vpop.xlane.xlu1 %2289 }
 0x3c1   : > { %v2305_v13 = vmul.f32 0.0078125, %v2290_v47 }
 0x3c2   : > { %v2292_v37 = vpop.xlane.xlu0 %2291 }
 0x3c3   : > { %v2306_v6 = vmul.f32 0.0078125, %v2292_v37  ;;  %v2345_v26 = vmul.f32 %v2305_v13, %v2305_v13  ;;  %v2369_v59 = vsub.f32 %v4892_v0, %v2305_v13  ;;  %v5077_v13 = vld [vmem:[%s5255_s8] ss:$0 sm:$0xff] }
 0x3c4   : > { %v2324_v56 = vpop.xlane.xlu1 %2323 }
 0x3c5   : > { %v2346_v1 = vmul.f32 %v2306_v6, %v2306_v6  ;;  %v2338_v11 = vmul.f32 0.0078125, %v2324_v56  ;;  %v2370_v31 = vsub.f32 %v4895_v40, %v2306_v6 }
 0x3c6   : > { %v2322_v35 = vpop.xlane.xlu0 %2321 }
 0x3c7   : > { %v2354_v24 = vsub.f32 %v2338_v11, %v2346_v1  ;;  %v2337_v46 = vmul.f32 0.0078125, %v2322_v35 }
 0x3c9   : > { %v2362_v2 = vmax.f32 %v2354_v24, 0.0  ;;  %v2353_v16 = vsub.f32 %v2337_v46, %v2345_v26 }
 0x3ca   : > { %v2294_v15 = vpop.xlane.xlu0 %2293  ;;  %v2296_v33 = vpop.xlane.xlu1 %2295 }
 0x3cb   : > { %v2378_v5 = vadd.f32 1e-05, %v2362_v2  ;;  %v2361_v8 = vmax.f32 %v2353_v16, 0.0  ;;  %v5046_v28 = vmul.f32 0.0078125, %v2294_v15  ;;  %v5048_v57 = vmul.f32 0.0078125, %v2296_v33 }
 0x3cd   : > { %3615 = vrsqrt.f32 %v2378_v5  ;;  %v2377_v27 = vadd.f32 1e-05, %v2361_v8  ;;  %v2347_v9 = vmul.f32 %v5046_v28, %v5046_v28  ;;  %v2348_v14 = vmul.f32 %v5048_v57, %v5048_v57 }
 0x3ce   : > { %v2326_v43 = vpop.xlane.xlu0 %2325  ;;  %v2328_v34 = vpop.xlane.xlu1 %2327 }
 0x3cf   : > { %3617 = vrsqrt.f32 %v2377_v27  ;;  %v2339_v22 = vmul.f32 0.0078125, %v2326_v43  ;;  %v2340_v61 = vmul.f32 0.0078125, %v2328_v34 }
 0x3d1   : > { %v2355_v7 = vsub.f32 %v2339_v22, %v2347_v9  ;;  %v2356_v44 = vsub.f32 %v2340_v61, %v2348_v14 }
 0x3d2   : > { %v2298_v29 = vpop.xlane.xlu0 %2297  ;;  %v2300_v3 = vpop.xlane.xlu1 %2299 }
 0x3d3   : > { %v2363_v62 = vmax.f32 %v2355_v7, 0.0  ;;  %v2364_v60 = vmax.f32 %v2356_v44, 0.0  ;;  %v5054_v19 = vmul.f32 0.0078125, %v2298_v29  ;;  %v5056_v48 = vmul.f32 0.0078125, %v2300_v3 }
 0x3d4   : > { %v2371_v7 = vsub.f32 %v4905_v63, %v5046_v28  ;;  %v2372_v3 = vsub.f32 %v4907_v23, %v5048_v57 }
 0x3d5   : > { %v2379_v41 = vadd.f32 1e-05, %v2363_v62  ;;  %v2380_v45 = vadd.f32 1e-05, %v2364_v60  ;;  %v2349_v38 = vmul.f32 %v5054_v19, %v5054_v19  ;;  %v2350_v50 = vmul.f32 %v5056_v48, %v5056_v48 }
 0x3d6   : > { %v2330_v10 = vpop.xlane.xlu0 %2329  ;;  %v2332_v4 = vpop.xlane.xlu1 %2331 }
 0x3d7   : > { %v3616_v30 = vpop.eup %3615  ;;  %3619 = vrsqrt.f32 %v2379_v41  ;;  %v2341_v52 = vmul.f32 0.0078125, %v2330_v10  ;;  %v2342_v49 = vmul.f32 0.0078125, %v2332_v4 }
 0x3d8   : > { %v2394_v47 = vmul.f32 %v3616_v30, %v2370_v31  ;;  %3621 = vrsqrt.f32 %v2380_v45 }
 0x3d9   : > { %v3618_v37 = vpop.eup %3617  ;;  %v2357_v6 = vsub.f32 %v2341_v52, %v2349_v38  ;;  %v2358_v56 = vsub.f32 %v2342_v49, %v2350_v50  ;;  %v2373_v49 = vsub.f32 %v4920_v36, %v5054_v19 }
 0x3da   : > { %v2393_v1 = vmul.f32 %v3618_v37, %v2369_v59  ;;  %v2302_v11 = vpop.xlane.xlu0 %2301  ;;  %v2304_v35 = vpop.xlane.xlu1 %2303  ;;  %v2408_v26 = vmul.f32 %v5066_v21, %v2394_v47 }
 0x3db   : > { %v2365_v24 = vmax.f32 %v2357_v6, 0.0  ;;  %v2366_v46 = vmax.f32 %v2358_v56, 0.0  ;;  %v5070_v2 = vmul.f32 0.0078125, %v2302_v11  ;;  %v5072_v16 = vmul.f32 0.0078125, %v2304_v35 }
 0x3dc   : > { %v2407_v15 = vmul.f32 %v5066_v21, %v2393_v1  ;;  %v2422_v34 = vadd.f32 %v5077_v13, %v2408_v26 }
 0x3dd   : > { %v2381_v33 = vadd.f32 1e-05, %v2365_v24  ;;  %v2382_v5 = vadd.f32 1e-05, %v2366_v46  ;;  %v2351_v8 = vmul.f32 %v5070_v2, %v5070_v2  ;;  %v2352_v14 = vmul.f32 %v5072_v16, %v5072_v16 }
 0x3de   : > { %v2334_v27 = vpop.xlane.xlu0 %2333  ;;  %v2336_v9 = vpop.xlane.xlu1 %2335  ;;  %v2421_v43 = vadd.f32 %v5077_v13, %v2407_v15  ;;  %v2376_v11 = vsub.f32 %v4948_v55, %v5072_v16  ;;  %v3470_v15 = vld [vmem:[%s5258_s11 + $0x38] sm:$0xff]  }
 0x3df   : > { %3623 = vrsqrt.f32 %v2381_v33  ;;  %v2343_v22 = vmul.f32 0.0078125, %v2334_v27  ;;  %v2344_v61 = vmul.f32 0.0078125, %v2336_v9  ;;  %v2434_v33 = vlaneseq  ;;  %v618_v27 = vld [vmem:[%s5257_s10] sm:$0x3] }
 0x3e0   : > { %3625 = vrsqrt.f32 %v2382_v5  ;;  %v2429_v44 = vpack.c.bf16 %v2422_v34, %v2421_v43 }
 0x3e1   : > { %v3620_v29 = vpop.eup %3619  ;;  %v2359_v62 = vsub.f32 %v2343_v22, %v2351_v8  ;;  %v2360_v60 = vsub.f32 %v2344_v61, %v2352_v14  ;;  %v2435_v5 = vshrl.u32 %v2434_v33, 7 }
 0x3e2   : > { %v3622_v41 = vpop.eup %3621  ;;  %2557 = vmatmul.mubr.bf16.vlgmr.msra.gmra.mrb[32].mxu1 %v2429_v44  ;;  %v2395_v45 = vmul.f32 %v3620_v29, %v2371_v7 }
 0x3e3   : > { %v2367_v31 = vmax.f32 %v2359_v62, 0.0  ;;  %v2368_v38 = vmax.f32 %v2360_v60, 0.0  ;;  %2566 = vmatprep.mubr.bf16.mxu1 %v5290_v20  ;;  %v2396_v10 = vmul.f32 %v3622_v41, %v2372_v3  ;;  %3323 = vmatpush3.bf16.msra.mxu1 %v4995_v53  ;;  %v2436_v8 = vsub.s32 0, %v2435_v5 }
 0x3e4   : > { %v2409_v28 = vmul.f32 %v5066_v21, %v2395_v45  ;;  %3316 = vmatprep.subr.bf16.mxu1 %v5000_v42  ;;  %v2374_v42 = vsub.f32 %v4922_v54, %v5056_v48  ;;  %v2375_v48 = vsub.f32 %v4946_v58, %v5070_v2  ;;  %v2440_v9 = vsub.s32 1, %v2435_v5 }
 0x3e5   : > { %v2383_v4 = vadd.f32 1e-05, %v2367_v31  ;;  %v2384_v30 = vadd.f32 1e-05, %v2368_v38  ;;  %v2410_v57 = vmul.f32 %v5066_v21, %v2396_v10  ;;  %v5143_v43 = vrot.slane %v618_v27, %v2436_v8 }
 0x3e6   : > { %v2423_v50 = vadd.f32 %v5077_v13, %v2409_v28  ;;  %v5145_v34 = vrot.slane %v618_v27, %v2440_v9 }
 0x3e7   : > { %3627 = vrsqrt.f32 %v2383_v4  ;;  %v2424_v52 = vadd.f32 %v5077_v13, %v2410_v57  ;;  %3324 = vmatpush3.bf16.msra.mxu1 %v5006_v51 }
 0x3e8   : > { %3629 = vrsqrt.f32 %v2384_v30  ;;  %3317 = vmatprep.subr.bf16.mxu1 %v5012_v39 }
 0x3e9   : > { %v3624_v53 = vpop.eup %3623  ;;  %v2430_v59 = vpack.c.bf16 %v2424_v52, %v2423_v50 }
 0x3ea   : > { %v3626_v47 = vpop.eup %3625  ;;  %v2397_v37 = vmul.f32 %v3624_v53, %v2373_v49 }
 0x3eb   : > { %2567 = vmatmul.mubr.bf16.gmra.mrb[36].mxu1 %v2430_v59  ;;  %v2398_v6 = vmul.f32 %v3626_v47, %v2374_v42 }
 0x3ec   : > { %2576 = vmatprep.mubr.bf16.mxu1 %v5290_v20  ;;  %v2411_v56 = vmul.f32 %v5066_v21, %v2397_v37  ;;  %3325 = vmatpush3.bf16.msra.mxu1 %v5018_v12 }
 0x3ed   : > { %v2412_v51 = vmul.f32 %v5066_v21, %v2398_v6  ;;  %3318 = vmatprep.subr.bf16.mxu1 %v5024_v18 }
 0x3ee   : > { %v2425_v39 = vadd.f32 %v5077_v13, %v2411_v56 }
 0x3ef   : > { %v2426_v19 = vadd.f32 %v5077_v13, %v2412_v51 }
 0x3f0   : > { %3326 = vmatpush3.bf16.msra.mxu1 %v5030_v25 }
 0x3f1   : > { %v3628_v1 = vpop.eup %3627  ;;  %v2431_v35 = vpack.c.bf16 %v2426_v19, %v2425_v39  ;;  %3319 = vmatprep.subr.bf16.mxu1 %v5036_v32  ;;  %v3465_v32 = vld [vmem:[%s5258_s11 + $0x68] sm:$0xff]  }
 0x3f2   : > { %v3630_v12 = vpop.eup %3629  ;;  %v2399_v26 = vmul.f32 %v3628_v1, %v2375_v48  ;;  %3213 = vmatprep.subr.bf16.mxu0 %v3465_v32 }
 0x3f3   : > { %2577 = vmatmul.mubr.bf16.gmra.mrb[40].mxu1 %v2431_v35  ;;  %v2400_v18 = vmul.f32 %v3630_v12, %v2376_v11 }
 0x3f4   : > { %2586 = vmatprep.mubr.bf16.mxu1 %v5290_v20  ;;  %v2413_v24 = vmul.f32 %v5066_v21, %v2399_v26  ;;  %3327 = vmatpush3.bf16.msra.mxu1 %v5042_v17  ;;  %v3466_v20 = vld [vmem:[%s5258_s11 + $0x28] sm:$0xff]   ;;  %v3467_v17 = vld [vmem:[%s5258_s11 + $0x70] sm:$0xff]  }
 0x3f5   : > { %v2414_v46 = vmul.f32 %v5066_v21, %v2400_v18  ;;  %3320 = vmatprep.subr.bf16.mxu1 %v3465_v32  ;;  %3214 = vmatpush3.bf16.msra.mxu0 %v3466_v20  ;;  %v3468_v21 = vld [vmem:[%s5258_s11 + $0x30] sm:$0xff]  }
 0x3f6   : > { %v2427_v25 = vadd.f32 %v5077_v13, %v2413_v24  ;;  %3215 = vmatprep.subr.bf16.mxu0 %v3467_v17 }
 0x3f7   : > { %v2428_v2 = vadd.f32 %v5077_v13, %v2414_v46  ;;  %v3469_v13 = vld [vmem:[%s5258_s11 + $0x78] sm:$0xff]  }
 0x3f8   : > { %3328 = vmatpush3.bf16.msra.mxu1 %v3466_v20 }
 0x3f9   : > { %v2432_v16 = vpack.c.bf16 %v2428_v2, %v2427_v25  ;;  %3321 = vmatprep.subr.bf16.mxu1 %v3467_v17  ;;  %3216 = vmatpush3.bf16.msra.mxu0 %v3468_v21 }
 0x3fa   : > { %3217 = vmatprep.subr.bf16.mxu0 %v3469_v13 }
 0x3fb   : > { %2587 = vmatmul.mubr.bf16.gmra.mrb[44].mxu1 %v2432_v16 }
 0x3fc   : > { %3329 = vmatpush3.bf16.msra.mxu1 %v3468_v21 }
 0x3fd   : > { %3322 = vmatprep.subr.bf16.mxu1 %v3469_v13  ;;  %3218 = vmatpush3.bf16.msra.mxu0 %v3470_v15 }
 0x400   : > { %3330 = vmatpush3.bf16.msra.mxu1 %v3470_v15 }
 0x4b5   : > { %v2558_v14 = vpop.f32.mrb[32].mxu1 }
 0x4b6   : > { %v2559_v22 = vadd.f32 %v2558_v14, %v5143_v43  ;;  %v2560_v61 = vpop.f32.mrb[33].mxu1 }
 0x4b7   : > { %v2561_v7 = vadd.f32 %v2560_v61, %v5145_v34  ;;  %v2562_v44 = vpop.f32.mrb[34].mxu1 }
 0x4b8   : > { %v2613_v29 = vmul.f32 0.70710677, %v2559_v22  ;;  %v2563_v3 = vadd.f32 %v2562_v44, %v5143_v43  ;;  %v2564_v62 = vpop.f32.mrb[35].mxu1  ;;  %v2597_v48 = vmul.f32 0.5, %v2559_v22 }
 0x4b9   : > { %v2614_v60 = vmul.f32 0.70710677, %v2561_v7  ;;  %v2565_v41 = vadd.f32 %v2564_v62, %v5145_v34  ;;  %v2598_v26 = vmul.f32 0.5, %v2561_v7 }
 0x4ba   : > { %3631 = verf.f32 %v2613_v29  ;;  %v2615_v45 = vmul.f32 0.70710677, %v2563_v3  ;;  %v2599_v1 = vmul.f32 0.5, %v2563_v3 }
 0x4bb   : > { %3633 = verf.f32 %v2614_v60  ;;  %v2616_v31 = vmul.f32 0.70710677, %v2565_v41  ;;  %v2600_v18 = vmul.f32 0.5, %v2565_v41 }
 0x4bc   : > { %3635 = verf.f32 %v2615_v45 }
 0x4bd   : > { %3637 = verf.f32 %v2616_v31 }
 0x4be   : > { %v2568_v38 = vpop.f32.mrb[36].mxu1 }
 0x4bf   : > { %v2569_v10 = vadd.f32 %v2568_v38, %v5143_v43  ;;  %v2570_v28 = vpop.f32.mrb[37].mxu1 }
 0x4c0   : > { %v2571_v4 = vadd.f32 %v2570_v28, %v5145_v34  ;;  %v2572_v30 = vpop.f32.mrb[38].mxu1 }
 0x4c1   : > { %v2617_v57 = vmul.f32 0.70710677, %v2569_v10  ;;  %v2573_v50 = vadd.f32 %v2572_v30, %v5143_v43  ;;  %v2574_v52 = vpop.f32.mrb[39].mxu1  ;;  %v2601_v41 = vmul.f32 0.5, %v2569_v10 }
 0x4c2   : > { %v2618_v49 = vmul.f32 0.70710677, %v2571_v4  ;;  %v2575_v53 = vadd.f32 %v2574_v52, %v5145_v34  ;;  %v2602_v30 = vmul.f32 0.5, %v2571_v4 }
 0x4c3   : > { %3639 = verf.f32 %v2617_v57  ;;  %v2619_v42 = vmul.f32 0.70710677, %v2573_v50  ;;  %v2603_v45 = vmul.f32 0.5, %v2573_v50 }
 0x4c4   : > { %v3632_v59 = vpop.eup %3631  ;;  %3641 = verf.f32 %v2618_v49  ;;  %v2620_v47 = vmul.f32 0.70710677, %v2575_v53  ;;  %v2604_v57 = vmul.f32 0.5, %v2575_v53 }
 0x4c5   : > { %v3634_v37 = vpop.eup %3633  ;;  %v2645_v6 = vadd.f32 1.0, %v3632_v59  ;;  %3643 = verf.f32 %v2619_v42 }
 0x4c6   : > { %v3636_v56 = vpop.eup %3635  ;;  %v2646_v51 = vadd.f32 1.0, %v3634_v37  ;;  %3645 = verf.f32 %v2620_v47  ;;  %v2578_v39 = vpop.f32.mrb[40].mxu1 }
 0x4c7   : > { %v3638_v19 = vpop.eup %3637  ;;  %v2647_v11 = vadd.f32 1.0, %v3636_v56  ;;  %v5156_v35 = vadd.f32 %v2578_v39, %v5143_v43  ;;  %v2580_v12 = vpop.f32.mrb[41].mxu1  ;;  %v2661_v2 = vmul.f32 %v2645_v6, %v2597_v48 }
 0x4c8   : > { %v2648_v24 = vadd.f32 1.0, %v3638_v19  ;;  %v5159_v46 = vadd.f32 %v2580_v12, %v5145_v34  ;;  %v2582_v25 = vpop.f32.mrb[42].mxu1  ;;  %v2662_v21 = vmul.f32 %v2646_v51, %v2598_v26 }
 0x4c9   : > { %v2663_v16 = vmul.f32 %v2647_v11, %v2599_v1  ;;  %v2621_v32 = vmul.f32 0.70710677, %v5156_v35  ;;  %v2583_v20 = vadd.f32 %v2582_v25, %v5143_v43  ;;  %v2584_v17 = vpop.f32.mrb[43].mxu1 }
 0x4ca   : > { %v2664_v13 = vmul.f32 %v2648_v24, %v2600_v18  ;;  %v2622_v15 = vmul.f32 0.70710677, %v5159_v46  ;;  %v2585_v33 = vadd.f32 %v2584_v17, %v5145_v34 }
 0x4cb   : > { %v2677_v5 = vpack.c.bf16 %v2663_v16, %v2661_v2  ;;  %3647 = verf.f32 %v2621_v32  ;;  %v2623_v8 = vmul.f32 0.70710677, %v2583_v20  ;;  %v2607_v18 = vmul.f32 0.5, %v2583_v20 }
 0x4cc   : > { %3649 = verf.f32 %v2622_v15  ;;  %v2624_v27 = vmul.f32 0.70710677, %v2585_v33  ;;  %v2678_v9 = vpack.c.bf16 %v2664_v13, %v2662_v21  ;;  %v2608_v25 = vmul.f32 0.5, %v2585_v33 }
 0x4cd   : > { %v3640_v14 = vpop.eup %3639  ;;  %3651 = verf.f32 %v2623_v8 }
 0x4ce   : > { %v3642_v22 = vpop.eup %3641  ;;  %v2649_v61 = vadd.f32 1.0, %v3640_v14  ;;  %3653 = verf.f32 %v2624_v27  ;;  %v2588_v7 = vpop.f32.mrb[44].mxu1  ;;  %2813 = vmatprep.mubr.bf16.mxu0 %v2678_v9 }
 0x4cf   : > { %v3644_v44 = vpop.eup %3643  ;;  %v2650_v29 = vadd.f32 1.0, %v3642_v22  ;;  %v2589_v3 = vadd.f32 %v2588_v7, %v5143_v43  ;;  %v2590_v62 = vpop.f32.mrb[45].mxu1  ;;  %2814 = vmatmul.mubr.bf16.vlgmr.msra.gmra.mrb[64].mxu0 %v2677_v5 }
 0x4d0   : > { %v3646_v60 = vpop.eup %3645  ;;  %v2651_v31 = vadd.f32 1.0, %v3644_v44  ;;  %v2591_v38 = vadd.f32 %v2590_v62, %v5145_v34  ;;  %v2592_v28 = vpop.f32.mrb[46].mxu1  ;;  %v2665_v59 = vmul.f32 %v2649_v61, %v2601_v41 }
 0x4d1   : > { %v2652_v52 = vadd.f32 1.0, %v3646_v60  ;;  %v2625_v49 = vmul.f32 0.70710677, %v2589_v3  ;;  %v2594_v42 = vpop.f32.mrb[47].mxu1  ;;  %v2593_v6 = vadd.f32 %v2592_v28, %v5143_v43  ;;  %v2666_v56 = vmul.f32 %v2650_v29, %v2602_v30 }
 0x4d2   : > { %v2667_v47 = vmul.f32 %v2651_v31, %v2603_v45  ;;  %v2626_v37 = vmul.f32 0.70710677, %v2591_v38  ;;  %v2595_v10 = vadd.f32 %v2594_v42, %v5145_v34  ;;  %v2605_v43 = vmul.f32 0.5, %v5156_v35 }
 0x4d3   : > { %v2668_v51 = vmul.f32 %v2652_v52, %v2604_v57  ;;  %3655 = verf.f32 %v2625_v49  ;;  %v2627_v39 = vmul.f32 0.70710677, %v2593_v6  ;;  %v2606_v34 = vmul.f32 0.5, %v5159_v46 }
 0x4d4   : > { %v2679_v50 = vpack.c.bf16 %v2667_v47, %v2665_v59  ;;  %3657 = verf.f32 %v2626_v37  ;;  %v2628_v48 = vmul.f32 0.70710677, %v2595_v10  ;;  %v2609_v20 = vmul.f32 0.5, %v2589_v3 }
 0x4d5   : > { %v3648_v19 = vpop.eup %3647  ;;  %v2680_v4 = vpack.c.bf16 %v2668_v51, %v2666_v56  ;;  %3659 = verf.f32 %v2627_v39  ;;  %v2611_v22 = vmul.f32 0.5, %v2593_v6  ;;  %v2610_v33 = vmul.f32 0.5, %v2591_v38  ;;  %v3077_v38 = vld [vmem:[%s5259_s12] ss:$0 sm:$0xff] }
 0x4d6   : > { %v3650_v53 = vpop.eup %3649  ;;  %v2653_v1 = vadd.f32 1.0, %v3648_v19  ;;  %3661 = verf.f32 %v2628_v48  ;;  %v2612_v61 = vmul.f32 0.5, %v2595_v10 }
 0x4d7   : > { %v3652_v11 = vpop.eup %3651  ;;  %v2654_v12 = vadd.f32 1.0, %v3650_v53  ;;  %2821 = vmatprep.mubr.bf16.mxu1 %v2680_v4 }
 0x4d8   : > { %v3654_v26 = vpop.eup %3653  ;;  %v2655_v24 = vadd.f32 1.0, %v3652_v11  ;;  %2822 = vmatmul.mubr.bf16.vlgmr.msra.gmra.mrb[48].mxu1 %v2679_v50  ;;  %v2669_v16 = vmul.f32 %v2653_v1, %v2605_v43 }
 0x4d9   : > { %v2656_v2 = vadd.f32 1.0, %v3654_v26  ;;  %v2670_v17 = vmul.f32 %v2654_v12, %v2606_v34 }
 0x4da   : > { %v2671_v32 = vmul.f32 %v2655_v24, %v2607_v18 }
 0x4db   : > { %v2672_v21 = vmul.f32 %v2656_v2, %v2608_v25 }
 0x4dc   : > { %v2681_v13 = vpack.c.bf16 %v2671_v32, %v2669_v16 }
 0x4dd   : > { %v3656_v15 = vpop.eup %3655  ;;  %v2682_v5 = vpack.c.bf16 %v2672_v21, %v2670_v17 }
 0x4de   : > { %v3658_v8 = vpop.eup %3657  ;;  %v2657_v27 = vadd.f32 1.0, %v3656_v15 }
 0x4df   : > { %2829 = vmatprep.mubr.bf16.mxu1 %v2682_v5  ;;  %v3660_v9 = vpop.eup %3659  ;;  %v2658_v14 = vadd.f32 1.0, %v3658_v8 }
 0x4e0   : > { %2830 = vmatmul.mubr.bf16.gmra.mrb[52].mxu1 %v2681_v13  ;;  %v3662_v35 = vpop.eup %3661  ;;  %v2659_v46 = vadd.f32 1.0, %v3660_v9  ;;  %v2673_v44 = vmul.f32 %v2657_v27, %v2609_v20 }
 0x4e1   : > { %v2660_v7 = vadd.f32 1.0, %v3662_v35  ;;  %v2674_v62 = vmul.f32 %v2658_v14, %v2610_v33 }
 0x4e2   : > { %v2675_v29 = vmul.f32 %v2659_v46, %v2611_v22 }
 0x4e3   : > { %v2676_v60 = vmul.f32 %v2660_v7, %v2612_v61 }
 0x4e4   : > { %v2683_v41 = vpack.c.bf16 %v2675_v29, %v2673_v44 }
 0x4e5   : > { %v2684_v45 = vpack.c.bf16 %v2676_v60, %v2674_v62 }
 0x4e7   : > { %2837 = vmatprep.mubr.bf16.mxu1 %v2684_v45 }
 0x4e8   : > { %2838 = vmatmul.mubr.bf16.gmra.mrb[56].mxu1 %v2683_v41 }
 0x5a2   : > { %v3219_v31 = vpop.f32.mrb[64].mxu0 }
 0x5a3   : > { %v3220_v28 = vpop.f32.mrb[65].mxu0 }
 0x5a4   : > { %v3221_v3 = vadd.f32 %v3220_v28, %v3219_v31  ;;  %v3222_v30 = vpop.f32.mrb[66].mxu0 }
 0x5a5   : > { %v3223_v57 = vpop.f32.mrb[67].mxu0 }
 0x5a6   : > { %v2846_v52 = vadd.f32 %v3221_v3, %v4892_v0  ;;  %v3224_v49 = vadd.f32 %v3223_v57, %v3222_v30 }
 0x5a8   : > { %v2860_v42 = vadd.f32 %v3077_v38, %v2846_v52  ;;  %v2847_v59 = vadd.f32 %v3224_v49, %v4895_v40 }
 0x5aa   : > { %2868 = vst [vmem:[%s5179_s16] sm:$0xff] %v2860_v42  ;;  %v2861_v47 = vadd.f32 %v3077_v38, %v2847_v59 }
 0x5ab   : > { %v3225_v37 = vpop.f32.mrb[48].mxu1 }
 0x5ac   : > { %2869 = vst [vmem:[%s5179_s16 + $0x8] sm:$0xff] %v2861_v47  ;;  %v3226_v6 = vpop.f32.mrb[49].mxu1 }
 0x5ad   : > { %v3227_v56 = vadd.f32 %v3226_v6, %v3225_v37  ;;  %v3228_v51 = vpop.f32.mrb[50].mxu1 }
 0x5ae   : > { %v3229_v10 = vpop.f32.mrb[51].mxu1 }
 0x5af   : > { %v2848_v0 = vadd.f32 %v3227_v56, %v4905_v63  ;;  %v3230_v50 = vadd.f32 %v3229_v10, %v3228_v51 }
 0x5b1   : > { %v2862_v39 = vadd.f32 %v3077_v38, %v2848_v0  ;;  %v2849_v40 = vadd.f32 %v3230_v50, %v4907_v23 }
 0x5b3   : > { %2870 = vst [vmem:[%s5179_s16 + $0x10] sm:$0xff] %v2862_v39  ;;  %v2863_v19 = vadd.f32 %v3077_v38, %v2849_v40  ;;  %v3231_v48 = vpop.f32.mrb[52].mxu1 }
 0x5b4   : > { %v3232_v4 = vpop.f32.mrb[53].mxu1 }
 0x5b5   : > { %2871 = vst [vmem:[%s5179_s16 + $0x18] sm:$0xff] %v2863_v19  ;;  %v3233_v53 = vadd.f32 %v3232_v4, %v3231_v48  ;;  %v3234_v1 = vpop.f32.mrb[54].mxu1 }
 0x5b6   : > { %v3235_v11 = vpop.f32.mrb[55].mxu1 }
 0x5b7   : > { %v2850_v12 = vadd.f32 %v3233_v53, %v4920_v36  ;;  %v3236_v26 = vadd.f32 %v3235_v11, %v3234_v1 }
 0x5b9   : > { %v2864_v63 = vadd.f32 %v3077_v38, %v2850_v12  ;;  %v2851_v43 = vadd.f32 %v3236_v26, %v4922_v54 }
 0x5bb   : > { %2872 = vst [vmem:[%s5179_s16 + $0x20] sm:$0xff] %v2864_v63  ;;  %v2865_v23 = vadd.f32 %v3077_v38, %v2851_v43  ;;  %v3237_v18 = vpop.f32.mrb[56].mxu1 }
 0x5bc   : > { %v3238_v24 = vpop.f32.mrb[57].mxu1 }
 0x5bd   : > { %2873 = vst [vmem:[%s5179_s16 + $0x28] sm:$0xff] %v2865_v23  ;;  %v3239_v34 = vadd.f32 %v3238_v24, %v3237_v18  ;;  %v3240_v25 = vpop.f32.mrb[58].mxu1 }
 0x5be   : > { %v3241_v2 = vpop.f32.mrb[59].mxu1 }
 0x5bf   : > { %v2852_v16 = vadd.f32 %v3239_v34, %v4946_v58  ;;  %v3242_v32 = vadd.f32 %v3241_v2, %v3240_v25 }
 0x5c1   : > { %v2866_v36 = vadd.f32 %v3077_v38, %v2852_v16  ;;  %v2853_v54 = vadd.f32 %v3242_v32, %v4948_v55 }
 0x5c3   : > { %2874 = vst [vmem:[%s5179_s16 + $0x30] sm:$0xff] %v2866_v36  ;;  %v2867_v17 = vadd.f32 %v3077_v38, %v2853_v54 }
 0x5c5   : > { %2875 = vst [vmem:[%s5179_s16 + $0x38] sm:$0xff] %v2867_v17 }
 0x5c6   : > { %3684 = shalt.err (!%p3681_p3)
}
 0x5c7   : > { %s3685_s27 = scalar_lea.hbm %s5198_s0, 1024  ;;  %s3689_s22 = scalar_lea.hbm %s5260_s13, 2048 }
 0x5c8   : > { %p3686_p4 = scmp.ne.s32.totalorder %s5198_s0, %s3685_s27  ;;  %p3690_p9 = scmp.lt.u32.totalorder %s5198_s0, %s5260_s13 }
 0x5c9   : > { %p3691_p10 = scmp.lt.u32.totalorder %s3689_s22, %s3685_s27  ;;  %p3693_p12 = scmp.lt.u32.totalorder %s3685_s27, %s5198_s0 }
 0x5ca   : > { %p3687_p7 = pnand %p3686_p4, %p3847_p5 }
 0x5cb   : > { %p3692_p11 = por %p3691_p10, %p3690_p9 }
 0x5cc   : > { %p3688_p8 = pneg %p3687_p7 }
 0x5cd   : > { %p3694_p13 = por %p3693_p12, %p3692_p11 }
 0x5cf   : > { %p3695_p0 = pnand %p3694_p13, %p3688_p8 }
 0x5d1   : > { %3698 = shalt.err (!%p3695_p0)
}
 0x5d2   : > { %s3737_s29 = smov 128   ;;  %s3738_s30 = smov 8  }
 0x5d3   : > { %3331 = dma.vmem_to_hbm [thread:$0]  (%p3847_p5), %s5200_s21, 1024, %s5198_s0, %s5206_s23, %s3737_s29, %s3737_s29, %s3738_s30  }
 0x5d4 PF: > { %p3337_p1 = scmp.ge.s32.totalorder %s3733_s28, 2  ;;  %s2906_s15 = sand.u32 1, %s3721_s25  }
 0x5d5   : > { %s2907_s27 = scalar_lea.sflag [#allocation3], %s2906_s15 }
 0x5d6   : > { %p3334_p2 = pnand %p3337_p1, %p3851_p6 }
 0x5d8   : > { %3716 = dma.done.wait (!%p3334_p2), %s2907_s27, 1024  }
 0x5d9   : > { %3718 = vsyncadd (!%p3334_p2), %s2907_s27, 4294966272  ;;  %s5291_s16 = sld [smem:[#allocation5_spill]]  ;;  %s5292_s27 = sld [smem:[#allocation6_spill]] }
 0x5da   : > { %p23_p3 = scmp.ge.s32.totalorder %s3834_s14, 4   ;;  %s5293_s25 = smov %s3725_s26 }
 0x5db   : > { %s5295_s28 = smov %s3834_s14 }
 0x5dc   :  { %25 = sbr.rel (!%p23_p3) target bundleno = 5 (0x5), region = 107 }
 0x5df   : > { %s5294_s26 = smov %s5291_s16 }
 0x5e3   :  { %2912 = vsyncpa [#allocation3], 1 }
 0x5e4   :  { %2914 = vsyncpa [#allocation3 + $0x1], 1 }

</bundles_post_ra>
